<compile_context>
chip_gen: v7x
topology: tpu7x:2x2x1
jax: 0.10.0
libtpu: 0.0.40
codegen_flags: <defaults>
</compile_context>

<pallas_src>
import functools

import numpy as np
import jax
import jax.numpy as jnp
from jax.experimental import pallas as pl
from jax.experimental.pallas import tpu as pltpu  # noqa: F401  (kept for completeness)


# ----------------------------- configuration --------------------------------
class Opt:
    vocab_size = 20
    input_encoding_size = 32
    rnn_type = "LSTM_SOFT_ATT"
    rnn_size = 32            # must equal input_encoding_size (fc_feats feeds xt at t==0)
    num_layers = 1
    drop_prob_lm = 0.0       # dropout is a no-op in eval; not modeled
    seq_length = 6
    fc_feat_size = 64
    att_feat_size = 64
    att_size = 16            # number of attention locations
    att_hid = 32             # attention hidden size


opt = Opt()
R = opt.rnn_size
E = opt.input_encoding_size
H = opt.att_hid
A = opt.att_size
V = opt.vocab_size + 1
VP = 128                    # lane-padded projection width (V <= 128)
F_FC = opt.fc_feat_size
F_ATT = opt.att_feat_size
assert E == R, "fc_feats feed xt at t==0; requires input_encoding_size == rnn_size"
assert V <= VP

# bias-slab lane offsets (all 128-aligned)
OFF_IMG_B = 0
OFF_ATT_B = 128
OFF_BV2A = 256
OFF_BH2A = 384
OFF_WAL = 512
OFF_BG = 640
OFF_PROJ_B = 896
NB = 1024


# --------------------------- the single fused kernel -------------------------
def bi_satt_kernel(fc_ref, attf_ref, xseq_ref, embw_ref, wv2a_ref, wh2a_ref,
                   wc_ref, projw_ref, bias_ref, out_ref, *, seq_len, batch, prelu_a):
    B = batch

    # ---- bias slab (static, 128-aligned lane slices; loop-invariant) ----
    img_b = bias_ref[:, OFF_IMG_B:OFF_IMG_B + R]
    att_b = bias_ref[:, OFF_ATT_B:OFF_ATT_B + R]
    bv2a = bias_ref[:, OFF_BV2A:OFF_BV2A + 2 * H]
    bh2a = bias_ref[:, OFF_BH2A:OFF_BH2A + 2 * H]
    walpha = bias_ref[:, OFF_WAL:OFF_WAL + 2 * H]
    bg = bias_ref[:, OFF_BG:OFF_BG + 8 * R]
    proj_b = bias_ref[:, OFF_PROJ_B:OFF_PROJ_B + VP]

    def prelu(y):
        return jnp.maximum(y, 0.0) + prelu_a * jnp.minimum(y, 0.0)

    # ---- embed_feats: PReLU(img_embed(fc)), PReLU(att_embed(att)) ----
    fc_e = prelu(jnp.dot(fc_ref[...], embw_ref[:F_FC, :],
                         preferred_element_type=jnp.float32) + img_b)          # (B, R)
    att_e_flat = prelu(jnp.dot(attf_ref[...], embw_ref[F_FC:, :],
                               preferred_element_type=jnp.float32) + att_b)    # (B*A, R)

    # time-invariant attention projections, both directions lane-packed
    p_att_flat = (jnp.dot(att_e_flat, wv2a_ref[...],
                          preferred_element_type=jnp.float32) + bv2a)          # (B*A, 2H)
    att_e = att_e_flat.reshape(B, A, R)                                        # (B, A, R)
    p_att = p_att_flat.reshape(B, A, 2 * H)                                    # (B, A, 2H)

    # ---- hoisted loop-invariant broadcasts / weight loads ----
    walB = jnp.broadcast_to(walpha.reshape(1, 1, 2 * H), (B, A, 2 * H))
    bh2aB = jnp.broadcast_to(bh2a, (B, 2 * H))
    bgB = jnp.broadcast_to(bg, (B, 8 * R))
    wh2a_w = wh2a_ref[...]
    wc_w = wc_ref[...]

    def _softmax_rows(e):
        e = e - jnp.max(e, axis=-1, keepdims=True)
        w = jnp.exp(e)
        return w * pl.reciprocal(jnp.sum(w, axis=-1, keepdims=True), approx=True)

    # init_hidden: h0 == c0 == embedded fc feats (both directions lane-packed)
    h = jnp.concatenate([fc_e, fc_e], axis=-1)     # (B, 2R) = [h_f | h_b]
    c = h
    x0 = h                                         # xt at t==0 is fc_e (E == R)

    htop_f, htop_b = [], []
    for t in range(seq_len):                       # statically unrolled, vreg carries
        x_t = x0 if t == 0 else xseq_ref[t]        # (B, 2E) = [x_f | x_b]

        # soft attention over att_feats conditioned on prev_h (both dirs packed)
        att_h = jnp.dot(h, wh2a_w, preferred_element_type=jnp.float32) + bh2aB  # (B, 2H)
        d = jnp.tanh(p_att + att_h[:, None, :])                                  # (B, A, 2H)
        prod = d * walB
        e_f = jnp.sum(prod[:, :, :H], axis=-1)                                   # (B, A)
        e_b = jnp.sum(prod[:, :, H:], axis=-1)
        a_f = _softmax_rows(e_f)
        a_b = _softmax_rows(e_b)
        ar_f = jnp.sum(a_f[:, :, None] * att_e, axis=1)                          # (B, R)
        ar_b = jnp.sum(a_b[:, :, None] * att_e, axis=1)
        ar = jnp.concatenate([ar_f, ar_b], axis=-1)                              # (B, 2R)

        # LSTM gates: ONE block-diag lane-dense matmul, columns ordered
        # [i_f, i_b, f_f, f_b, o_f, o_b, g_f, g_b] (each R lanes)
        xin = jnp.concatenate([x_t, h, ar], axis=-1)                             # (B, 2E+4R)
        gates = jnp.dot(xin, wc_w, preferred_element_type=jnp.float32) + bgB     # (B, 8R)
        sig = jax.nn.sigmoid(gates[:, :6 * R])     # i/f/o gates, both directions
        g_g = jnp.tanh(gates[:, 6 * R:])           # [g_f | g_b]
        i_g = sig[:, :2 * R]
        f_g = sig[:, 2 * R:4 * R]
        o_g = sig[:, 4 * R:]
        c = f_g * c + i_g * g_g
        h = o_g * jnp.tanh(c)                      # htop == h for this cell

        if t >= 1:
            htop_f.append(h[:, :R])
            htop_b.append(h[:, R:])

    # ---- vectorized finalize: one matmul + one log_softmax + one store ----
    rows = [htop_f[i] + htop_b[seq_len - 2 - i] for i in range(seq_len - 1)]
    hsum = jnp.concatenate(rows, axis=0)                                         # ((T-1)*B, R)
    logits = (jnp.dot(hsum, projw_ref[...], preferred_element_type=jnp.float32)
              + proj_b)                                                          # ((T-1)*B, VP)
    m = jnp.max(logits, axis=-1, keepdims=True)
    lse = jnp.log(jnp.sum(jnp.exp(logits - m), axis=-1, keepdims=True)) + m
    out_ref[...] = logits - lse


# ------------------------- host-side parameter packing ----------------------
def _pack_params(params):
    core_f, core_b = params["core"], params["core1"]

    # img + att embed weights stacked into one slab (shared inner dim F=64)
    embw = jnp.concatenate([params["img_w"], params["att_w"]], axis=0)           # (128, R)

    # shared-input attention projection: output lanes [fwd | bwd]
    wv2a = jnp.concatenate([core_f["wv2a"], core_b["wv2a"]], axis=1)             # (R, 2H)

    # block-diag h -> att_hid projection
    wh2a = jnp.zeros((2 * R, 2 * H), jnp.float32)
    wh2a = wh2a.at[:R, :H].set(core_f["wh2a"])
    wh2a = wh2a.at[R:, H:].set(core_b["wh2a"])

    # block-diagonal fwd/bwd gate weight, column order [i_f,i_b,f_f,f_b,o_f,o_b,g_f,g_b]
    wc = jnp.zeros((2 * (E + 2 * R), 8 * R), jnp.float32)
    bgp = jnp.zeros((1, 8 * R), jnp.float32)
    row_f = {"wx": 0, "wh": 2 * E, "wa": 2 * E + 2 * R}
    row_b = {"wx": E, "wh": 2 * E + R, "wa": 2 * E + 3 * R}
    nrows = {"wx": E, "wh": R, "wa": R}
    for k in range(4):                         # gate order within a core: [i, f, o, g]
        src = slice(k * R, (k + 1) * R)
        dst_f = slice(2 * k * R, (2 * k + 1) * R)
        dst_b = slice((2 * k + 1) * R, (2 * k + 2) * R)
        for name in ("wx", "wh", "wa"):
            wc = wc.at[row_f[name]:row_f[name] + nrows[name], dst_f].set(core_f[name][:, src])
            wc = wc.at[row_b[name]:row_b[name] + nrows[name], dst_b].set(core_b[name][:, src])
        bgp = bgp.at[:, dst_f].set(core_f["bg"][:, src])
        bgp = bgp.at[:, dst_b].set(core_b["bg"][:, src])

    # projection padded to 128 output lanes
    projw = jnp.zeros((R, VP), jnp.float32).at[:, :V].set(params["proj_w"])

    # one 128-aligned bias slab
    bias = jnp.zeros((1, NB), jnp.float32)
    bias = bias.at[:, OFF_IMG_B:OFF_IMG_B + R].set(params["img_b"].reshape(1, R))
    bias = bias.at[:, OFF_ATT_B:OFF_ATT_B + R].set(params["att_b"].reshape(1, R))
    bias = bias.at[:, OFF_BV2A:OFF_BV2A + 2 * H].set(
        jnp.concatenate([core_f["bv2a"], core_b["bv2a"]]).reshape(1, 2 * H))
    bias = bias.at[:, OFF_BH2A:OFF_BH2A + 2 * H].set(
        jnp.concatenate([core_f["bh2a"], core_b["bh2a"]], axis=1))
    bias = bias.at[:, OFF_WAL:OFF_WAL + 2 * H].set(
        jnp.concatenate([core_f["walpha"], core_b["walpha"]], axis=1))
    bias = bias.at[:, OFF_BG:OFF_BG + 8 * R].set(bgp)
    # padded projection lanes get ~-inf bias so they vanish from the log_softmax
    bias = bias.at[:, OFF_PROJ_B:OFF_PROJ_B + VP].set(jnp.full((1, VP), -1e30, jnp.float32))
    bias = bias.at[:, OFF_PROJ_B:OFF_PROJ_B + V].set(params["proj_b"].reshape(1, V))

    return embw, wv2a, wh2a, wc, projw, bias


# ------------------------------ parameters ----------------------------------
def xavier_normal(key, shape):
    fan_in, fan_out = shape[0], shape[1]
    std = np.sqrt(2.0 / (fan_in + fan_out))
    return (std * jax.random.normal(key, shape)).astype(jnp.float32)


def small_normal(key, shape, scale=0.01):
    return (scale * jax.random.normal(key, shape)).astype(jnp.float32)


def init_core_params(key):
    ks = jax.random.split(key, 9)
    return {
        "wx": xavier_normal(ks[0], (E, 4 * R)),
        "wh": xavier_normal(ks[1], (R, 4 * R)),
        "wa": xavier_normal(ks[2], (R, 4 * R)),
        "bg": small_normal(ks[3], (1, 4 * R)),
        "wh2a": xavier_normal(ks[4], (R, H)),
        "bh2a": small_normal(ks[5], (1, H)),
        "walpha": xavier_normal(ks[6], (1, H)),
        "wv2a": xavier_normal(ks[7], (R, H)),
        "bv2a": small_normal(ks[8], (H,)),
        # alpha_net bias omitted: a constant shift before softmax is a no-op
    }


def init_params(key):
    ks = jax.random.split(key, 10)
    return {
        "embed": jax.random.normal(ks[0], (V, E)).astype(jnp.float32),
        "img_w": xavier_normal(ks[1], (opt.fc_feat_size, R)),
        "img_b": small_normal(ks[2], (R,)),
        "att_w": xavier_normal(ks[3], (opt.att_feat_size, R)),
        "att_b": small_normal(ks[4], (R,)),
        "proj_w": xavier_normal(ks[5], (R, V)),
        "proj_b": small_normal(ks[6], (V,)),
        "prelu_a": 0.25,
        "core": init_core_params(ks[7]),
        "core1": init_core_params(ks[8]),
    }


# ------------------------------ forward pass --------------------------------
def bi_show_atten_tell_forward(params, fc_feats, att_feats, labels_np):
    B = fc_feats.shape[0]
    seq_length = opt.seq_length

    # data-dependent early break of the torch loop, resolved host-side
    max_len = seq_length + 2
    for t in range(2, seq_length + 2):
        if int(labels_np[:, t - 2].sum()) == 0:
            max_len = t
            break
    T = max_len

    emb = params["embed"]
    labels = jnp.asarray(labels_np, dtype=jnp.int32)

    # forward-direction columns (t=2..T-1 -> labels[:, t-2]) and backward-direction
    # columns (literal torch index max_len-1-t-1, incl. the -1 wrap to the last col)
    idx_f = np.arange(0, T - 2, dtype=np.int32)
    idx_b = np.array([(T - t - 2) % seq_length for t in range(2, T)], dtype=np.int32)

    # x sequence for the kernel: row 0 unused (fc_e is computed in-kernel),
    # row 1 = embedding of token 0, rows 2.. = one gather per direction.
    zeros_row = jnp.zeros((1, B, 2 * E), jnp.float32)
    e0 = jnp.broadcast_to(emb[0][None, :], (B, E))
    row1 = jnp.concatenate([e0, e0], axis=-1)[None]                  # (1, B, 2E)
    if T > 2:
        xf = jnp.transpose(emb[labels[:, idx_f]], (1, 0, 2))         # (T-2, B, E)
        xb = jnp.transpose(emb[labels[:, idx_b]], (1, 0, 2))
        rest = jnp.concatenate([xf, xb], axis=-1)                    # (T-2, B, 2E)
        x_seq = jnp.concatenate([zeros_row, row1, rest], axis=0)     # (T, B, 2E)
    else:
        x_seq = jnp.concatenate([zeros_row, row1], axis=0)

    embw, wv2a, wh2a, wc, projw, bias = _pack_params(params)

    kernel = functools.partial(bi_satt_kernel, seq_len=T, batch=B,
                               prelu_a=float(params["prelu_a"]))
    out_flat = pl.pallas_call(
        kernel,
        out_shape=jax.ShapeDtypeStruct(((T - 1) * B, VP), jnp.float32),
    )(fc_feats.astype(jnp.float32),
      att_feats.reshape(-1, F_ATT).astype(jnp.float32),
      x_seq, embw, wv2a, wh2a, wc, projw, bias)

    out = out_flat[:, :V].reshape(T - 1, B, V)       # drop padded lanes (free HBM glue)
    return jnp.transpose(out, (1, 0, 2))             # (B, max_len-1, V)


# --------------------------------- main --------------------------------------
if __name__ == "__main__":
    key = jax.random.PRNGKey(0)
    kp, k1, k2, k3 = jax.random.split(key, 4)

    params = init_params(kp)

    B = 2
    fc_feats = jax.random.normal(k1, (B, opt.fc_feat_size), dtype=jnp.float32)
    att_feats = jax.random.normal(k2, (B, opt.att_size, opt.att_feat_size), dtype=jnp.float32)

    # labels: 4 real tokens then zero padding (triggers the early break at t=6)
    labels_np = np.zeros((B, opt.seq_length), dtype=np.int32)
    tok = np.asarray(jax.random.randint(k3, (B, 4), 1, opt.vocab_size + 1))
    labels_np[:, :4] = tok

    out = bi_show_atten_tell_forward(params, fc_feats, att_feats, labels_np)
    out = jax.block_until_ready(out)

    expected_max_len = 6  # break at t == 4 + 2
    assert out.shape == (B, expected_max_len - 1, V), out.shape
    assert bool(jnp.all(jnp.isfinite(out)))
    # each row of log-probs should sum (in prob space) to ~1
    assert bool(jnp.allclose(jnp.sum(jnp.exp(out), axis=-1), 1.0, atol=1e-4))

    print("KERNEL_OK")
</pallas_src>

<mosaic_0001>
module attributes {stable_mosaic.version = 11 : i64} {
  func.func @bi_satt_kernel(%arg0: memref<2x64xf32, #tpu.memory_space<vmem>>, %arg1: memref<32x64xf32, #tpu.memory_space<vmem>>, %arg2: memref<6x2x64xf32, #tpu.memory_space<vmem>>, %arg3: memref<128x32xf32, #tpu.memory_space<vmem>>, %arg4: memref<32x64xf32, #tpu.memory_space<vmem>>, %arg5: memref<64x64xf32, #tpu.memory_space<vmem>>, %arg6: memref<192x256xf32, #tpu.memory_space<vmem>>, %arg7: memref<32x128xf32, #tpu.memory_space<vmem>>, %arg8: memref<1x1024xf32, #tpu.memory_space<vmem>>, %arg9: memref<10x128xf32, #tpu.memory_space<vmem>>) attributes {dimension_semantics = [], scalar_prefetch = 0 : i64, scratch_operands = 0 : i64, tpu.core_type = #tpu.core_type<tc>} {
    %c0 = arith.constant 0 : index
    %c0_0 = arith.constant 0 : index
    %0 = vector.load %arg8[%c0, %c0_0] : memref<1x1024xf32, #tpu.memory_space<vmem>>, vector<1x32xf32>
    %c0_1 = arith.constant 0 : index
    %c128 = arith.constant 128 : index
    %1 = vector.load %arg8[%c0_1, %c128] : memref<1x1024xf32, #tpu.memory_space<vmem>>, vector<1x32xf32>
    %c0_2 = arith.constant 0 : index
    %c256 = arith.constant 256 : index
    %2 = vector.load %arg8[%c0_2, %c256] : memref<1x1024xf32, #tpu.memory_space<vmem>>, vector<1x64xf32>
    %c0_3 = arith.constant 0 : index
    %c384 = arith.constant 384 : index
    %3 = vector.load %arg8[%c0_3, %c384] : memref<1x1024xf32, #tpu.memory_space<vmem>>, vector<1x64xf32>
    %c0_4 = arith.constant 0 : index
    %c512 = arith.constant 512 : index
    %4 = vector.load %arg8[%c0_4, %c512] : memref<1x1024xf32, #tpu.memory_space<vmem>>, vector<1x64xf32>
    %c0_5 = arith.constant 0 : index
    %c640 = arith.constant 640 : index
    %5 = vector.load %arg8[%c0_5, %c640] : memref<1x1024xf32, #tpu.memory_space<vmem>>, vector<1x256xf32>
    %c0_6 = arith.constant 0 : index
    %c896 = arith.constant 896 : index
    %6 = vector.load %arg8[%c0_6, %c896] : memref<1x1024xf32, #tpu.memory_space<vmem>>, vector<1x128xf32>
    %c0_7 = arith.constant 0 : index
    %c0_8 = arith.constant 0 : index
    %7 = vector.load %arg0[%c0_7, %c0_8] : memref<2x64xf32, #tpu.memory_space<vmem>>, vector<2x64xf32>
    %c0_9 = arith.constant 0 : index
    %c0_10 = arith.constant 0 : index
    %8 = vector.load %arg3[%c0_9, %c0_10] : memref<128x32xf32, #tpu.memory_space<vmem>>, vector<64x32xf32>
    %cst = arith.constant dense<0.000000e+00> : vector<2x32xf32>
    %9 = tpu.matmul %7, %8, %cst {dimension_numbers = #tpu.dot_dimension_numbers<[1], [0], [0], [1], [0, 0, 1, 1], [], []>} : vector<2x64xf32>, vector<64x32xf32>, vector<2x32xf32> -> vector<2x32xf32>
    %10 = vector.broadcast %0 : vector<1x32xf32> to vector<2x32xf32>
    %11 = arith.addf %9, %10 : vector<2x32xf32>
    %cst_11 = arith.constant 0.000000e+00 : f32
    %12 = vector.broadcast %cst_11 : f32 to vector<2x32xf32>
    %13 = arith.maximumf %11, %12 : vector<2x32xf32>
    %cst_12 = arith.constant 0.000000e+00 : f32
    %14 = vector.broadcast %cst_12 : f32 to vector<2x32xf32>
    %15 = arith.minimumf %11, %14 : vector<2x32xf32>
    %cst_13 = arith.constant 2.500000e-01 : f32
    %16 = vector.broadcast %cst_13 : f32 to vector<2x32xf32>
    %17 = arith.mulf %16, %15 : vector<2x32xf32>
    %18 = arith.addf %13, %17 : vector<2x32xf32>
    %c0_14 = arith.constant 0 : index
    %c0_15 = arith.constant 0 : index
    %19 = vector.load %arg1[%c0_14, %c0_15] : memref<32x64xf32, #tpu.memory_space<vmem>>, vector<32x64xf32>
    %c64 = arith.constant 64 : index
    %c0_16 = arith.constant 0 : index
    %20 = vector.load %arg3[%c64, %c0_16] : memref<128x32xf32, #tpu.memory_space<vmem>>, vector<64x32xf32>
    %cst_17 = arith.constant dense<0.000000e+00> : vector<32x32xf32>
    %21 = tpu.matmul %19, %20, %cst_17 {dimension_numbers = #tpu.dot_dimension_numbers<[1], [0], [0], [1], [0, 0, 1, 1], [], []>} : vector<32x64xf32>, vector<64x32xf32>, vector<32x32xf32> -> vector<32x32xf32>
    %22 = vector.broadcast %1 : vector<1x32xf32> to vector<32x32xf32>
    %23 = arith.addf %21, %22 : vector<32x32xf32>
    %cst_18 = arith.constant 0.000000e+00 : f32
    %24 = vector.broadcast %cst_18 : f32 to vector<32x32xf32>
    %25 = arith.maximumf %23, %24 : vector<32x32xf32>
    %cst_19 = arith.constant 0.000000e+00 : f32
    %26 = vector.broadcast %cst_19 : f32 to vector<32x32xf32>
    %27 = arith.minimumf %23, %26 : vector<32x32xf32>
    %cst_20 = arith.constant 2.500000e-01 : f32
    %28 = vector.broadcast %cst_20 : f32 to vector<32x32xf32>
    %29 = arith.mulf %28, %27 : vector<32x32xf32>
    %30 = arith.addf %25, %29 : vector<32x32xf32>
    %c0_21 = arith.constant 0 : index
    %c0_22 = arith.constant 0 : index
    %31 = vector.load %arg4[%c0_21, %c0_22] : memref<32x64xf32, #tpu.memory_space<vmem>>, vector<32x64xf32>
    %cst_23 = arith.constant dense<0.000000e+00> : vector<32x64xf32>
    %32 = tpu.matmul %30, %31, %cst_23 {dimension_numbers = #tpu.dot_dimension_numbers<[1], [0], [0], [1], [0, 0, 1, 1], [], []>} : vector<32x32xf32>, vector<32x64xf32>, vector<32x64xf32> -> vector<32x64xf32>
    %33 = vector.broadcast %2 : vector<1x64xf32> to vector<32x64xf32>
    %34 = arith.addf %32, %33 : vector<32x64xf32>
    %35 = vector.shape_cast %30 : vector<32x32xf32> to vector<2x16x32xf32>
    %36 = vector.shape_cast %34 : vector<32x64xf32> to vector<2x16x64xf32>
    %37 = vector.shape_cast %4 : vector<1x64xf32> to vector<1x1x64xf32>
    %38 = vector.shape_cast %37 : vector<1x1x64xf32> to vector<1x1x64xf32>
    %39 = vector.broadcast %38 : vector<1x1x64xf32> to vector<2x16x64xf32>
    %40 = vector.shape_cast %3 : vector<1x64xf32> to vector<1x64xf32>
    %41 = vector.broadcast %40 : vector<1x64xf32> to vector<2x64xf32>
    %42 = vector.shape_cast %5 : vector<1x256xf32> to vector<1x256xf32>
    %43 = vector.broadcast %42 : vector<1x256xf32> to vector<2x256xf32>
    %c0_24 = arith.constant 0 : index
    %c0_25 = arith.constant 0 : index
    %44 = vector.load %arg5[%c0_24, %c0_25] : memref<64x64xf32, #tpu.memory_space<vmem>>, vector<64x64xf32>
    %c0_26 = arith.constant 0 : index
    %c0_27 = arith.constant 0 : index
    %45 = vector.load %arg6[%c0_26, %c0_27] : memref<192x256xf32, #tpu.memory_space<vmem>>, vector<192x256xf32>
    %46 = tpu.concatenate %18, %18 in 1 : vector<2x32xf32>, vector<2x32xf32> -> vector<2x64xf32>
    %cst_28 = arith.constant dense<0.000000e+00> : vector<2x64xf32>
    %47 = tpu.matmul %46, %44, %cst_28 {dimension_numbers = #tpu.dot_dimension_numbers<[1], [0], [0], [1], [0, 0, 1, 1], [], []>} : vector<2x64xf32>, vector<64x64xf32>, vector<2x64xf32> -> vector<2x64xf32>
    %48 = arith.addf %47, %41 : vector<2x64xf32>
    %49 = vector.shape_cast %48 : vector<2x64xf32> to vector<2x1x64xf32>
    %50 = vector.broadcast %49 : vector<2x1x64xf32> to vector<2x16x64xf32>
    %51 = arith.addf %36, %50 : vector<2x16x64xf32>
    %52 = math.tanh %51 : vector<2x16x64xf32>
    %53 = arith.mulf %52, %39 : vector<2x16x64xf32>
    %54 = vector.extract_strided_slice %53 {offsets = [0, 0, 0], sizes = [2, 16, 32], strides = [1, 1, 1]} : vector<2x16x64xf32> to vector<2x16x32xf32>
    %cst_29 = arith.constant dense<0.000000e+00> : vector<2x16xf32>
    %55 = vector.multi_reduction <add>, %54, %cst_29 [2] : vector<2x16x32xf32> to vector<2x16xf32>
    %56 = vector.extract_strided_slice %53 {offsets = [0, 0, 32], sizes = [2, 16, 32], strides = [1, 1, 1]} : vector<2x16x64xf32> to vector<2x16x32xf32>
    %cst_30 = arith.constant dense<0.000000e+00> : vector<2x16xf32>
    %57 = vector.multi_reduction <add>, %56, %cst_30 [2] : vector<2x16x32xf32> to vector<2x16xf32>
    %cst_31 = arith.constant dense<0xFF800000> : vector<2xf32>
    %58 = vector.multi_reduction <maximumf>, %55, %cst_31 [1] : vector<2x16xf32> to vector<2xf32>
    %59 = vector.shape_cast %58 : vector<2xf32> to vector<2x1xf32>
    %60 = vector.broadcast %59 : vector<2x1xf32> to vector<2x16xf32>
    %61 = arith.subf %55, %60 : vector<2x16xf32>
    %62 = math.exp %61 : vector<2x16xf32>
    %cst_32 = arith.constant dense<0.000000e+00> : vector<2xf32>
    %63 = vector.multi_reduction <add>, %62, %cst_32 [1] : vector<2x16xf32> to vector<2xf32>
    %64 = vector.shape_cast %63 : vector<2xf32> to vector<2x1xf32>
    %65 = tpu.reciprocal %64 {approx = true} : vector<2x1xf32> -> vector<2x1xf32>
    %66 = vector.broadcast %65 : vector<2x1xf32> to vector<2x16xf32>
    %67 = arith.mulf %62, %66 : vector<2x16xf32>
    %cst_33 = arith.constant dense<0xFF800000> : vector<2xf32>
    %68 = vector.multi_reduction <maximumf>, %57, %cst_33 [1] : vector<2x16xf32> to vector<2xf32>
    %69 = vector.shape_cast %68 : vector<2xf32> to vector<2x1xf32>
    %70 = vector.broadcast %69 : vector<2x1xf32> to vector<2x16xf32>
    %71 = arith.subf %57, %70 : vector<2x16xf32>
    %72 = math.exp %71 : vector<2x16xf32>
    %cst_34 = arith.constant dense<0.000000e+00> : vector<2xf32>
    %73 = vector.multi_reduction <add>, %72, %cst_34 [1] : vector<2x16xf32> to vector<2xf32>
    %74 = vector.shape_cast %73 : vector<2xf32> to vector<2x1xf32>
    %75 = tpu.reciprocal %74 {approx = true} : vector<2x1xf32> -> vector<2x1xf32>
    %76 = vector.broadcast %75 : vector<2x1xf32> to vector<2x16xf32>
    %77 = arith.mulf %72, %76 : vector<2x16xf32>
    %78 = vector.shape_cast %67 : vector<2x16xf32> to vector<2x16x1xf32>
    %79 = vector.broadcast %78 : vector<2x16x1xf32> to vector<2x16x32xf32>
    %80 = arith.mulf %79, %35 : vector<2x16x32xf32>
    %cst_35 = arith.constant dense<0.000000e+00> : vector<2x32xf32>
    %81 = vector.multi_reduction <add>, %80, %cst_35 [1] : vector<2x16x32xf32> to vector<2x32xf32>
    %82 = vector.shape_cast %77 : vector<2x16xf32> to vector<2x16x1xf32>
    %83 = vector.broadcast %82 : vector<2x16x1xf32> to vector<2x16x32xf32>
    %84 = arith.mulf %83, %35 : vector<2x16x32xf32>
    %cst_36 = arith.constant dense<0.000000e+00> : vector<2x32xf32>
    %85 = vector.multi_reduction <add>, %84, %cst_36 [1] : vector<2x16x32xf32> to vector<2x32xf32>
    %86 = tpu.concatenate %81, %85 in 1 : vector<2x32xf32>, vector<2x32xf32> -> vector<2x64xf32>
    %87 = tpu.concatenate %46, %46, %86 in 1 : vector<2x64xf32>, vector<2x64xf32>, vector<2x64xf32> -> vector<2x192xf32>
    %cst_37 = arith.constant dense<0.000000e+00> : vector<2x256xf32>
    %88 = tpu.matmul %87, %45, %cst_37 {dimension_numbers = #tpu.dot_dimension_numbers<[1], [0], [0], [1], [0, 0, 1, 1], [], []>} : vector<2x192xf32>, vector<192x256xf32>, vector<2x256xf32> -> vector<2x256xf32>
    %89 = arith.addf %88, %43 : vector<2x256xf32>
    %90 = vector.extract_strided_slice %89 {offsets = [0, 0], sizes = [2, 192], strides = [1, 1]} : vector<2x256xf32> to vector<2x192xf32>
    %91 = arith.negf %90 : vector<2x192xf32>
    %92 = math.exp %91 : vector<2x192xf32>
    %cst_38 = arith.constant 1.000000e+00 : f32
    %93 = vector.broadcast %cst_38 : f32 to vector<2x192xf32>
    %94 = arith.addf %93, %92 : vector<2x192xf32>
    %95 = arith.divf %93, %94 : vector<2x192xf32>
    %96 = vector.extract_strided_slice %89 {offsets = [0, 192], sizes = [2, 64], strides = [1, 1]} : vector<2x256xf32> to vector<2x64xf32>
    %97 = math.tanh %96 : vector<2x64xf32>
    %98 = vector.extract_strided_slice %95 {offsets = [0, 0], sizes = [2, 64], strides = [1, 1]} : vector<2x192xf32> to vector<2x64xf32>
    %99 = vector.extract_strided_slice %95 {offsets = [0, 64], sizes = [2, 64], strides = [1, 1]} : vector<2x192xf32> to vector<2x64xf32>
    %100 = vector.extract_strided_slice %95 {offsets = [0, 128], sizes = [2, 64], strides = [1, 1]} : vector<2x192xf32> to vector<2x64xf32>
    %101 = arith.mulf %99, %46 : vector<2x64xf32>
    %102 = arith.mulf %98, %97 : vector<2x64xf32>
    %103 = arith.addf %101, %102 : vector<2x64xf32>
    %104 = math.tanh %103 : vector<2x64xf32>
    %105 = arith.mulf %100, %104 : vector<2x64xf32>
    %c1 = arith.constant 1 : index
    %c0_39 = arith.constant 0 : index
    %c0_40 = arith.constant 0 : index
    %106 = vector.load %arg2[%c1, %c0_39, %c0_40] : memref<6x2x64xf32, #tpu.memory_space<vmem>>, vector<1x2x64xf32>
    %107 = vector.shape_cast %106 : vector<1x2x64xf32> to vector<2x64xf32>
    %cst_41 = arith.constant dense<0.000000e+00> : vector<2x64xf32>
    %108 = tpu.matmul %105, %44, %cst_41 {dimension_numbers = #tpu.dot_dimension_numbers<[1], [0], [0], [1], [0, 0, 1, 1], [], []>} : vector<2x64xf32>, vector<64x64xf32>, vector<2x64xf32> -> vector<2x64xf32>
    %109 = arith.addf %108, %41 : vector<2x64xf32>
    %110 = vector.shape_cast %109 : vector<2x64xf32> to vector<2x1x64xf32>
    %111 = vector.broadcast %110 : vector<2x1x64xf32> to vector<2x16x64xf32>
    %112 = arith.addf %36, %111 : vector<2x16x64xf32>
    %113 = math.tanh %112 : vector<2x16x64xf32>
    %114 = arith.mulf %113, %39 : vector<2x16x64xf32>
    %115 = vector.extract_strided_slice %114 {offsets = [0, 0, 0], sizes = [2, 16, 32], strides = [1, 1, 1]} : vector<2x16x64xf32> to vector<2x16x32xf32>
    %cst_42 = arith.constant dense<0.000000e+00> : vector<2x16xf32>
    %116 = vector.multi_reduction <add>, %115, %cst_42 [2] : vector<2x16x32xf32> to vector<2x16xf32>
    %117 = vector.extract_strided_slice %114 {offsets = [0, 0, 32], sizes = [2, 16, 32], strides = [1, 1, 1]} : vector<2x16x64xf32> to vector<2x16x32xf32>
    %cst_43 = arith.constant dense<0.000000e+00> : vector<2x16xf32>
    %118 = vector.multi_reduction <add>, %117, %cst_43 [2] : vector<2x16x32xf32> to vector<2x16xf32>
    %cst_44 = arith.constant dense<0xFF800000> : vector<2xf32>
    %119 = vector.multi_reduction <maximumf>, %116, %cst_44 [1] : vector<2x16xf32> to vector<2xf32>
    %120 = vector.shape_cast %119 : vector<2xf32> to vector<2x1xf32>
    %121 = vector.broadcast %120 : vector<2x1xf32> to vector<2x16xf32>
    %122 = arith.subf %116, %121 : vector<2x16xf32>
    %123 = math.exp %122 : vector<2x16xf32>
    %cst_45 = arith.constant dense<0.000000e+00> : vector<2xf32>
    %124 = vector.multi_reduction <add>, %123, %cst_45 [1] : vector<2x16xf32> to vector<2xf32>
    %125 = vector.shape_cast %124 : vector<2xf32> to vector<2x1xf32>
    %126 = tpu.reciprocal %125 {approx = true} : vector<2x1xf32> -> vector<2x1xf32>
    %127 = vector.broadcast %126 : vector<2x1xf32> to vector<2x16xf32>
    %128 = arith.mulf %123, %127 : vector<2x16xf32>
    %cst_46 = arith.constant dense<0xFF800000> : vector<2xf32>
    %129 = vector.multi_reduction <maximumf>, %118, %cst_46 [1] : vector<2x16xf32> to vector<2xf32>
    %130 = vector.shape_cast %129 : vector<2xf32> to vector<2x1xf32>
    %131 = vector.broadcast %130 : vector<2x1xf32> to vector<2x16xf32>
    %132 = arith.subf %118, %131 : vector<2x16xf32>
    %133 = math.exp %132 : vector<2x16xf32>
    %cst_47 = arith.constant dense<0.000000e+00> : vector<2xf32>
    %134 = vector.multi_reduction <add>, %133, %cst_47 [1] : vector<2x16xf32> to vector<2xf32>
    %135 = vector.shape_cast %134 : vector<2xf32> to vector<2x1xf32>
    %136 = tpu.reciprocal %135 {approx = true} : vector<2x1xf32> -> vector<2x1xf32>
    %137 = vector.broadcast %136 : vector<2x1xf32> to vector<2x16xf32>
    %138 = arith.mulf %133, %137 : vector<2x16xf32>
    %139 = vector.shape_cast %128 : vector<2x16xf32> to vector<2x16x1xf32>
    %140 = vector.broadcast %139 : vector<2x16x1xf32> to vector<2x16x32xf32>
    %141 = arith.mulf %140, %35 : vector<2x16x32xf32>
    %cst_48 = arith.constant dense<0.000000e+00> : vector<2x32xf32>
    %142 = vector.multi_reduction <add>, %141, %cst_48 [1] : vector<2x16x32xf32> to vector<2x32xf32>
    %143 = vector.shape_cast %138 : vector<2x16xf32> to vector<2x16x1xf32>
    %144 = vector.broadcast %143 : vector<2x16x1xf32> to vector<2x16x32xf32>
    %145 = arith.mulf %144, %35 : vector<2x16x32xf32>
    %cst_49 = arith.constant dense<0.000000e+00> : vector<2x32xf32>
    %146 = vector.multi_reduction <add>, %145, %cst_49 [1] : vector<2x16x32xf32> to vector<2x32xf32>
    %147 = tpu.concatenate %142, %146 in 1 : vector<2x32xf32>, vector<2x32xf32> -> vector<2x64xf32>
    %148 = tpu.concatenate %107, %105, %147 in 1 : vector<2x64xf32>, vector<2x64xf32>, vector<2x64xf32> -> vector<2x192xf32>
    %cst_50 = arith.constant dense<0.000000e+00> : vector<2x256xf32>
    %149 = tpu.matmul %148, %45, %cst_50 {dimension_numbers = #tpu.dot_dimension_numbers<[1], [0], [0], [1], [0, 0, 1, 1], [], []>} : vector<2x192xf32>, vector<192x256xf32>, vector<2x256xf32> -> vector<2x256xf32>
    %150 = arith.addf %149, %43 : vector<2x256xf32>
    %151 = vector.extract_strided_slice %150 {offsets = [0, 0], sizes = [2, 192], strides = [1, 1]} : vector<2x256xf32> to vector<2x192xf32>
    %152 = arith.negf %151 : vector<2x192xf32>
    %153 = math.exp %152 : vector<2x192xf32>
    %cst_51 = arith.constant 1.000000e+00 : f32
    %154 = vector.broadcast %cst_51 : f32 to vector<2x192xf32>
    %155 = arith.addf %154, %153 : vector<2x192xf32>
    %156 = arith.divf %154, %155 : vector<2x192xf32>
    %157 = vector.extract_strided_slice %150 {offsets = [0, 192], sizes = [2, 64], strides = [1, 1]} : vector<2x256xf32> to vector<2x64xf32>
    %158 = math.tanh %157 : vector<2x64xf32>
    %159 = vector.extract_strided_slice %156 {offsets = [0, 0], sizes = [2, 64], strides = [1, 1]} : vector<2x192xf32> to vector<2x64xf32>
    %160 = vector.extract_strided_slice %156 {offsets = [0, 64], sizes = [2, 64], strides = [1, 1]} : vector<2x192xf32> to vector<2x64xf32>
    %161 = vector.extract_strided_slice %156 {offsets = [0, 128], sizes = [2, 64], strides = [1, 1]} : vector<2x192xf32> to vector<2x64xf32>
    %162 = arith.mulf %160, %103 : vector<2x64xf32>
    %163 = arith.mulf %159, %158 : vector<2x64xf32>
    %164 = arith.addf %162, %163 : vector<2x64xf32>
    %165 = math.tanh %164 : vector<2x64xf32>
    %166 = arith.mulf %161, %165 : vector<2x64xf32>
    %167 = vector.extract_strided_slice %166 {offsets = [0, 0], sizes = [2, 32], strides = [1, 1]} : vector<2x64xf32> to vector<2x32xf32>
    %168 = vector.extract_strided_slice %166 {offsets = [0, 32], sizes = [2, 32], strides = [1, 1]} : vector<2x64xf32> to vector<2x32xf32>
    %c2 = arith.constant 2 : index
    %c0_52 = arith.constant 0 : index
    %c0_53 = arith.constant 0 : index
    %169 = vector.load %arg2[%c2, %c0_52, %c0_53] : memref<6x2x64xf32, #tpu.memory_space<vmem>>, vector<1x2x64xf32>
    %170 = vector.shape_cast %169 : vector<1x2x64xf32> to vector<2x64xf32>
    %cst_54 = arith.constant dense<0.000000e+00> : vector<2x64xf32>
    %171 = tpu.matmul %166, %44, %cst_54 {dimension_numbers = #tpu.dot_dimension_numbers<[1], [0], [0], [1], [0, 0, 1, 1], [], []>} : vector<2x64xf32>, vector<64x64xf32>, vector<2x64xf32> -> vector<2x64xf32>
    %172 = arith.addf %171, %41 : vector<2x64xf32>
    %173 = vector.shape_cast %172 : vector<2x64xf32> to vector<2x1x64xf32>
    %174 = vector.broadcast %173 : vector<2x1x64xf32> to vector<2x16x64xf32>
    %175 = arith.addf %36, %174 : vector<2x16x64xf32>
    %176 = math.tanh %175 : vector<2x16x64xf32>
    %177 = arith.mulf %176, %39 : vector<2x16x64xf32>
    %178 = vector.extract_strided_slice %177 {offsets = [0, 0, 0], sizes = [2, 16, 32], strides = [1, 1, 1]} : vector<2x16x64xf32> to vector<2x16x32xf32>
    %cst_55 = arith.constant dense<0.000000e+00> : vector<2x16xf32>
    %179 = vector.multi_reduction <add>, %178, %cst_55 [2] : vector<2x16x32xf32> to vector<2x16xf32>
    %180 = vector.extract_strided_slice %177 {offsets = [0, 0, 32], sizes = [2, 16, 32], strides = [1, 1, 1]} : vector<2x16x64xf32> to vector<2x16x32xf32>
    %cst_56 = arith.constant dense<0.000000e+00> : vector<2x16xf32>
    %181 = vector.multi_reduction <add>, %180, %cst_56 [2] : vector<2x16x32xf32> to vector<2x16xf32>
    %cst_57 = arith.constant dense<0xFF800000> : vector<2xf32>
    %182 = vector.multi_reduction <maximumf>, %179, %cst_57 [1] : vector<2x16xf32> to vector<2xf32>
    %183 = vector.shape_cast %182 : vector<2xf32> to vector<2x1xf32>
    %184 = vector.broadcast %183 : vector<2x1xf32> to vector<2x16xf32>
    %185 = arith.subf %179, %184 : vector<2x16xf32>
    %186 = math.exp %185 : vector<2x16xf32>
    %cst_58 = arith.constant dense<0.000000e+00> : vector<2xf32>
    %187 = vector.multi_reduction <add>, %186, %cst_58 [1] : vector<2x16xf32> to vector<2xf32>
    %188 = vector.shape_cast %187 : vector<2xf32> to vector<2x1xf32>
    %189 = tpu.reciprocal %188 {approx = true} : vector<2x1xf32> -> vector<2x1xf32>
    %190 = vector.broadcast %189 : vector<2x1xf32> to vector<2x16xf32>
    %191 = arith.mulf %186, %190 : vector<2x16xf32>
    %cst_59 = arith.constant dense<0xFF800000> : vector<2xf32>
    %192 = vector.multi_reduction <maximumf>, %181, %cst_59 [1] : vector<2x16xf32> to vector<2xf32>
    %193 = vector.shape_cast %192 : vector<2xf32> to vector<2x1xf32>
    %194 = vector.broadcast %193 : vector<2x1xf32> to vector<2x16xf32>
    %195 = arith.subf %181, %194 : vector<2x16xf32>
    %196 = math.exp %195 : vector<2x16xf32>
    %cst_60 = arith.constant dense<0.000000e+00> : vector<2xf32>
    %197 = vector.multi_reduction <add>, %196, %cst_60 [1] : vector<2x16xf32> to vector<2xf32>
    %198 = vector.shape_cast %197 : vector<2xf32> to vector<2x1xf32>
    %199 = tpu.reciprocal %198 {approx = true} : vector<2x1xf32> -> vector<2x1xf32>
    %200 = vector.broadcast %199 : vector<2x1xf32> to vector<2x16xf32>
    %201 = arith.mulf %196, %200 : vector<2x16xf32>
    %202 = vector.shape_cast %191 : vector<2x16xf32> to vector<2x16x1xf32>
    %203 = vector.broadcast %202 : vector<2x16x1xf32> to vector<2x16x32xf32>
    %204 = arith.mulf %203, %35 : vector<2x16x32xf32>
    %cst_61 = arith.constant dense<0.000000e+00> : vector<2x32xf32>
    %205 = vector.multi_reduction <add>, %204, %cst_61 [1] : vector<2x16x32xf32> to vector<2x32xf32>
    %206 = vector.shape_cast %201 : vector<2x16xf32> to vector<2x16x1xf32>
    %207 = vector.broadcast %206 : vector<2x16x1xf32> to vector<2x16x32xf32>
    %208 = arith.mulf %207, %35 : vector<2x16x32xf32>
    %cst_62 = arith.constant dense<0.000000e+00> : vector<2x32xf32>
    %209 = vector.multi_reduction <add>, %208, %cst_62 [1] : vector<2x16x32xf32> to vector<2x32xf32>
    %210 = tpu.concatenate %205, %209 in 1 : vector<2x32xf32>, vector<2x32xf32> -> vector<2x64xf32>
    %211 = tpu.concatenate %170, %166, %210 in 1 : vector<2x64xf32>, vector<2x64xf32>, vector<2x64xf32> -> vector<2x192xf32>
    %cst_63 = arith.constant dense<0.000000e+00> : vector<2x256xf32>
    %212 = tpu.matmul %211, %45, %cst_63 {dimension_numbers = #tpu.dot_dimension_numbers<[1], [0], [0], [1], [0, 0, 1, 1], [], []>} : vector<2x192xf32>, vector<192x256xf32>, vector<2x256xf32> -> vector<2x256xf32>
    %213 = arith.addf %212, %43 : vector<2x256xf32>
    %214 = vector.extract_strided_slice %213 {offsets = [0, 0], sizes = [2, 192], strides = [1, 1]} : vector<2x256xf32> to vector<2x192xf32>
    %215 = arith.negf %214 : vector<2x192xf32>
    %216 = math.exp %215 : vector<2x192xf32>
    %cst_64 = arith.constant 1.000000e+00 : f32
    %217 = vector.broadcast %cst_64 : f32 to vector<2x192xf32>
    %218 = arith.addf %217, %216 : vector<2x192xf32>
    %219 = arith.divf %217, %218 : vector<2x192xf32>
    %220 = vector.extract_strided_slice %213 {offsets = [0, 192], sizes = [2, 64], strides = [1, 1]} : vector<2x256xf32> to vector<2x64xf32>
    %221 = math.tanh %220 : vector<2x64xf32>
    %222 = vector.extract_strided_slice %219 {offsets = [0, 0], sizes = [2, 64], strides = [1, 1]} : vector<2x192xf32> to vector<2x64xf32>
    %223 = vector.extract_strided_slice %219 {offsets = [0, 64], sizes = [2, 64], strides = [1, 1]} : vector<2x192xf32> to vector<2x64xf32>
    %224 = vector.extract_strided_slice %219 {offsets = [0, 128], sizes = [2, 64], strides = [1, 1]} : vector<2x192xf32> to vector<2x64xf32>
    %225 = arith.mulf %223, %164 : vector<2x64xf32>
    %226 = arith.mulf %222, %221 : vector<2x64xf32>
    %227 = arith.addf %225, %226 : vector<2x64xf32>
    %228 = math.tanh %227 : vector<2x64xf32>
    %229 = arith.mulf %224, %228 : vector<2x64xf32>
    %230 = vector.extract_strided_slice %229 {offsets = [0, 0], sizes = [2, 32], strides = [1, 1]} : vector<2x64xf32> to vector<2x32xf32>
    %231 = vector.extract_strided_slice %229 {offsets = [0, 32], sizes = [2, 32], strides = [1, 1]} : vector<2x64xf32> to vector<2x32xf32>
    %c3 = arith.constant 3 : index
    %c0_65 = arith.constant 0 : index
    %c0_66 = arith.constant 0 : index
    %232 = vector.load %arg2[%c3, %c0_65, %c0_66] : memref<6x2x64xf32, #tpu.memory_space<vmem>>, vector<1x2x64xf32>
    %233 = vector.shape_cast %232 : vector<1x2x64xf32> to vector<2x64xf32>
    %cst_67 = arith.constant dense<0.000000e+00> : vector<2x64xf32>
    %234 = tpu.matmul %229, %44, %cst_67 {dimension_numbers = #tpu.dot_dimension_numbers<[1], [0], [0], [1], [0, 0, 1, 1], [], []>} : vector<2x64xf32>, vector<64x64xf32>, vector<2x64xf32> -> vector<2x64xf32>
    %235 = arith.addf %234, %41 : vector<2x64xf32>
    %236 = vector.shape_cast %235 : vector<2x64xf32> to vector<2x1x64xf32>
    %237 = vector.broadcast %236 : vector<2x1x64xf32> to vector<2x16x64xf32>
    %238 = arith.addf %36, %237 : vector<2x16x64xf32>
    %239 = math.tanh %238 : vector<2x16x64xf32>
    %240 = arith.mulf %239, %39 : vector<2x16x64xf32>
    %241 = vector.extract_strided_slice %240 {offsets = [0, 0, 0], sizes = [2, 16, 32], strides = [1, 1, 1]} : vector<2x16x64xf32> to vector<2x16x32xf32>
    %cst_68 = arith.constant dense<0.000000e+00> : vector<2x16xf32>
    %242 = vector.multi_reduction <add>, %241, %cst_68 [2] : vector<2x16x32xf32> to vector<2x16xf32>
    %243 = vector.extract_strided_slice %240 {offsets = [0, 0, 32], sizes = [2, 16, 32], strides = [1, 1, 1]} : vector<2x16x64xf32> to vector<2x16x32xf32>
    %cst_69 = arith.constant dense<0.000000e+00> : vector<2x16xf32>
    %244 = vector.multi_reduction <add>, %243, %cst_69 [2] : vector<2x16x32xf32> to vector<2x16xf32>
    %cst_70 = arith.constant dense<0xFF800000> : vector<2xf32>
    %245 = vector.multi_reduction <maximumf>, %242, %cst_70 [1] : vector<2x16xf32> to vector<2xf32>
    %246 = vector.shape_cast %245 : vector<2xf32> to vector<2x1xf32>
    %247 = vector.broadcast %246 : vector<2x1xf32> to vector<2x16xf32>
    %248 = arith.subf %242, %247 : vector<2x16xf32>
    %249 = math.exp %248 : vector<2x16xf32>
    %cst_71 = arith.constant dense<0.000000e+00> : vector<2xf32>
    %250 = vector.multi_reduction <add>, %249, %cst_71 [1] : vector<2x16xf32> to vector<2xf32>
    %251 = vector.shape_cast %250 : vector<2xf32> to vector<2x1xf32>
    %252 = tpu.reciprocal %251 {approx = true} : vector<2x1xf32> -> vector<2x1xf32>
    %253 = vector.broadcast %252 : vector<2x1xf32> to vector<2x16xf32>
    %254 = arith.mulf %249, %253 : vector<2x16xf32>
    %cst_72 = arith.constant dense<0xFF800000> : vector<2xf32>
    %255 = vector.multi_reduction <maximumf>, %244, %cst_72 [1] : vector<2x16xf32> to vector<2xf32>
    %256 = vector.shape_cast %255 : vector<2xf32> to vector<2x1xf32>
    %257 = vector.broadcast %256 : vector<2x1xf32> to vector<2x16xf32>
    %258 = arith.subf %244, %257 : vector<2x16xf32>
    %259 = math.exp %258 : vector<2x16xf32>
    %cst_73 = arith.constant dense<0.000000e+00> : vector<2xf32>
    %260 = vector.multi_reduction <add>, %259, %cst_73 [1] : vector<2x16xf32> to vector<2xf32>
    %261 = vector.shape_cast %260 : vector<2xf32> to vector<2x1xf32>
    %262 = tpu.reciprocal %261 {approx = true} : vector<2x1xf32> -> vector<2x1xf32>
    %263 = vector.broadcast %262 : vector<2x1xf32> to vector<2x16xf32>
    %264 = arith.mulf %259, %263 : vector<2x16xf32>
    %265 = vector.shape_cast %254 : vector<2x16xf32> to vector<2x16x1xf32>
    %266 = vector.broadcast %265 : vector<2x16x1xf32> to vector<2x16x32xf32>
    %267 = arith.mulf %266, %35 : vector<2x16x32xf32>
    %cst_74 = arith.constant dense<0.000000e+00> : vector<2x32xf32>
    %268 = vector.multi_reduction <add>, %267, %cst_74 [1] : vector<2x16x32xf32> to vector<2x32xf32>
    %269 = vector.shape_cast %264 : vector<2x16xf32> to vector<2x16x1xf32>
    %270 = vector.broadcast %269 : vector<2x16x1xf32> to vector<2x16x32xf32>
    %271 = arith.mulf %270, %35 : vector<2x16x32xf32>
    %cst_75 = arith.constant dense<0.000000e+00> : vector<2x32xf32>
    %272 = vector.multi_reduction <add>, %271, %cst_75 [1] : vector<2x16x32xf32> to vector<2x32xf32>
    %273 = tpu.concatenate %268, %272 in 1 : vector<2x32xf32>, vector<2x32xf32> -> vector<2x64xf32>
    %274 = tpu.concatenate %233, %229, %273 in 1 : vector<2x64xf32>, vector<2x64xf32>, vector<2x64xf32> -> vector<2x192xf32>
    %cst_76 = arith.constant dense<0.000000e+00> : vector<2x256xf32>
    %275 = tpu.matmul %274, %45, %cst_76 {dimension_numbers = #tpu.dot_dimension_numbers<[1], [0], [0], [1], [0, 0, 1, 1], [], []>} : vector<2x192xf32>, vector<192x256xf32>, vector<2x256xf32> -> vector<2x256xf32>
    %276 = arith.addf %275, %43 : vector<2x256xf32>
    %277 = vector.extract_strided_slice %276 {offsets = [0, 0], sizes = [2, 192], strides = [1, 1]} : vector<2x256xf32> to vector<2x192xf32>
    %278 = arith.negf %277 : vector<2x192xf32>
    %279 = math.exp %278 : vector<2x192xf32>
    %cst_77 = arith.constant 1.000000e+00 : f32
    %280 = vector.broadcast %cst_77 : f32 to vector<2x192xf32>
    %281 = arith.addf %280, %279 : vector<2x192xf32>
    %282 = arith.divf %280, %281 : vector<2x192xf32>
    %283 = vector.extract_strided_slice %276 {offsets = [0, 192], sizes = [2, 64], strides = [1, 1]} : vector<2x256xf32> to vector<2x64xf32>
    %284 = math.tanh %283 : vector<2x64xf32>
    %285 = vector.extract_strided_slice %282 {offsets = [0, 0], sizes = [2, 64], strides = [1, 1]} : vector<2x192xf32> to vector<2x64xf32>
    %286 = vector.extract_strided_slice %282 {offsets = [0, 64], sizes = [2, 64], strides = [1, 1]} : vector<2x192xf32> to vector<2x64xf32>
    %287 = vector.extract_strided_slice %282 {offsets = [0, 128], sizes = [2, 64], strides = [1, 1]} : vector<2x192xf32> to vector<2x64xf32>
    %288 = arith.mulf %286, %227 : vector<2x64xf32>
    %289 = arith.mulf %285, %284 : vector<2x64xf32>
    %290 = arith.addf %288, %289 : vector<2x64xf32>
    %291 = math.tanh %290 : vector<2x64xf32>
    %292 = arith.mulf %287, %291 : vector<2x64xf32>
    %293 = vector.extract_strided_slice %292 {offsets = [0, 0], sizes = [2, 32], strides = [1, 1]} : vector<2x64xf32> to vector<2x32xf32>
    %294 = vector.extract_strided_slice %292 {offsets = [0, 32], sizes = [2, 32], strides = [1, 1]} : vector<2x64xf32> to vector<2x32xf32>
    %c4 = arith.constant 4 : index
    %c0_78 = arith.constant 0 : index
    %c0_79 = arith.constant 0 : index
    %295 = vector.load %arg2[%c4, %c0_78, %c0_79] : memref<6x2x64xf32, #tpu.memory_space<vmem>>, vector<1x2x64xf32>
    %296 = vector.shape_cast %295 : vector<1x2x64xf32> to vector<2x64xf32>
    %cst_80 = arith.constant dense<0.000000e+00> : vector<2x64xf32>
    %297 = tpu.matmul %292, %44, %cst_80 {dimension_numbers = #tpu.dot_dimension_numbers<[1], [0], [0], [1], [0, 0, 1, 1], [], []>} : vector<2x64xf32>, vector<64x64xf32>, vector<2x64xf32> -> vector<2x64xf32>
    %298 = arith.addf %297, %41 : vector<2x64xf32>
    %299 = vector.shape_cast %298 : vector<2x64xf32> to vector<2x1x64xf32>
    %300 = vector.broadcast %299 : vector<2x1x64xf32> to vector<2x16x64xf32>
    %301 = arith.addf %36, %300 : vector<2x16x64xf32>
    %302 = math.tanh %301 : vector<2x16x64xf32>
    %303 = arith.mulf %302, %39 : vector<2x16x64xf32>
    %304 = vector.extract_strided_slice %303 {offsets = [0, 0, 0], sizes = [2, 16, 32], strides = [1, 1, 1]} : vector<2x16x64xf32> to vector<2x16x32xf32>
    %cst_81 = arith.constant dense<0.000000e+00> : vector<2x16xf32>
    %305 = vector.multi_reduction <add>, %304, %cst_81 [2] : vector<2x16x32xf32> to vector<2x16xf32>
    %306 = vector.extract_strided_slice %303 {offsets = [0, 0, 32], sizes = [2, 16, 32], strides = [1, 1, 1]} : vector<2x16x64xf32> to vector<2x16x32xf32>
    %cst_82 = arith.constant dense<0.000000e+00> : vector<2x16xf32>
    %307 = vector.multi_reduction <add>, %306, %cst_82 [2] : vector<2x16x32xf32> to vector<2x16xf32>
    %cst_83 = arith.constant dense<0xFF800000> : vector<2xf32>
    %308 = vector.multi_reduction <maximumf>, %305, %cst_83 [1] : vector<2x16xf32> to vector<2xf32>
    %309 = vector.shape_cast %308 : vector<2xf32> to vector<2x1xf32>
    %310 = vector.broadcast %309 : vector<2x1xf32> to vector<2x16xf32>
    %311 = arith.subf %305, %310 : vector<2x16xf32>
    %312 = math.exp %311 : vector<2x16xf32>
    %cst_84 = arith.constant dense<0.000000e+00> : vector<2xf32>
    %313 = vector.multi_reduction <add>, %312, %cst_84 [1] : vector<2x16xf32> to vector<2xf32>
    %314 = vector.shape_cast %313 : vector<2xf32> to vector<2x1xf32>
    %315 = tpu.reciprocal %314 {approx = true} : vector<2x1xf32> -> vector<2x1xf32>
    %316 = vector.broadcast %315 : vector<2x1xf32> to vector<2x16xf32>
    %317 = arith.mulf %312, %316 : vector<2x16xf32>
    %cst_85 = arith.constant dense<0xFF800000> : vector<2xf32>
    %318 = vector.multi_reduction <maximumf>, %307, %cst_85 [1] : vector<2x16xf32> to vector<2xf32>
    %319 = vector.shape_cast %318 : vector<2xf32> to vector<2x1xf32>
    %320 = vector.broadcast %319 : vector<2x1xf32> to vector<2x16xf32>
    %321 = arith.subf %307, %320 : vector<2x16xf32>
    %322 = math.exp %321 : vector<2x16xf32>
    %cst_86 = arith.constant dense<0.000000e+00> : vector<2xf32>
    %323 = vector.multi_reduction <add>, %322, %cst_86 [1] : vector<2x16xf32> to vector<2xf32>
    %324 = vector.shape_cast %323 : vector<2xf32> to vector<2x1xf32>
    %325 = tpu.reciprocal %324 {approx = true} : vector<2x1xf32> -> vector<2x1xf32>
    %326 = vector.broadcast %325 : vector<2x1xf32> to vector<2x16xf32>
    %327 = arith.mulf %322, %326 : vector<2x16xf32>
    %328 = vector.shape_cast %317 : vector<2x16xf32> to vector<2x16x1xf32>
    %329 = vector.broadcast %328 : vector<2x16x1xf32> to vector<2x16x32xf32>
    %330 = arith.mulf %329, %35 : vector<2x16x32xf32>
    %cst_87 = arith.constant dense<0.000000e+00> : vector<2x32xf32>
    %331 = vector.multi_reduction <add>, %330, %cst_87 [1] : vector<2x16x32xf32> to vector<2x32xf32>
    %332 = vector.shape_cast %327 : vector<2x16xf32> to vector<2x16x1xf32>
    %333 = vector.broadcast %332 : vector<2x16x1xf32> to vector<2x16x32xf32>
    %334 = arith.mulf %333, %35 : vector<2x16x32xf32>
    %cst_88 = arith.constant dense<0.000000e+00> : vector<2x32xf32>
    %335 = vector.multi_reduction <add>, %334, %cst_88 [1] : vector<2x16x32xf32> to vector<2x32xf32>
    %336 = tpu.concatenate %331, %335 in 1 : vector<2x32xf32>, vector<2x32xf32> -> vector<2x64xf32>
    %337 = tpu.concatenate %296, %292, %336 in 1 : vector<2x64xf32>, vector<2x64xf32>, vector<2x64xf32> -> vector<2x192xf32>
    %cst_89 = arith.constant dense<0.000000e+00> : vector<2x256xf32>
    %338 = tpu.matmul %337, %45, %cst_89 {dimension_numbers = #tpu.dot_dimension_numbers<[1], [0], [0], [1], [0, 0, 1, 1], [], []>} : vector<2x192xf32>, vector<192x256xf32>, vector<2x256xf32> -> vector<2x256xf32>
    %339 = arith.addf %338, %43 : vector<2x256xf32>
    %340 = vector.extract_strided_slice %339 {offsets = [0, 0], sizes = [2, 192], strides = [1, 1]} : vector<2x256xf32> to vector<2x192xf32>
    %341 = arith.negf %340 : vector<2x192xf32>
    %342 = math.exp %341 : vector<2x192xf32>
    %cst_90 = arith.constant 1.000000e+00 : f32
    %343 = vector.broadcast %cst_90 : f32 to vector<2x192xf32>
    %344 = arith.addf %343, %342 : vector<2x192xf32>
    %345 = arith.divf %343, %344 : vector<2x192xf32>
    %346 = vector.extract_strided_slice %339 {offsets = [0, 192], sizes = [2, 64], strides = [1, 1]} : vector<2x256xf32> to vector<2x64xf32>
    %347 = math.tanh %346 : vector<2x64xf32>
    %348 = vector.extract_strided_slice %345 {offsets = [0, 0], sizes = [2, 64], strides = [1, 1]} : vector<2x192xf32> to vector<2x64xf32>
    %349 = vector.extract_strided_slice %345 {offsets = [0, 64], sizes = [2, 64], strides = [1, 1]} : vector<2x192xf32> to vector<2x64xf32>
    %350 = vector.extract_strided_slice %345 {offsets = [0, 128], sizes = [2, 64], strides = [1, 1]} : vector<2x192xf32> to vector<2x64xf32>
    %351 = arith.mulf %349, %290 : vector<2x64xf32>
    %352 = arith.mulf %348, %347 : vector<2x64xf32>
    %353 = arith.addf %351, %352 : vector<2x64xf32>
    %354 = math.tanh %353 : vector<2x64xf32>
    %355 = arith.mulf %350, %354 : vector<2x64xf32>
    %356 = vector.extract_strided_slice %355 {offsets = [0, 0], sizes = [2, 32], strides = [1, 1]} : vector<2x64xf32> to vector<2x32xf32>
    %357 = vector.extract_strided_slice %355 {offsets = [0, 32], sizes = [2, 32], strides = [1, 1]} : vector<2x64xf32> to vector<2x32xf32>
    %c5 = arith.constant 5 : index
    %c0_91 = arith.constant 0 : index
    %c0_92 = arith.constant 0 : index
    %358 = vector.load %arg2[%c5, %c0_91, %c0_92] : memref<6x2x64xf32, #tpu.memory_space<vmem>>, vector<1x2x64xf32>
    %359 = vector.shape_cast %358 : vector<1x2x64xf32> to vector<2x64xf32>
    %cst_93 = arith.constant dense<0.000000e+00> : vector<2x64xf32>
    %360 = tpu.matmul %355, %44, %cst_93 {dimension_numbers = #tpu.dot_dimension_numbers<[1], [0], [0], [1], [0, 0, 1, 1], [], []>} : vector<2x64xf32>, vector<64x64xf32>, vector<2x64xf32> -> vector<2x64xf32>
    %361 = arith.addf %360, %41 : vector<2x64xf32>
    %362 = vector.shape_cast %361 : vector<2x64xf32> to vector<2x1x64xf32>
    %363 = vector.broadcast %362 : vector<2x1x64xf32> to vector<2x16x64xf32>
    %364 = arith.addf %36, %363 : vector<2x16x64xf32>
    %365 = math.tanh %364 : vector<2x16x64xf32>
    %366 = arith.mulf %365, %39 : vector<2x16x64xf32>
    %367 = vector.extract_strided_slice %366 {offsets = [0, 0, 0], sizes = [2, 16, 32], strides = [1, 1, 1]} : vector<2x16x64xf32> to vector<2x16x32xf32>
    %cst_94 = arith.constant dense<0.000000e+00> : vector<2x16xf32>
    %368 = vector.multi_reduction <add>, %367, %cst_94 [2] : vector<2x16x32xf32> to vector<2x16xf32>
    %369 = vector.extract_strided_slice %366 {offsets = [0, 0, 32], sizes = [2, 16, 32], strides = [1, 1, 1]} : vector<2x16x64xf32> to vector<2x16x32xf32>
    %cst_95 = arith.constant dense<0.000000e+00> : vector<2x16xf32>
    %370 = vector.multi_reduction <add>, %369, %cst_95 [2] : vector<2x16x32xf32> to vector<2x16xf32>
    %cst_96 = arith.constant dense<0xFF800000> : vector<2xf32>
    %371 = vector.multi_reduction <maximumf>, %368, %cst_96 [1] : vector<2x16xf32> to vector<2xf32>
    %372 = vector.shape_cast %371 : vector<2xf32> to vector<2x1xf32>
    %373 = vector.broadcast %372 : vector<2x1xf32> to vector<2x16xf32>
    %374 = arith.subf %368, %373 : vector<2x16xf32>
    %375 = math.exp %374 : vector<2x16xf32>
    %cst_97 = arith.constant dense<0.000000e+00> : vector<2xf32>
    %376 = vector.multi_reduction <add>, %375, %cst_97 [1] : vector<2x16xf32> to vector<2xf32>
    %377 = vector.shape_cast %376 : vector<2xf32> to vector<2x1xf32>
    %378 = tpu.reciprocal %377 {approx = true} : vector<2x1xf32> -> vector<2x1xf32>
    %379 = vector.broadcast %378 : vector<2x1xf32> to vector<2x16xf32>
    %380 = arith.mulf %375, %379 : vector<2x16xf32>
    %cst_98 = arith.constant dense<0xFF800000> : vector<2xf32>
    %381 = vector.multi_reduction <maximumf>, %370, %cst_98 [1] : vector<2x16xf32> to vector<2xf32>
    %382 = vector.shape_cast %381 : vector<2xf32> to vector<2x1xf32>
    %383 = vector.broadcast %382 : vector<2x1xf32> to vector<2x16xf32>
    %384 = arith.subf %370, %383 : vector<2x16xf32>
    %385 = math.exp %384 : vector<2x16xf32>
    %cst_99 = arith.constant dense<0.000000e+00> : vector<2xf32>
    %386 = vector.multi_reduction <add>, %385, %cst_99 [1] : vector<2x16xf32> to vector<2xf32>
    %387 = vector.shape_cast %386 : vector<2xf32> to vector<2x1xf32>
    %388 = tpu.reciprocal %387 {approx = true} : vector<2x1xf32> -> vector<2x1xf32>
    %389 = vector.broadcast %388 : vector<2x1xf32> to vector<2x16xf32>
    %390 = arith.mulf %385, %389 : vector<2x16xf32>
    %391 = vector.shape_cast %380 : vector<2x16xf32> to vector<2x16x1xf32>
    %392 = vector.broadcast %391 : vector<2x16x1xf32> to vector<2x16x32xf32>
    %393 = arith.mulf %392, %35 : vector<2x16x32xf32>
    %cst_100 = arith.constant dense<0.000000e+00> : vector<2x32xf32>
    %394 = vector.multi_reduction <add>, %393, %cst_100 [1] : vector<2x16x32xf32> to vector<2x32xf32>
    %395 = vector.shape_cast %390 : vector<2x16xf32> to vector<2x16x1xf32>
    %396 = vector.broadcast %395 : vector<2x16x1xf32> to vector<2x16x32xf32>
    %397 = arith.mulf %396, %35 : vector<2x16x32xf32>
    %cst_101 = arith.constant dense<0.000000e+00> : vector<2x32xf32>
    %398 = vector.multi_reduction <add>, %397, %cst_101 [1] : vector<2x16x32xf32> to vector<2x32xf32>
    %399 = tpu.concatenate %394, %398 in 1 : vector<2x32xf32>, vector<2x32xf32> -> vector<2x64xf32>
    %400 = tpu.concatenate %359, %355, %399 in 1 : vector<2x64xf32>, vector<2x64xf32>, vector<2x64xf32> -> vector<2x192xf32>
    %cst_102 = arith.constant dense<0.000000e+00> : vector<2x256xf32>
    %401 = tpu.matmul %400, %45, %cst_102 {dimension_numbers = #tpu.dot_dimension_numbers<[1], [0], [0], [1], [0, 0, 1, 1], [], []>} : vector<2x192xf32>, vector<192x256xf32>, vector<2x256xf32> -> vector<2x256xf32>
    %402 = arith.addf %401, %43 : vector<2x256xf32>
    %403 = vector.extract_strided_slice %402 {offsets = [0, 0], sizes = [2, 192], strides = [1, 1]} : vector<2x256xf32> to vector<2x192xf32>
    %404 = arith.negf %403 : vector<2x192xf32>
    %405 = math.exp %404 : vector<2x192xf32>
    %cst_103 = arith.constant 1.000000e+00 : f32
    %406 = vector.broadcast %cst_103 : f32 to vector<2x192xf32>
    %407 = arith.addf %406, %405 : vector<2x192xf32>
    %408 = arith.divf %406, %407 : vector<2x192xf32>
    %409 = vector.extract_strided_slice %402 {offsets = [0, 192], sizes = [2, 64], strides = [1, 1]} : vector<2x256xf32> to vector<2x64xf32>
    %410 = math.tanh %409 : vector<2x64xf32>
    %411 = vector.extract_strided_slice %408 {offsets = [0, 0], sizes = [2, 64], strides = [1, 1]} : vector<2x192xf32> to vector<2x64xf32>
    %412 = vector.extract_strided_slice %408 {offsets = [0, 64], sizes = [2, 64], strides = [1, 1]} : vector<2x192xf32> to vector<2x64xf32>
    %413 = vector.extract_strided_slice %408 {offsets = [0, 128], sizes = [2, 64], strides = [1, 1]} : vector<2x192xf32> to vector<2x64xf32>
    %414 = arith.mulf %412, %353 : vector<2x64xf32>
    %415 = arith.mulf %411, %410 : vector<2x64xf32>
    %416 = arith.addf %414, %415 : vector<2x64xf32>
    %417 = math.tanh %416 : vector<2x64xf32>
    %418 = arith.mulf %413, %417 : vector<2x64xf32>
    %419 = vector.extract_strided_slice %418 {offsets = [0, 0], sizes = [2, 32], strides = [1, 1]} : vector<2x64xf32> to vector<2x32xf32>
    %420 = vector.extract_strided_slice %418 {offsets = [0, 32], sizes = [2, 32], strides = [1, 1]} : vector<2x64xf32> to vector<2x32xf32>
    %421 = arith.addf %167, %420 : vector<2x32xf32>
    %422 = arith.addf %230, %357 : vector<2x32xf32>
    %423 = arith.addf %293, %294 : vector<2x32xf32>
    %424 = arith.addf %356, %231 : vector<2x32xf32>
    %425 = arith.addf %419, %168 : vector<2x32xf32>
    %426 = tpu.concatenate %421, %422, %423, %424, %425 in 0 : vector<2x32xf32>, vector<2x32xf32>, vector<2x32xf32>, vector<2x32xf32>, vector<2x32xf32> -> vector<10x32xf32>
    %c0_104 = arith.constant 0 : index
    %c0_105 = arith.constant 0 : index
    %427 = vector.load %arg7[%c0_104, %c0_105] : memref<32x128xf32, #tpu.memory_space<vmem>>, vector<32x128xf32>
    %cst_106 = arith.constant dense<0.000000e+00> : vector<10x128xf32>
    %428 = tpu.matmul %426, %427, %cst_106 {dimension_numbers = #tpu.dot_dimension_numbers<[1], [0], [0], [1], [0, 0, 1, 1], [], []>} : vector<10x32xf32>, vector<32x128xf32>, vector<10x128xf32> -> vector<10x128xf32>
    %429 = vector.broadcast %6 : vector<1x128xf32> to vector<10x128xf32>
    %430 = arith.addf %428, %429 : vector<10x128xf32>
    %cst_107 = arith.constant dense<0xFF800000> : vector<10xf32>
    %431 = vector.multi_reduction <maximumf>, %430, %cst_107 [1] : vector<10x128xf32> to vector<10xf32>
    %432 = vector.shape_cast %431 : vector<10xf32> to vector<10x1xf32>
    %433 = vector.broadcast %432 : vector<10x1xf32> to vector<10x128xf32>
    %434 = arith.subf %430, %433 : vector<10x128xf32>
    %435 = math.exp %434 : vector<10x128xf32>
    %cst_108 = arith.constant dense<0.000000e+00> : vector<10xf32>
    %436 = vector.multi_reduction <add>, %435, %cst_108 [1] : vector<10x128xf32> to vector<10xf32>
    %437 = vector.shape_cast %436 : vector<10xf32> to vector<10x1xf32>
    %438 = math.log %437 : vector<10x1xf32>
    %439 = arith.addf %438, %432 : vector<10x1xf32>
    %440 = vector.broadcast %439 : vector<10x1xf32> to vector<10x128xf32>
    %441 = arith.subf %430, %440 : vector<10x128xf32>
    %c0_109 = arith.constant 0 : index
    %c0_110 = arith.constant 0 : index
    %442 = vector.load %arg9[%c0_109, %c0_110] : memref<10x128xf32, #tpu.memory_space<vmem>>, vector<10x128xf32>
    tpu.vector_store %arg9[%c0_109, %c0_110], %441 {strides = array<i32>} : memref<10x128xf32, #tpu.memory_space<vmem>>, vector<10x128xf32>,
    return
  }
}

</mosaic_0001>

<bundles_post_ra>
// kernel: tpu_custom_call.1
= control target key start
LH: loop header
LB: loop body
LE: loop exit
PB: predicated region body
PF: predicated region fallthrough
CT: control target
= control target key end

     0   :  { %14 = vsyncpa [#allocation3], 0  ;;  %s6412_s0 = inlined_call_operand.hbm [shape: f32[2,64], index: 0, kind: input, shape index: {}]   ;;  %s6413_s1 = inlined_call_operand.vmem [shape: f32[32,64], index: 1, kind: input, shape index: {}]   ;;  %s6414_s2 = inlined_call_operand.hbm [shape: f32[6,2,64], index: 2, kind: input, shape index: {}]   ;;  %s6415_s3 = inlined_call_operand.vmem [shape: f32[128,32], index: 3, kind: input, shape index: {}]   ;;  %s6416_s4 = inlined_call_operand.vmem [shape: f32[32,64], index: 4, kind: input, shape index: {}]   ;;  %s6417_s5 = inlined_call_operand.vmem [shape: f32[64,64], index: 5, kind: input, shape index: {}]   ;;  %s6418_s6 = inlined_call_operand.hbm [shape: f32[192,256], index: 6, kind: input, shape index: {}]   ;;  %s6419_s7 = inlined_call_operand.vmem [shape: f32[32,128], index: 7, kind: input, shape index: {}]   ;;  %s6420_s8 = inlined_call_operand.vmem [shape: f32[1,1024], index: 8, kind: input, shape index: {}]   ;;  %s6421_s9 = inlined_call_operand.hbm [shape: f32[10,128], index: 9, kind: output, shape index: {}]  }
   0x1   :  { %15 = vsyncpa [#allocation6], 0 }
   0x2   :  { %16 = vsyncpa [#allocation4], 0  ;;  %s5187_s30 = smov [#allocation5]   ;;  %s5093_s13 = scalar_lea.hbm %s6414_s2, 192 }
   0x3   :  { %s34_s10 = sshll.u32 %s5187_s30, 4  ;;  %p5094_p0 = scmp.ne.s32.totalorder %s6414_s2, %s5093_s13  ;;  %s35_s10 = int_to_ptr.vmem [resolvable:$true] %s34_s10 }
   0x4   :  { %p5097_p1 = scmp.lt.u32.totalorder %s5093_s13, %s6414_s2 }
   0x6   :  { %p5099_p2 = pnand %p5097_p1, %p5094_p0 }
   0x8   :  { %5102 = shalt.err (!%p5099_p2)
}
   0x9   :  { %s5103_s18 = scalar_lea.vmem %s35_s10, 192  ;;  %p5108_p4 = scmp.lt.s32.totalorder %s35_s10, %s35_s10 }
   0xa   :  { %p5104_p3 = scmp.ne.s32.totalorder %s35_s10, %s5103_s18  ;;  %p5109_p5 = scmp.lt.s32.totalorder %s5103_s18, %s5103_s18 }
   0xc   :  { %p5110_p6 = por %p5109_p5, %p5108_p4 }
   0xe   :  { %p5111_p7 = pnand %p5110_p6, %p5104_p3 }
  0x10   :  { %5114 = shalt.err (!%p5111_p7)
}
  0x11   :  { %s5188_s19 = smov 32   ;;  %s5189_s20 = smov 2  }
  0x12   :  { %40 = dma.hbm_to_vmem [thread:$0]  %s6414_s2, 192, %s35_s10, [#allocation6], %s5188_s19, %s5188_s19, %s5189_s20  }
  0x13   :  { %s5190_s23 = smov [#allocation2]   ;;  %s5191_s25 = smov [#allocation7]  }
  0x14   :  { %s23_s24 = sshll.u32 %s5190_s23, 4  ;;  %s52_s26 = sshll.u32 %s5191_s25, 4  ;;  %s24_s24 = int_to_ptr.vmem [resolvable:$true] %s23_s24  ;;  %s53_s26 = int_to_ptr.vmem [resolvable:$true] %s52_s26 }
  0x15   :  { %s5115_s29 = scalar_lea.hbm %s6412_s0, 32 }
  0x16   :  { %p5116_p8 = scmp.ne.s32.totalorder %s6412_s0, %s5115_s29  ;;  %p5119_p9 = scmp.lt.u32.totalorder %s5115_s29, %s6412_s0 }
  0x18   :  { %p5121_p10 = pnand %p5119_p9, %p5116_p8 }
  0x1a   :  { %5124 = shalt.err (!%p5121_p10)
}
  0x1b   :  { %s5125_s2 = scalar_lea.vmem %s24_s24, 32  ;;  %p5130_p12 = scmp.lt.s32.totalorder %s24_s24, %s24_s24 }
  0x1c   :  { %p5126_p11 = scmp.ne.s32.totalorder %s24_s24, %s5125_s2  ;;  %p5131_p13 = scmp.lt.s32.totalorder %s5125_s2, %s5125_s2 }
  0x1e   :  { %p5132_p0 = por %p5131_p13, %p5130_p12 }
  0x20   :  { %p5133_p1 = pnand %p5132_p0, %p5126_p11 }
  0x22   :  { %5136 = shalt.err (!%p5133_p1)
}
  0x23   :  { %26 = dma.hbm_to_vmem [thread:$0]  %s6412_s0, 32, %s24_s24, [#allocation3]  }
  0x24   :  { %s5137_s17 = scalar_lea.hbm %s6418_s6, 6144 }
  0x25   :  { %p5138_p2 = scmp.ne.s32.totalorder %s6418_s6, %s5137_s17  ;;  %p5141_p3 = scmp.lt.u32.totalorder %s5137_s17, %s6418_s6 }
  0x27   :  { %p5143_p4 = pnand %p5141_p3, %p5138_p2 }
  0x29   :  { %5146 = shalt.err (!%p5143_p4)
}
  0x2a   :  { %s5147_s23 = scalar_lea.vmem %s53_s26, 6144  ;;  %p5152_p6 = scmp.lt.s32.totalorder %s53_s26, %s53_s26 }
  0x2b   :  { %p5148_p5 = scmp.ne.s32.totalorder %s53_s26, %s5147_s23  ;;  %p5153_p7 = scmp.lt.s32.totalorder %s5147_s23, %s5147_s23 }
  0x2d   :  { %p5154_p8 = por %p5153_p7, %p5152_p6 }
  0x2f   :  { %p5155_p9 = pnand %p5154_p8, %p5148_p5 }
  0x31   :  { %5158 = shalt.err (!%p5155_p9)
}
  0x32   :  { %s5192_s0 = smov 256   ;;  %s5193_s24 = smov 16  }
  0x33   :  { %58 = dma.hbm_to_vmem [thread:$0]  %s6418_s6, 6144, %s53_s26, [#allocation6], %s5192_s0, %s5192_s0, %s5193_s24  }
  0x34   :  { %5181 = dma.done.wait [#allocation3], 32  }
  0x35   :  { %5182 = vsyncadd [#allocation3], 4294967264 }
  0x36   :  { %5183 = dma.done.wait [#allocation6], 6336  }
  0x37   :  { %5184 = vsyncadd [#allocation6], 4294960960  ;;  %v6422_v0 = vmov 0.0|0.0   ;;  %vm5195_vm0 = vmmov 0   ;;  %v6424_v1 = vmov 0.0   ;;  %v80_v2 = vld [vmem:[%s6415_s3] sm:$0xff] }
  0x38   :  { %4418 = vmatprep.subr.bf16.mxu0 %v6422_v0  ;;  %4254 = vmatprep.mubr.msk.f32.mxu0 %vm5195_vm0, %v6424_v1  ;;  %v81_v3 = vld [vmem:[%s6415_s3 + $0x8] sm:$0xff]  ;;  %v82_v4 = vld [vmem:[%s6415_s3 + $0x10] sm:$0xff]  ;;  %v83_v6 = vld [vmem:[%s6415_s3 + $0x18] sm:$0xff]  ;;  %vm94_vm1 = vcmask 523264   ;;  %vm313_vm2 = vcmask 261120   ;;  %s5198_s27 = smov 96  }
  0x39   :  { %v4419_v5 = vpack.c.bf16 %v81_v3, %v80_v2  ;;  %v4422_v7 = vpack.c.bf16 %v83_v6, %v82_v4  ;;  %v176_v8 = vld [vmem:[%s6415_s3 + $0x40] sm:$0xff]  ;;  %v177_v9 = vld [vmem:[%s6415_s3 + $0x48] sm:$0xff]  ;;  %v178_v10 = vld [vmem:[%s6415_s3 + $0x50] sm:$0xff]  ;;  %vm668_vm3 = vcmask 130112   ;;  %vm679_vm4 = vcmask 1041409   ;;  %s5200_s28 = smov 64  }
  0x3a   :  { %v84_v11 = vld [vmem:[%s6415_s3 + $0x20] sm:$0xff]  ;;  %v85_v12 = vld [vmem:[%s6415_s3 + $0x28] sm:$0xff]  ;;  %v4430_v13 = vpack.c.bf16 %v177_v9, %v176_v8  ;;  %v179_v14 = vld [vmem:[%s6415_s3 + $0x58] sm:$0xff]  ;;  %vm682_vm5 = vcmask 123904   ;;  %vm3967_vm6 = vcmask 1041408   ;;  %vm3969_vm7 = vcmask 1043456  }
  0x3b   :  { %4420 = vmatpush3.bf16.msra.mxu0 %v4419_v5  ;;  %v4434_v15 = vpack.c.bf16 %v179_v14, %v178_v10  ;;  %v180_v16 = vld [vmem:[%s6415_s3 + $0x60] sm:$0xff]  ;;  %v181_v17 = vld [vmem:[%s6415_s3 + $0x68] sm:$0xff]  ;;  %v4425_v19 = vpack.c.bf16 %v85_v12, %v84_v11  ;;  %v86_v20 = vld [vmem:[%s6415_s3 + $0x30] sm:$0xff]  ;;  %vm3971_vm8 = vcmask 1045504  }
  0x3c   :  { %4421 = vmatprep.subr.bf16.mxu0 %v6422_v0  ;;  %v172_v18 = vld [vmem:[%s6413_s1] sm:$0xff]  ;;  %4431 = vmatprep.subr.bf16.mxu1 %v4430_v13  ;;  %v87_v21 = vld [vmem:[%s6415_s3 + $0x38] sm:$0xff]  ;;  %v4438_v22 = vpack.c.bf16 %v181_v17, %v180_v16  ;;  %v182_v23 = vld [vmem:[%s6415_s3 + $0x70] sm:$0xff] }
  0x3d   :  { %4273 = vmatprep.mubr.msk.f32.mxu1 %vm94_vm1, %v172_v18  ;;  %4433 = vmatpush3.bf16.msra.mxu1 %v4430_v13  ;;  %v183_v24 = vld [vmem:[%s6415_s3 + $0x78] sm:$0xff]  ;;  %v4428_v25 = vpack.c.bf16 %v87_v21, %v86_v20  ;;  %v79_v27 = vld [vmem:[#allocation2] sm:$0x3]  ;;  %v173_v28 = vld [vmem:[%s6413_s1 + $0x8] sm:$0xff] }
  0x3e   :  { %4435 = vmatprep.subr.bf16.mxu1 %v4434_v15  ;;  %v4442_v26 = vpack.c.bf16 %v183_v24, %v182_v23  ;;  %v174_v29 = vld [vmem:[%s6413_s1 + $0x10] sm:$0xff]  ;;  %v175_v30 = vld [vmem:[%s6413_s1 + $0x18] sm:$0xff]  ;;  %v434_v31 = vld [vmem:[%s6417_s5] sm:$0xff] }
  0x3f   :  { %4423 = vmatpush3.bf16.msra.mxu0 %v4422_v7  ;;  %v435_v32 = vld [vmem:[%s6417_s5 + $0x8] sm:$0xff]  ;;  %v436_v34 = vld [vmem:[%s6417_s5 + $0x10] sm:$0xff]  ;;  %v437_v35 = vld [vmem:[%s6417_s5 + $0x18] sm:$0xff] }
  0x40   :  { %4424 = vmatprep.subr.bf16.mxu0 %v6422_v0  ;;  %v5372_v33 = vpack.c.bf16 %v435_v32, %v434_v31  ;;  %v5381_v36 = vpack.c.bf16 %v437_v35, %v436_v34  ;;  %v303_v37 = vld [vmem:[%s6416_s4] sm:$0xff]  ;;  %v304_v38 = vld [vmem:[%s6416_s4 + $0x8] sm:$0xff]  ;;  %v305_v43 = vld [vmem:[%s6416_s4 + $0x10] sm:$0xff] }
  0x41   :  { %4437 = vmatpush3.bf16.msra.mxu1 %v4434_v15  ;;  %v4446_v39 = vpack.c.bf16 %v304_v38, %v303_v37  ;;  %v438_v40 = vld [vmem:[%s6417_s5 + $0x20] sm:$0xff]  ;;  %v439_v41 = vld [vmem:[%s6417_s5 + $0x28] sm:$0xff]  ;;  %v306_v44 = vld [vmem:[%s6416_s4 + $0x18] sm:$0xff] }
  0x42   :  { %4439 = vmatprep.subr.bf16.mxu1 %v4438_v22  ;;  %v5397_v42 = vpack.c.bf16 %v439_v41, %v438_v40  ;;  %v4450_v45 = vpack.c.bf16 %v306_v44, %v305_v43  ;;  %v440_v46 = vld [vmem:[%s6417_s5 + $0x30] sm:$0xff]  ;;  %v441_v47 = vld [vmem:[%s6417_s5 + $0x38] sm:$0xff]  ;;  %v4108_v49 = vld [vmem:[%s6420_s8] ss:$0 sm:$0xff] }
  0x43   :  { %4426 = vmatpush3.bf16.msra.mxu0 %v4425_v19  ;;  %v5413_v48 = vpack.c.bf16 %v441_v47, %v440_v46  ;;  %v4110_v53 = vld [vmem:[%s6420_s8 + $0x1] ss:$0 sm:$0xff]  ;;  %v5461_v31 = vld [vmem:[%s6420_s8 + $0x3] ss:$0 sm:$0xff]  ;;  %v4115_v40 = vld [vmem:[%s6420_s8 + $0x2] ss:$0 sm:$0xff] }
  0x44   :  { %4427 = vmatprep.subr.bf16.mxu0 %v6422_v0 }
  0x45   :  { %4441 = vmatpush3.bf16.msra.mxu1 %v4438_v22 }
  0x46   :  { %4443 = vmatprep.subr.bf16.mxu1 %v4442_v26 }
  0x47   :  { %4429 = vmatpush3.bf16.msra.mxu0 %v4428_v25 }
  0x48   :  { %4447 = vmatprep.subr.bf16.mxu0 %v4446_v39 }
  0x49   :  { %4445 = vmatpush3.bf16.msra.mxu1 %v4442_v26  ;;  %v424_v26 = vlaneseq }
  0x4a   :  { %4255 = vmatmul.mubr.msk.f32.vlgmr.msra.gmra.mrb[0].mxu0 %vm94_vm1, %v79_v27  ;;  %4454 = vmatprep.subr.bf16.mxu1 %v6422_v0  ;;  %v5197_v27 = vmov 1966171168  }
  0x4b   :  { %4449 = vmatpush3.bf16.msra.mxu0 %v4446_v39 }
  0x4c   :  { %4274 = vmatmul.mubr.msk.f32.vlgmr.msra.gmra.mrb[0].mxu1 %vm94_vm1, %v173_v28  ;;  %4451 = vmatprep.subr.bf16.mxu0 %v4450_v45  ;;  %v570_v28 = vunpack.c.l.s4 %v5197_v27 }
  0x4d   :  { %4276 = vmatprep.mubr.msk.f32.mxu1 %vm94_vm1, %v174_v29  ;;  %4456 = vmatpush3.bf16.msra.mxu1 %v5372_v33  ;;  %v5456_v29 = vshrl.u32 %v424_v26, 7 }
  0x4e   :  { %4457 = vmatprep.subr.bf16.mxu1 %v6422_v0 }
  0x4f   :  { %4453 = vmatpush3.bf16.msra.mxu0 %v4450_v45  ;;  %v5468_v38 = vsub.s32 0, %v5456_v29 }
  0x50   :  { %4277 = vmatmul.mubr.msk.f32.gmra.mrb[2].mxu1 %vm94_vm1, %v175_v30  ;;  %v571_v30 = vunpack.c.0.s8 %v570_v28 }
  0x51   :  { %4309 = vmatprep.mubr.msk.f32.mxu1 %vm5195_vm0, %v6424_v1  ;;  %4459 = vmatpush3.bf16.msra.mxu1 %v5381_v36 }
  0x52   :  { %4460 = vmatprep.subr.bf16.mxu1 %v6422_v0  ;;  %v5464_v32 = vsub.s32 %v571_v30, %v5456_v29 }
  0x54   :  { %6458 = vst [vmem:[#allocation13_spill] sm:$0xff] %v5464_v32 }
  0x55   :  { %4462 = vmatpush3.bf16.msra.mxu1 %v5397_v42 }
  0x56   :  { %4463 = vmatprep.subr.bf16.mxu1 %v6422_v0 }
  0x59   :  { %4465 = vmatpush3.bf16.msra.mxu1 %v5413_v48 }
  0x5a   :  { %4514 = vmatprep.subr.bf16.mxu1 %v6422_v0 }
 0x11d   :  { %v164_v50 = vpop.f32.mrb[0].mxu0 }
 0x11e   :  { %v165_v51 = vadd.f32 %v4108_v49, %v164_v50  ;;  %v4256_v52 = vpop.f32.mrb[1].mxu0 }
 0x11f   :  { %v4275_v55 = vpop.f32.mrb[0].mxu1 }
 0x120   :  { %v169_v54 = vmin.f32 %v165_v51, 0.0  ;;  %v168_v56 = vmax.f32 %v165_v51, 0.0  ;;  %v274_v58 = vadd.f32 %v4275_v55, %v4110_v53  ;;  %v268_v59 = vpop.f32.mrb[1].mxu1 }
 0x121   :  { %v269_v60 = vadd.f32 %v4110_v53, %v268_v59 }
 0x122   :  { %v170_v57 = vmul.f32 0.25, %v169_v54  ;;  %v288_v62 = vmax.f32 %v274_v58, 0.0  ;;  %v292_v63 = vmin.f32 %v274_v58, 0.0 }
 0x123   :  { %v287_v2 = vmax.f32 %v269_v60, 0.0  ;;  %v291_v3 = vmin.f32 %v269_v60, 0.0  ;;  %v4278_v4 = vpop.f32.mrb[2].mxu1 }
 0x124   :  { %v171_v61 = vadd.f32 %v170_v57, %v168_v56  ;;  %v296_v5 = vmul.f32 0.25, %v292_v63  ;;  %v284_v6 = vadd.f32 %v4278_v4, %v4110_v53  ;;  %v278_v7 = vpop.f32.mrb[3].mxu1  ;;  %v5493_v56 = vld [vmem:[%s6420_s8 + $0x4] ss:$0 sm:$0xff] }
 0x125   :  { %v295_v8 = vmul.f32 0.25, %v291_v3  ;;  %v279_v9 = vadd.f32 %v4110_v53, %v278_v7 }
 0x126   :  { %491 = vrot.lane.b32.xlu0 %v171_v61, %s5188_s19  ;;  %v5425_v10 = vadd.f32 %v296_v5, %v288_v62  ;;  %v290_v11 = vmax.f32 %v284_v6, 0.0  ;;  %v294_v12 = vmin.f32 %v284_v6, 0.0 }
 0x127   :  { %v5427_v13 = vadd.f32 %v295_v8, %v287_v2  ;;  %v289_v14 = vmax.f32 %v279_v9, 0.0  ;;  %v293_v15 = vmin.f32 %v279_v9, 0.0 }
 0x128   :  { %v298_v16 = vmul.f32 0.25, %v294_v12 }
 0x129   :  { %v297_v17 = vmul.f32 0.25, %v293_v15  ;;  %4287 = vmatprep.mubr.msk.f32.mxu0 %vm313_vm2, %v5427_v13 }
 0x12a   :  { %v5431_v18 = vadd.f32 %v298_v16, %v290_v11  ;;  %4288 = vmatmul.mubr.msk.f32.vlgmr.msra.gmra.mrb[2].mxu0 %vm313_vm2, %v5425_v10 }
 0x12b   :  { %v5435_v19 = vadd.f32 %v297_v17, %v289_v14  ;;  %v658_v17 = vand.u32 127, %v424_v26 }
 0x12c   :  { %6457 = vst [vmem:[#allocation12_spill] sm:$0xff] %v5431_v18 }
 0x12d   :  { %4290 = vmatprep.mubr.msk.f32.mxu0 %vm313_vm2, %v5435_v19 }
 0x12e   :  { %4291 = vmatmul.mubr.msk.f32.gmra.mrb[4].mxu0 %vm313_vm2, %v5431_v18 }
 0x198   :  { %v492_v20 = vpop.permute.xlu0 %491 }
 0x199   :  { %v5442_v21 = vsel %vm313_vm2, %v171_v61, %v492_v20  ;;  %v663_v20 = vadd.s32 4294967288, %v658_v17 }
 0x19a   :  { %4310 = vmatmul.mubr.msk.f32.vlgmr.msra.gmra.mrb[4].mxu1 %vm94_vm1, %v5442_v21 }
 0x19b   :  { %4516 = vmatpush3.bf16.msra.mxu1 %v5372_v33  ;;  %4328 = vmatprep.mubr.msk.f32.mxu1 %vm5195_vm0, %v6424_v1 }
 0x19c   :  { %4517 = vmatprep.subr.bf16.mxu1 %v6422_v0 }
 0x19f   :  { %4519 = vmatpush3.bf16.msra.mxu1 %v5381_v36 }
 0x1a0   :  { %4520 = vmatprep.subr.bf16.mxu1 %v6422_v0 }
 0x1a3   :  { %4522 = vmatpush3.bf16.msra.mxu1 %v5397_v42 }
 0x1a4   :  { %4523 = vmatprep.subr.bf16.mxu1 %v6422_v0 }
 0x1a7   :  { %4525 = vmatpush3.bf16.msra.mxu1 %v5413_v48 }
 0x1fd   :  { %v4289_v22 = vpop.f32.mrb[2].mxu0 }
 0x1fe   :  { %v392_v23 = vpop.f32.mrb[3].mxu0  ;;  %v5475_v44 = vadd.f32 %v4289_v22, %v4115_v40  ;;  %v5513_v22 = vsub.s32 %v658_v17, %v5456_v29 }
 0x1ff   :  { %v5479_v47 = vadd.f32 %v4115_v40, %v392_v23  ;;  %v5516_v23 = vsub.s32 %v663_v20, %v5456_v29 }
 0x200   :  { %6459 = vst [vmem:[#allocation14_spill] sm:$0xff] %v5475_v44  ;;  %6463 = vst [vmem:[#allocation18_spill] sm:$0xff] %v5513_v22 }
 0x201   :  { %v4292_v24 = vpop.f32.mrb[4].mxu0  ;;  %6460 = vst [vmem:[#allocation15_spill] sm:$0xff] %v5479_v47 }
 0x202   :  { %v402_v25 = vpop.f32.mrb[5].mxu0  ;;  %v5481_v49 = vadd.f32 %v4292_v24, %v4115_v40 }
 0x203   :  { %v5485_v52 = vadd.f32 %v4115_v40, %v402_v25 }
 0x204   :  { %6461 = vst [vmem:[#allocation16_spill] sm:$0xff] %v5481_v49 }
 0x205   :  { %6462 = vst [vmem:[#allocation17_spill] sm:$0xff] %v5485_v52 }
 0x26d   :  { %v564_v34 = vpop.f32.mrb[4].mxu1 }
 0x26e   :  { %v565_v35 = vadd.f32 %v5461_v31, %v564_v34  ;;  %v4311_v37 = vpop.f32.mrb[5].mxu1 }
 0x270   :  { %v575_v39 = vrot.slane %v565_v35, %v5464_v32 }
 0x272   :  { %v576_v41 = vcombine.high %v575_v39, %v575_v39  ;;  %v583_v43 = vrot.slane %v575_v39, %v5464_v32 }
 0x274   :  { %v590_v45 = vrot.slane %v576_v41, %v5464_v32  ;;  %v594_v46 = vrot.slane %v583_v43, %v5468_v38 }
 0x276   :  { %v598_v50 = vrot.slane %v590_v45, %v5468_v38  ;;  %v602_v51 = vadd.f32 %v594_v46, %v5475_v44  ;;  %v601_v53 = vadd.f32 %v594_v46, %v5479_v47 }
 0x278   :  { %4841 = vtanh.f32 %v602_v51  ;;  %v604_v54 = vadd.f32 %v598_v50, %v5481_v49  ;;  %v603_v55 = vadd.f32 %v598_v50, %v5485_v52 }
 0x279   :  { %4843 = vtanh.f32 %v601_v53 }
 0x27a   :  { %4845 = vtanh.f32 %v604_v54 }
 0x27b   :  { %4847 = vtanh.f32 %v603_v55 }
 0x282   :  { %v4842_v57 = vpop.eup %4841 }
 0x283   :  { %v4844_v58 = vpop.eup %4843  ;;  %v610_v59 = vmul.f32 %v4842_v57, %v5493_v56 }
 0x284   :  { %v4846_v60 = vpop.eup %4845  ;;  %v609_v61 = vmul.f32 %v4844_v58, %v5493_v56 }
 0x285   :  { %v4848_v62 = vpop.eup %4847  ;;  %631 = vrot.lane.b32.xlu1 %v610_v59, %s5198_s27  ;;  %v612_v2 = vmul.f32 %v4846_v60, %v5493_v56  ;;  %v616_v14 = vsel %vm313_vm2, %v610_v59, 0.0 }
 0x286   :  { %629 = vrot.lane.b32.xlu0 %v609_v61, %s5198_s27  ;;  %v611_v63 = vmul.f32 %v4848_v62, %v5493_v56  ;;  %v613_v12 = vsel %vm313_vm2, %v609_v61, 0.0  ;;  %v5199_v61 = vmov 0   ;;  %v5535_v62 = vsub.s32 1, %v5456_v29 }
 0x287   :  { %v622_v16 = vsel %vm313_vm2, %v612_v2, 0.0  ;;  %4840 = vset.pattern.permute.xlu1 %v5199_v61  ;;  %4839 = vset.pattern.permute.xlu0 %v5199_v61 }
 0x288   :  { %v619_v15 = vsel %vm313_vm2, %v611_v63, 0.0 }
 0x289   :  { %633 = vrot.lane.b32.xlu1 %v611_v63, %s5198_s27 }
 0x28a   :  { %635 = vrot.lane.b32.xlu0 %v612_v2, %s5198_s27 }
 0x2f7   :  { %v632_v3 = vpop.permute.xlu1 %631 }
 0x2f8   :  { %v630_v4 = vpop.permute.xlu0 %629  ;;  %v644_v5 = vsel %vm313_vm2, %v632_v3, 0.0 }
 0x2f9   :  { %645 = vadd.xlane.f32.xlu0 %v644_v5  ;;  %v641_v6 = vsel %vm313_vm2, %v630_v4, 0.0 }
 0x2fa   :  { %642 = vadd.xlane.f32.xlu1 %v641_v6 }
 0x2fb   :  { %v634_v7 = vpop.permute.xlu1 %633 }
 0x2fc   :  { %v636_v8 = vpop.permute.xlu0 %635  ;;  %v647_v9 = vsel %vm313_vm2, %v634_v7, 0.0 }
 0x2fd   :  { %v650_v11 = vsel %vm313_vm2, %v636_v8, 0.0  ;;  %648 = vadd.xlane.f32.xlu0 %v647_v9 }
 0x2fe   :  { %651 = vadd.xlane.f32.xlu1 %v650_v11 }
 0x301   :  { %614 = vadd.xlane.f32.xlu0 %v613_v12 }
 0x302   :  { %617 = vadd.xlane.f32.xlu1 %v616_v14 }
 0x305   :  { %620 = vadd.xlane.f32.xlu0 %v619_v15 }
 0x306   :  { %623 = vadd.xlane.f32.xlu1 %v622_v16 }
 0x386   :  { %v646_v24 = vpop.xlane.xlu0 %645 }
 0x387   :  { %v643_v25 = vpop.xlane.xlu1 %642  ;;  %v775_v27 = vrot.slane %v646_v24, %v5516_v23 }
 0x388   :  { %v771_v28 = vrot.slane %v643_v25, %v5513_v22 }
 0x38a   :  { %v649_v30 = vpop.xlane.xlu0 %648  ;;  %v776_v39 = vsel %vm668_vm3, %v775_v27, %v771_v28 }
 0x38b   :  { %v780_v34 = vrot.slane %v649_v30, %v5513_v22  ;;  %v652_v35 = vpop.xlane.xlu1 %651 }
 0x38c   :  { %v784_v26 = vrot.slane %v652_v35, %v5516_v23 }
 0x38e   :  { %v615_v37 = vpop.xlane.xlu0 %614  ;;  %v785_v40 = vsel %vm668_vm3, %v784_v26, %v780_v34 }
 0x38f   :  { %v618_v41 = vpop.xlane.xlu1 %617  ;;  %v786_v43 = vsel %vm679_vm4, %v785_v40, %v776_v39  ;;  %v662_v46 = vrot.slane %v615_v37, %v5513_v22 }
 0x390   :  { %v788_v45 = vsel %vm682_vm5, %v786_v43, -inf  ;;  %v667_v50 = vrot.slane %v618_v41, %v5516_v23 }
 0x391   :  { %789 = vmax.xlane.f32.xlu0 %v788_v45 }
 0x392   :  { %v621_v51 = vpop.xlane.xlu0 %620  ;;  %v669_v57 = vsel %vm668_vm3, %v667_v50, %v662_v46 }
 0x393   :  { %v624_v53 = vpop.xlane.xlu1 %623  ;;  %v673_v54 = vrot.slane %v621_v51, %v5513_v22 }
 0x394   :  { %v677_v55 = vrot.slane %v624_v53, %v5516_v23 }
 0x396   :  { %v678_v58 = vsel %vm668_vm3, %v677_v55, %v673_v54 }
 0x397   :  { %v680_v59 = vsel %vm679_vm4, %v678_v58, %v669_v57 }
 0x398   :  { %v683_v60 = vsel %vm682_vm5, %v680_v59, -inf }
 0x399   :  { %684 = vmax.xlane.f32.xlu1 %v683_v60 }
 0x41e   :  { %v790_v63 = vpop.xlane.xlu0 %789 }
 0x41f   :  { %v795_v2 = vrot.slane %v790_v63, %v5468_v38  ;;  %v799_v3 = vrot.slane %v790_v63, %v5535_v62 }
 0x421   :  { %v802_v4 = vsub.f32 %v643_v25, %v795_v2  ;;  %v803_v5 = vsub.f32 %v646_v24, %v795_v2  ;;  %v804_v6 = vsub.f32 %v649_v30, %v799_v3  ;;  %v805_v9 = vsub.f32 %v652_v35, %v799_v3 }
 0x423   :  { %v806_v7 = vmul.f32 1.442695, %v802_v4  ;;  %v808_v8 = vmul.f32 1.442695, %v803_v5  ;;  %v810_v11 = vmul.f32 1.442695, %v804_v6 }
 0x424   :  { %v812_v29 = vmul.f32 1.442695, %v805_v9 }
 0x425   :  { %4849 = vpow2.f32 %v806_v7 }
 0x426   :  { %4851 = vpow2.f32 %v808_v8  ;;  %v685_v12 = vpop.xlane.xlu1 %684 }
 0x427   :  { %v690_v14 = vrot.slane %v685_v12, %v5468_v38  ;;  %4853 = vpow2.f32 %v810_v11  ;;  %v694_v16 = vrot.slane %v685_v12, %v5535_v62 }
 0x428   :  { %4855 = vpow2.f32 %v812_v29 }
 0x429   :  { %v697_v15 = vsub.f32 %v615_v37, %v690_v14  ;;  %v698_v17 = vsub.f32 %v618_v41, %v690_v14  ;;  %v699_v27 = vsub.f32 %v621_v51, %v694_v16  ;;  %v700_v34 = vsub.f32 %v624_v53, %v694_v16 }
 0x42b   :  { %v701_v20 = vmul.f32 1.442695, %v697_v15  ;;  %v703_v28 = vmul.f32 1.442695, %v698_v17  ;;  %v705_v35 = vmul.f32 1.442695, %v699_v27 }
 0x42c   :  { %v707_v37 = vmul.f32 1.442695, %v700_v34 }
 0x42d   :  { %4857 = vpow2.f32 %v701_v20 }
 0x42e   :  { %4859 = vpow2.f32 %v703_v28 }
 0x42f   :  { %v4850_v25 = vpop.eup %4849  ;;  %4861 = vpow2.f32 %v705_v35 }
 0x430   :  { %v4852_v24 = vpop.eup %4851  ;;  %819 = vperm.xlu0 %4839, %v4850_v25   ;;  %4863 = vpow2.f32 %v707_v37 }
 0x431   :  { %822 = vperm.xlu1 %4840, %v4852_v24   ;;  %v4854_v30 = vpop.eup %4853 }
 0x432   :  { %v4856_v26 = vpop.eup %4855 }
 0x435   :  { %825 = vperm.xlu1 %4840, %v4854_v30  }
 0x437   :  { %v4858_v39 = vpop.eup %4857 }
 0x438   :  { %v4860_v40 = vpop.eup %4859 }
 0x439   :  { %828 = vperm.xlu1 %4840, %v4856_v26   ;;  %v4862_v41 = vpop.eup %4861 }
 0x43a   :  { %v4864_v43 = vpop.eup %4863 }
 0x43d   :  { %714 = vperm.xlu1 %4840, %v4858_v39  }
 0x441   :  { %717 = vperm.xlu1 %4840, %v4860_v40  }
 0x445   :  { %720 = vperm.xlu1 %4840, %v4862_v41  }
 0x449   :  { %723 = vperm.xlu1 %4840, %v4864_v43  }
 0x4af   :  { %v820_v46 = vpop.permute.xlu0 %819 }
 0x4b0   :  { %v823_v45 = vpop.permute.xlu1 %822  ;;  %v833_v53 = vrot.slane %v820_v46, %v5513_v22 }
 0x4b1   :  { %v837_v51 = vrot.slane %v823_v45, %v5516_v23 }
 0x4b3   :  { %v838_v58 = vsel %vm668_vm3, %v837_v51, %v833_v53  ;;  %v442_v53 = vld [vmem:[#allocation7] sm:$0xff] }
 0x4b4   :  { %v826_v50 = vpop.permute.xlu1 %825 }
 0x4b5   :  { %v842_v55 = vrot.slane %v826_v50, %v5513_v22 }
 0x4b8   :  { %v829_v54 = vpop.permute.xlu1 %828 }
 0x4b9   :  { %v846_v57 = vrot.slane %v829_v54, %v5516_v23 }
 0x4bb   :  { %v847_v59 = vsel %vm668_vm3, %v846_v57, %v842_v55  ;;  %v444_v55 = vld [vmem:[#allocation7 + $0x10] sm:$0xff] }
 0x4bc   :  { %v715_v60 = vpop.permute.xlu1 %714  ;;  %v848_v61 = vsel %vm679_vm4, %v847_v59, %v838_v58  ;;  %v5565_v57 = vpack.c.bf16 %v444_v55, %v442_v53  ;;  %v451_v59 = vld [vmem:[#allocation7 + $0x48] sm:$0xff]  ;;  %v470_v55 = vld [vmem:[#allocation7 + $0xe0] sm:$0xff] }
 0x4bd   :  { %v850_v63 = vsel %vm682_vm5, %v848_v61, 0.0  ;;  %v728_v6 = vrot.slane %v715_v60, %v5513_v22  ;;  %v453_v60 = vld [vmem:[#allocation7 + $0x58] sm:$0xff] }
 0x4be   :  { %851 = vadd.xlane.f32.xlu1 %v850_v63  ;;  %v5575_v63 = vpack.c.bf16 %v453_v60, %v451_v59  ;;  %v474_v60 = vld [vmem:[#allocation7 + $0x100] sm:$0xff] }
 0x4c0   :  { %v718_v2 = vpop.permute.xlu1 %717 }
 0x4c1   :  { %v732_v4 = vrot.slane %v718_v2, %v5516_v23  ;;  %v450_v2 = vld [vmem:[#allocation7 + $0x40] sm:$0xff] }
 0x4c3   :  { %v733_v9 = vsel %vm668_vm3, %v732_v4, %v728_v6  ;;  %v455_v4 = vld [vmem:[#allocation7 + $0x68] sm:$0xff] }
 0x4c4   :  { %v721_v3 = vpop.permute.xlu1 %720 }
 0x4c5   :  { %v737_v7 = vrot.slane %v721_v3, %v5513_v22  ;;  %v452_v3 = vld [vmem:[#allocation7 + $0x50] sm:$0xff] }
 0x4c6   :  { %v5578_v6 = vpack.c.bf16 %v452_v3, %v450_v2  ;;  %v476_v2 = vld [vmem:[#allocation7 + $0x110] sm:$0xff]  ;;  %v479_v3 = vld [vmem:[#allocation7 + $0x128] sm:$0xff] }
 0x4c8   :  { %v724_v5 = vpop.permute.xlu1 %723 }
 0x4c9   :  { %v741_v8 = vrot.slane %v724_v5, %v5516_v23  ;;  %v457_v5 = vld [vmem:[#allocation7 + $0x78] sm:$0xff] }
 0x4cb   :  { %v742_v11 = vsel %vm668_vm3, %v741_v8, %v737_v7  ;;  %v5581_v7 = vpack.c.bf16 %v457_v5, %v455_v4  ;;  %v454_v8 = vld [vmem:[#allocation7 + $0x60] sm:$0xff]  ;;  %v481_v4 = vld [vmem:[#allocation7 + $0x138] sm:$0xff]  ;;  %v5614_v5 = vpack.c.bf16 %v476_v2, %v474_v60 }
 0x4cc   :  { %v743_v12 = vsel %vm679_vm4, %v742_v11, %v733_v9  ;;  %v456_v9 = vld [vmem:[#allocation7 + $0x70] sm:$0xff]  ;;  %v459_v11 = vld [vmem:[#allocation7 + $0x88] sm:$0xff] }
 0x4cd   :  { %v745_v14 = vsel %vm682_vm5, %v743_v12, 0.0  ;;  %v461_v12 = vld [vmem:[#allocation7 + $0x98] sm:$0xff] }
 0x4ce   :  { %746 = vadd.xlane.f32.xlu0 %v745_v14  ;;  %v5584_v14 = vpack.c.bf16 %v456_v9, %v454_v8  ;;  %v5617_v8 = vpack.c.bf16 %v481_v4, %v479_v3  ;;  %v478_v9 = vld [vmem:[#allocation7 + $0x120] sm:$0xff] }
 0x54b   :  { %v852_v29 = vpop.xlane.xlu1 %851 }
 0x54c   :  { %4865 = vrcp.f32 %v852_v29  ;;  %v5587_v29 = vpack.c.bf16 %v461_v12, %v459_v11  ;;  %v480_v11 = vld [vmem:[#allocation7 + $0x130] sm:$0xff]  ;;  %v483_v12 = vld [vmem:[#allocation7 + $0x148] sm:$0xff] }
 0x556   :  { %v4866_v15 = vpop.eup %4865 }
 0x557   :  { %v858_v16 = vrot.slane %v4866_v15, %v5468_v38  ;;  %v862_v27 = vrot.slane %v4866_v15, %v5535_v62  ;;  %v458_v15 = vld [vmem:[#allocation7 + $0x80] sm:$0xff] }
 0x559   :  { %v866_v17 = vmul.f32 %v4852_v24, %v858_v16  ;;  %v865_v20 = vmul.f32 %v4850_v25, %v858_v16  ;;  %v867_v34 = vmul.f32 %v4854_v30, %v862_v27  ;;  %v868_v35 = vmul.f32 %v4856_v26, %v862_v27  ;;  %v443_v30 = vld [vmem:[#allocation7 + $0x8] sm:$0xff]  ;;  %v445_v26 = vld [vmem:[#allocation7 + $0x18] sm:$0xff]  ;;  %v460_v16 = vld [vmem:[#allocation7 + $0x90] sm:$0xff] }
 0x55a   :  { %v5563_v54 = vpack.c.bf16 %v445_v26, %v443_v30  ;;  %v5590_v27 = vpack.c.bf16 %v460_v16, %v458_v15  ;;  %v473_v30 = vld [vmem:[#allocation7 + $0xf8] sm:$0xff]  ;;  %v5620_v16 = vpack.c.bf16 %v480_v11, %v478_v9 }
 0x55b   :  { %918 = vperm.xlu1 %4840, %v866_v17   ;;  %913 = vperm.xlu0 %4839, %v865_v20   ;;  %v747_v28 = vpop.xlane.xlu0 %746  ;;  %v463_v17 = vld [vmem:[#allocation7 + $0xa8] sm:$0xff]  ;;  %v465_v20 = vld [vmem:[#allocation7 + $0xb8] sm:$0xff] }
 0x55c   :  { %4867 = vrcp.f32 %v747_v28  ;;  %4467 = vmatprep.subr.bf16.mxu0 %v5563_v54  ;;  %4527 = vmatprep.subr.bf16.mxu1 %v5563_v54  ;;  %v5593_v28 = vpack.c.bf16 %v465_v20, %v463_v17  ;;  %v485_v15 = vld [vmem:[#allocation7 + $0x158] sm:$0xff]  ;;  %v482_v20 = vld [vmem:[#allocation7 + $0x140] sm:$0xff] }
 0x55d   :  { %4469 = vmatpush1.bf16.msra.mxu0 %v5565_v57  ;;  %v5623_v17 = vpack.c.bf16 %v485_v15, %v483_v12 }
 0x55f   :  { %923 = vperm.xlu1 %4840, %v867_v34   ;;  %928 = vperm.xlu0 %4839, %v868_v35   ;;  %v462_v34 = vld [vmem:[#allocation7 + $0xa0] sm:$0xff]  ;;  %v464_v35 = vld [vmem:[#allocation7 + $0xb0] sm:$0xff] }
 0x566   :  { %v4868_v37 = vpop.eup %4867 }
 0x567   :  { %v753_v45 = vrot.slane %v4868_v37, %v5468_v38  ;;  %v757_v51 = vrot.slane %v4868_v37, %v5535_v62  ;;  %v467_v37 = vld [vmem:[#allocation7 + $0xc8] sm:$0xff] }
 0x569   :  { %v761_v46 = vmul.f32 %v4860_v40, %v753_v45  ;;  %v760_v50 = vmul.f32 %v4858_v39, %v753_v45  ;;  %v763_v25 = vmul.f32 %v4864_v43, %v757_v51  ;;  %v762_v24 = vmul.f32 %v4862_v41, %v757_v51  ;;  %v447_v40 = vld [vmem:[#allocation7 + $0x28] sm:$0xff]  ;;  %v449_v39 = vld [vmem:[#allocation7 + $0x38] sm:$0xff]  ;;  %v446_v43 = vld [vmem:[#allocation7 + $0x20] sm:$0xff] }
 0x56a   :  { %v5567_v58 = vpack.c.bf16 %v449_v39, %v447_v40  ;;  %v448_v41 = vld [vmem:[#allocation7 + $0x30] sm:$0xff]  ;;  %v469_v45 = vld [vmem:[#allocation7 + $0xd8] sm:$0xff]  ;;  %v466_v51 = vld [vmem:[#allocation7 + $0xc0] sm:$0xff] }
 0x56b   :  { %876 = vperm.xlu0 %4839, %v761_v46   ;;  %871 = vperm.xlu1 %4840, %v760_v50   ;;  %v5572_v61 = vpack.c.bf16 %v448_v41, %v446_v43  ;;  %v5596_v46 = vpack.c.bf16 %v464_v35, %v462_v34  ;;  %v5599_v50 = vpack.c.bf16 %v469_v45, %v467_v37  ;;  %v472_v40 = vld [vmem:[#allocation7 + $0xf0] sm:$0xff]  ;;  %v475_v39 = vld [vmem:[#allocation7 + $0x108] sm:$0xff]  ;;  %v477_v43 = vld [vmem:[#allocation7 + $0x118] sm:$0xff] }
 0x56c   :  { %4471 = vmatprep.subr.bf16.mxu0 %v5567_v58  ;;  %v5608_v41 = vpack.c.bf16 %v472_v40, %v470_v55  ;;  %v5611_v59 = vpack.c.bf16 %v477_v43, %v475_v39  ;;  %v484_v34 = vld [vmem:[#allocation7 + $0x150] sm:$0xff]  ;;  %v487_v35 = vld [vmem:[#allocation7 + $0x168] sm:$0xff]  ;;  %v489_v37 = vld [vmem:[#allocation7 + $0x178] sm:$0xff] }
 0x56d   :  { %4473 = vmatpush1.bf16.msra.mxu0 %v5572_v61  ;;  %v5626_v45 = vpack.c.bf16 %v484_v34, %v482_v20 }
 0x56e   :  { %4475 = vmatprep.subr.bf16.mxu0 %v5575_v63 }
 0x56f   :  { %886 = vperm.xlu0 %4839, %v763_v25   ;;  %881 = vperm.xlu1 %4840, %v762_v24   ;;  %v468_v25 = vld [vmem:[#allocation7 + $0xd0] sm:$0xff]  ;;  %v471_v24 = vld [vmem:[#allocation7 + $0xe8] sm:$0xff]  ;;  %6464 = vst [vmem:[#allocation19_spill] sm:$0xff] %v5626_v45 }
 0x570   :  { %v5602_v26 = vpack.c.bf16 %v468_v25, %v466_v51  ;;  %v5605_v53 = vpack.c.bf16 %v473_v30, %v471_v24  ;;  %v5629_v51 = vpack.c.bf16 %v489_v37, %v487_v35  ;;  %v486_v25 = vld [vmem:[#allocation7 + $0x160] sm:$0xff]  ;;  %v488_v24 = vld [vmem:[#allocation7 + $0x170] sm:$0xff] }
 0x571   :  { %4477 = vmatpush1.bf16.msra.mxu0 %v5578_v6  ;;  %v5632_v30 = vpack.c.bf16 %v488_v24, %v486_v25 }
 0x572   :  { %4479 = vmatprep.subr.bf16.mxu0 %v5581_v7  ;;  %6465 = vst [vmem:[#allocation20_spill] sm:$0xff] %v5629_v51 }
 0x573   :  { %964 = vrot.lane.b32.xlu0 %v5442_v21, %s5200_s28  ;;  %6466 = vst [vmem:[#allocation21_spill] sm:$0xff] %v5632_v30 }
 0x575   :  { %4481 = vmatpush1.bf16.msra.mxu0 %v5584_v14 }
 0x576   :  { %4483 = vmatprep.subr.bf16.mxu0 %v5587_v29 }
 0x579   :  { %4485 = vmatpush1.bf16.msra.mxu0 %v5590_v27 }
 0x57a   :  { %4487 = vmatprep.subr.bf16.mxu0 %v5593_v28 }
 0x57d   :  { %4489 = vmatpush1.bf16.msra.mxu0 %v5596_v46 }
 0x57e   :  { %4491 = vmatprep.subr.bf16.mxu0 %v5599_v50 }
 0x581   :  { %4493 = vmatpush1.bf16.msra.mxu0 %v5602_v26 }
 0x582   :  { %4495 = vmatprep.subr.bf16.mxu0 %v5605_v53 }
 0x585   :  { %4497 = vmatpush1.bf16.msra.mxu0 %v5608_v41 }
 0x586   :  { %4499 = vmatprep.subr.bf16.mxu0 %v5611_v59 }
 0x589   :  { %4501 = vmatpush1.bf16.msra.mxu0 %v5614_v5 }
 0x58a   :  { %4503 = vmatprep.subr.bf16.mxu0 %v5617_v8 }
 0x58d   :  { %4505 = vmatpush1.bf16.msra.mxu0 %v5620_v16 }
 0x58e   :  { %4507 = vmatprep.subr.bf16.mxu0 %v5623_v17 }
 0x591   :  { %4509 = vmatpush1.bf16.msra.mxu0 %v5626_v45 }
 0x592   :  { %4511 = vmatprep.subr.bf16.mxu0 %v5629_v51 }
 0x595   :  { %4513 = vmatpush1.bf16.msra.mxu0 %v5632_v30 }
 0x596   :  { %4574 = vmatprep.subr.bf16.mxu0 %v6422_v0 }
 0x5da   :  { %v919_v55 = vpop.permute.xlu1 %918  ;;  %v914_v40 = vpop.permute.xlu0 %913 }
 0x5db   :  { %v932_v39 = vmul.f32 %v919_v55, %v5425_v10  ;;  %v931_v43 = vmul.f32 %v914_v40, %v5427_v13 }
 0x5dd   :  { %v936_v60 = vsel %vm313_vm2, %v932_v39, 0.0  ;;  %v935_v2 = vsel %vm313_vm2, %v931_v43, 0.0 }
 0x5de   :  { %v937_v3 = vadd.f32 %v936_v60, %v935_v2  ;;  %v924_v4 = vpop.permute.xlu1 %923  ;;  %v929_v9 = vpop.permute.xlu0 %928 }
 0x5df   :  { %v933_v11 = vmul.f32 %v924_v4, %v5435_v19  ;;  %v934_v12 = vmul.f32 %v929_v9, %v5431_v18 }
 0x5e0   :  { %v938_v15 = vrot.slane %v937_v3, 4 }
 0x5e1   :  { %v944_v20 = vsel %vm313_vm2, %v933_v11, 0.0  ;;  %v945_v34 = vsel %vm313_vm2, %v934_v12, 0.0 }
 0x5e2   :  { %v939_v35 = vadd.f32 %v938_v15, %v937_v3  ;;  %v946_v37 = vadd.f32 %v945_v34, %v944_v20 }
 0x5e4   :  { %v940_v25 = vrot.slane %v939_v35, 2  ;;  %v947_v24 = vrot.slane %v946_v37, 4 }
 0x5e6   :  { %v948_v55 = vadd.f32 %v947_v24, %v946_v37  ;;  %v941_v40 = vadd.f32 %v940_v25, %v939_v35 }
 0x5e8   :  { %v949_v39 = vrot.slane %v948_v55, 2  ;;  %v942_v43 = vrot.slane %v941_v40, 1 }
 0x5ea   :  { %v950_v60 = vadd.f32 %v949_v39, %v948_v55  ;;  %v943_v0 = vadd.f32 %v942_v43, %v941_v40  ;;  %v872_v9 = vpop.permute.xlu1 %871  ;;  %v877_v11 = vpop.permute.xlu0 %876 }
 0x5eb   :  { %v889_v20 = vmul.f32 %v872_v9, %v5427_v13  ;;  %v890_v34 = vmul.f32 %v877_v11, %v5425_v10 }
 0x5ec   :  { %v951_v2 = vrot.slane %v950_v60, 1 }
 0x5ee   :  { %v952_v1 = vadd.f32 %v951_v2, %v950_v60  ;;  %v882_v22 = vpop.permute.xlu1 %881  ;;  %v887_v12 = vpop.permute.xlu0 %886 }
 0x5ef   :  { %v891_v3 = vmul.f32 %v882_v22, %v5435_v19  ;;  %v892_v15 = vmul.f32 %v887_v12, %v5431_v18 }
 0x5f0   :  { %v959_v4 = vsel %vm679_vm4, %v952_v1, %v943_v0  ;;  %v893_v0 = vsel %vm313_vm2, %v889_v20, 0.0  ;;  %v894_v1 = vsel %vm313_vm2, %v890_v34, 0.0 }
 0x5f1   :  { %960 = vrot.lane.b32.xlu1 %v959_v4, %s5188_s19  ;;  %v902_v35 = vsel %vm313_vm2, %v891_v3, 0.0  ;;  %v903_v37 = vsel %vm313_vm2, %v892_v15, 0.0  ;;  %v895_v24 = vadd.f32 %v894_v1, %v893_v0  ;;  %v6468_v0 = vmov 0.0|0.0  }
 0x5f2   :  { %v904_v25 = vadd.f32 %v903_v37, %v902_v35  ;;  %v965_v18 = vpop.permute.xlu0 %964  ;;  %v6467_v37 = vmov 0.0  }
 0x5f3   :  { %v896_v40 = vrot.slane %v895_v24, 4  ;;  %v967_v35 = vsel %vm94_vm1, %v5442_v21, %v965_v18  ;;  %v77_v21 = vld [vmem:[%s6420_s8 + $0x5] sm:$0x3] }
 0x5f4   :  { %v905_v55 = vrot.slane %v904_v25, 4  ;;  %v5674_v1 = vrot.slane %v77_v21, %v5535_v62 }
 0x5f5   :  { %v897_v22 = vadd.f32 %v896_v40, %v895_v24 }
 0x5f6   :  { %v906_v39 = vadd.f32 %v905_v55, %v904_v25 }
 0x5f7   :  { %v898_v60 = vrot.slane %v897_v22, 2 }
 0x5f8   :  { %v907_v43 = vrot.slane %v906_v39, 2 }
 0x5f9   :  { %v899_v4 = vadd.f32 %v898_v60, %v897_v22 }
 0x5fa   :  { %v908_v2 = vadd.f32 %v907_v43, %v906_v39  ;;  %v5679_v39 = vrot.slane %v77_v21, %v5468_v38 }
 0x5fb   :  { %v900_v11 = vrot.slane %v899_v4, 1 }
 0x5fc   :  { %v909_v9 = vrot.slane %v908_v2, 1 }
 0x5fd   :  { %v901_v3 = vadd.f32 %v900_v11, %v899_v4 }
 0x5fe   :  { %v910_v12 = vadd.f32 %v909_v9, %v908_v2 }
 0x600   :  { %v955_v20 = vsel %vm679_vm4, %v910_v12, %v901_v3 }
 0x663   :  { %v961_v15 = vpop.permute.xlu1 %960 }
 0x664   :  { %v963_v34 = vsel %vm313_vm2, %v955_v20, %v961_v15 }
 0x665   :  { %4123 = vmatprep.mubr.msk.f32.mxu0 %vm94_vm1, %v963_v34 }
 0x666   :  { %1036 = vmatmul.mubr.f32.vlgmr.msra.gmra.mrb[6].mxu0 %v967_v35 }
 0x667   :  { %4576 = vmatpush3.bf16.msra.mxu0 %v5372_v33  ;;  %4347 = vmatprep.mubr.msk.f32.mxu0 %vm5195_vm0, %v6467_v37 }
 0x668   :  { %4577 = vmatprep.subr.bf16.mxu0 %v6468_v0 }
 0x66b   :  { %4579 = vmatpush3.bf16.msra.mxu0 %v5381_v36 }
 0x66c   :  { %4580 = vmatprep.subr.bf16.mxu0 %v6468_v0 }
 0x66f   :  { %4582 = vmatpush3.bf16.msra.mxu0 %v5397_v42 }
 0x670   :  { %4583 = vmatprep.subr.bf16.mxu0 %v6468_v0 }
 0x673   :  { %4585 = vmatpush3.bf16.msra.mxu0 %v5413_v48 }
 0x674   :  { %4587 = vmatprep.subr.bf16.mxu0 %v5563_v54 }
 0x739   :  { %v1037_v25 = vpop.f32.mrb[6].mxu0 }
 0x73a   :  { %v1039_v24 = vpop.f32.mrb[7].mxu0  ;;  %v1038_v22 = vadd.f32 %v1037_v25, %v5679_v39 }
 0x73b   :  { %v1040_v55 = vadd.f32 %v1039_v24, %v5674_v1 }
 0x73c   :  { %v4124_v43 = vmul.f32 -1.442695, %v1038_v22 }
 0x73d   :  { %4869 = vtanh.f32 %v1040_v55  ;;  %v4125_v34 = vmul.f32 -1.442695, %v1040_v55 }
 0x73e   :  { %4871 = vpow2.f32 %v4124_v43 }
 0x747   :  { %v4870_v40 = vpop.eup %4869 }
 0x748   :  { %1057 = vrot.lane.b32.xlu1 %v4870_v40, %s5200_s28  ;;  %v4872_v60 = vpop.eup %4871 }
 0x749   :  { %v1048_v2 = vadd.f32 1.0, %v4872_v60 }
 0x74b   :  { %4873 = vrcp.f32 %v1048_v2 }
 0x755   :  { %v4874_v4 = vpop.eup %4873 }
 0x756   :  { %v1055_v12 = vmul.f32 %v4874_v4, %v965_v18 }
 0x7ba   :  { %v1058_v9 = vpop.permute.xlu1 %1057 }
 0x7bb   :  { %v1060_v11 = vmul.f32 %v4874_v4, %v1058_v9 }
 0x7bd   :  { %1062 = vrot.lane.b32.xlu0 %v1060_v11, %s5200_s28 }
 0x82f   :  { %v1063_v3 = vpop.permute.xlu0 %1062 }
 0x830   :  { %v5683_v15 = vadd.f32 %v1063_v3, %v1055_v12 }
 0x832   :  { %4875 = vtanh.f32 %v5683_v15 }
 0x833   :  { %4877 = vpow2.f32 %v4125_v34 }
 0x83c   :  { %v4876_v20 = vpop.eup %4875 }
 0x83d   :  { %1068 = vrot.lane.b32.xlu1 %v4876_v20, %s5200_s28  ;;  %v4878_v35 = vpop.eup %4877 }
 0x83e   :  { %v1049_v21 = vadd.f32 1.0, %v4878_v35 }
 0x840   :  { %4879 = vrcp.f32 %v1049_v21 }
 0x84a   :  { %v4880_v25 = vpop.eup %4879 }
 0x8af   :  { %v1069_v24 = vpop.permute.xlu1 %1068 }
 0x8b0   :  { %v5687_v40 = vmul.f32 %v4880_v25, %v1069_v24 }
 0x8b2   :  { %4329 = vmatmul.mubr.msk.f32.vlgmr.msra.gmra.mrb[6].mxu1 %vm94_vm1, %v5687_v40 }
 0x8b3   :  { %4529 = vmatpush1.bf16.msra.mxu1 %v5565_v57 }
 0x8b4   :  { %4531 = vmatprep.subr.bf16.mxu1 %v5567_v58 }
 0x8b7   :  { %4533 = vmatpush1.bf16.msra.mxu1 %v5572_v61 }
 0x8b8   :  { %4535 = vmatprep.subr.bf16.mxu1 %v5575_v63 }
 0x8bb   :  { %4537 = vmatpush1.bf16.msra.mxu1 %v5578_v6 }
 0x8bc   :  { %4539 = vmatprep.subr.bf16.mxu1 %v5581_v7 }
 0x8bf   :  { %4541 = vmatpush1.bf16.msra.mxu1 %v5584_v14 }
 0x8c0   :  { %4543 = vmatprep.subr.bf16.mxu1 %v5587_v29 }
 0x8c3   :  { %4545 = vmatpush1.bf16.msra.mxu1 %v5590_v27 }
 0x8c4   :  { %4547 = vmatprep.subr.bf16.mxu1 %v5593_v28 }
 0x8c7   :  { %4549 = vmatpush1.bf16.msra.mxu1 %v5596_v46 }
 0x8c8   :  { %4551 = vmatprep.subr.bf16.mxu1 %v5599_v50 }
 0x8cb   :  { %4553 = vmatpush1.bf16.msra.mxu1 %v5602_v26 }
 0x8cc   :  { %4555 = vmatprep.subr.bf16.mxu1 %v5605_v53 }
 0x8cf   :  { %4557 = vmatpush1.bf16.msra.mxu1 %v5608_v41 }
 0x8d0   :  { %4559 = vmatprep.subr.bf16.mxu1 %v5611_v59 }
 0x8d3   :  { %4561 = vmatpush1.bf16.msra.mxu1 %v5614_v5 }
 0x8d4   :  { %4563 = vmatprep.subr.bf16.mxu1 %v5617_v8 }
 0x8d7   :  { %4565 = vmatpush1.bf16.msra.mxu1 %v5620_v16 }
 0x8d8   :  { %4567 = vmatprep.subr.bf16.mxu1 %v5623_v17 }
 0x8db   :  { %4569 = vmatpush1.bf16.msra.mxu1 %v5626_v45 }
 0x8dc   :  { %4571 = vmatprep.subr.bf16.mxu1 %v5629_v51 }
 0x8df   :  { %4573 = vmatpush1.bf16.msra.mxu1 %v5632_v30 }
 0x8e0   :  { %4634 = vmatprep.subr.bf16.mxu1 %v6468_v0 }
 0x985   :  { %v1143_v18 = vpop.f32.mrb[6].mxu1 }
 0x986   :  { %v1144_v55 = vadd.f32 %v5461_v31, %v1143_v18  ;;  %v4330_v22 = vpop.f32.mrb[7].mxu1 }
 0x988   :  { %v1154_v43 = vrot.slane %v1144_v55, %v5464_v32 }
 0x98a   :  { %v1155_v60 = vcombine.high %v1154_v43, %v1154_v43  ;;  %v1162_v2 = vrot.slane %v1154_v43, %v5464_v32 }
 0x98c   :  { %v1169_v4 = vrot.slane %v1155_v60, %v5464_v32  ;;  %v1173_v9 = vrot.slane %v1162_v2, %v5468_v38 }
 0x98e   :  { %v1177_v11 = vrot.slane %v1169_v4, %v5468_v38  ;;  %v1180_v12 = vadd.f32 %v1173_v9, %v5479_v47  ;;  %v1181_v3 = vadd.f32 %v1173_v9, %v5475_v44 }
 0x990   :  { %v1182_v20 = vadd.f32 %v1177_v11, %v5485_v52  ;;  %v1183_v31 = vadd.f32 %v1177_v11, %v5481_v49  ;;  %4881 = vtanh.f32 %v1180_v12 }
 0x991   :  { %4883 = vtanh.f32 %v1181_v3 }
 0x992   :  { %4885 = vtanh.f32 %v1182_v20 }
 0x993   :  { %4887 = vtanh.f32 %v1183_v31 }
 0x99a   :  { %v4882_v34 = vpop.eup %4881 }
 0x99b   :  { %v4884_v35 = vpop.eup %4883  ;;  %v1188_v21 = vmul.f32 %v4882_v34, %v5493_v56 }
 0x99c   :  { %v4886_v25 = vpop.eup %4885  ;;  %v1189_v24 = vmul.f32 %v4884_v35, %v5493_v56 }
 0x99d   :  { %v4888_v18 = vpop.eup %4887  ;;  %1208 = vrot.lane.b32.xlu0 %v1188_v21, %s5198_s27  ;;  %v1190_v55 = vmul.f32 %v4886_v25, %v5493_v56  ;;  %v1192_v3 = vsel %vm313_vm2, %v1188_v21, 0.0  ;;  %v6469_v21 = vld [vmem:[#allocation18_spill] sm:$0xff] }
 0x99e   :  { %1210 = vrot.lane.b32.xlu1 %v1189_v24, %s5198_s27  ;;  %v1191_v22 = vmul.f32 %v4888_v18, %v5493_v56  ;;  %v1195_v31 = vsel %vm313_vm2, %v1189_v24, 0.0 }
 0x99f   :  { %v1198_v20 = vsel %vm313_vm2, %v1190_v55, 0.0 }
 0x9a0   :  { %v1201_v34 = vsel %vm313_vm2, %v1191_v22, 0.0 }
 0x9a1   :  { %1212 = vrot.lane.b32.xlu0 %v1190_v55, %s5198_s27 }
 0x9a2   :  { %1214 = vrot.lane.b32.xlu1 %v1191_v22, %s5198_s27 }
 0xa0f   :  { %v1209_v43 = vpop.permute.xlu0 %1208 }
 0xa10   :  { %v1211_v60 = vpop.permute.xlu1 %1210  ;;  %v1220_v2 = vsel %vm313_vm2, %v1209_v43, 0.0 }
 0xa11   :  { %v1223_v4 = vsel %vm313_vm2, %v1211_v60, 0.0  ;;  %1221 = vadd.xlane.f32.xlu0 %v1220_v2 }
 0xa12   :  { %1224 = vadd.xlane.f32.xlu1 %v1223_v4 }
 0xa13   :  { %v1213_v9 = vpop.permute.xlu0 %1212 }
 0xa14   :  { %v1226_v11 = vsel %vm313_vm2, %v1213_v9, 0.0  ;;  %v1215_v12 = vpop.permute.xlu1 %1214 }
 0xa15   :  { %1227 = vadd.xlane.f32.xlu0 %v1226_v11  ;;  %v1229_v56 = vsel %vm313_vm2, %v1215_v12, 0.0 }
 0xa16   :  { %1193 = vadd.xlane.f32.xlu1 %v1192_v3 }
 0xa19   :  { %1230 = vadd.xlane.f32.xlu0 %v1229_v56 }
 0xa1a   :  { %1199 = vadd.xlane.f32.xlu1 %v1198_v20 }
 0xa1d   :  { %1196 = vadd.xlane.f32.xlu0 %v1195_v31 }
 0xa21   :  { %1202 = vadd.xlane.f32.xlu0 %v1201_v34 }
 0xa9e   :  { %v1222_v35 = vpop.xlane.xlu0 %1221 }
 0xa9f   :  { %v1225_v25 = vpop.xlane.xlu1 %1224  ;;  %v1344_v60 = vrot.slane %v1222_v35, %v6469_v21 }
 0xaa0   :  { %v1348_v43 = vrot.slane %v1225_v25, %v5516_v23 }
 0xaa2   :  { %v1228_v18 = vpop.xlane.xlu0 %1227  ;;  %v1349_v11 = vsel %vm668_vm3, %v1348_v43, %v1344_v60 }
 0xaa3   :  { %v1194_v2 = vpop.xlane.xlu1 %1193  ;;  %v1353_v9 = vrot.slane %v1228_v18, %v6469_v21 }
 0xaa4   :  { %v1239_v34 = vrot.slane %v1194_v2, %v6469_v21 }
 0xaa6   :  { %v1231_v4 = vpop.xlane.xlu0 %1230 }
 0xaa7   :  { %v1357_v55 = vrot.slane %v1231_v4, %v5516_v23  ;;  %v1200_v56 = vpop.xlane.xlu1 %1199 }
 0xaa8   :  { %v1248_v49 = vrot.slane %v1200_v56, %v6469_v21 }
 0xaa9   :  { %v1358_v24 = vsel %vm668_vm3, %v1357_v55, %v1353_v9 }
 0xaaa   :  { %v1197_v12 = vpop.xlane.xlu0 %1196  ;;  %v1359_v22 = vsel %vm679_vm4, %v1358_v24, %v1349_v11 }
 0xaab   :  { %v1361_v3 = vsel %vm682_vm5, %v1359_v22, -inf  ;;  %v1243_v20 = vrot.slane %v1197_v12, %v5516_v23 }
 0xaac   :  { %1362 = vmax.xlane.f32.xlu1 %v1361_v3 }
 0xaad   :  { %v1244_v43 = vsel %vm668_vm3, %v1243_v20, %v1239_v34 }
 0xaae   :  { %v1203_v31 = vpop.xlane.xlu0 %1202 }
 0xaaf   :  { %v1252_v52 = vrot.slane %v1203_v31, %v5516_v23 }
 0xab1   :  { %v1253_v60 = vsel %vm668_vm3, %v1252_v52, %v1248_v49 }
 0xab2   :  { %v1254_v9 = vsel %vm679_vm4, %v1253_v60, %v1244_v43 }
 0xab3   :  { %v1256_v55 = vsel %vm682_vm5, %v1254_v9, -inf }
 0xab4   :  { %1257 = vmax.xlane.f32.xlu0 %v1256_v55 }
 0xb39   :  { %v1363_v11 = vpop.xlane.xlu1 %1362 }
 0xb3a   :  { %v1368_v24 = vrot.slane %v1363_v11, %v5468_v38  ;;  %v1372_v22 = vrot.slane %v1363_v11, %v5535_v62 }
 0xb3c   :  { %v1375_v3 = vsub.f32 %v1222_v35, %v1368_v24  ;;  %v1376_v44 = vsub.f32 %v1225_v25, %v1368_v24  ;;  %v1377_v47 = vsub.f32 %v1228_v18, %v1372_v22  ;;  %v1378_v51 = vsub.f32 %v1231_v4, %v1372_v22 }
 0xb3e   :  { %v1379_v32 = vmul.f32 1.442695, %v1375_v3  ;;  %v1381_v30 = vmul.f32 1.442695, %v1376_v44  ;;  %v1383_v20 = vmul.f32 1.442695, %v1377_v47 }
 0xb3f   :  { %v1385_v43 = vmul.f32 1.442695, %v1378_v51 }
 0xb40   :  { %4889 = vpow2.f32 %v1379_v32 }
 0xb41   :  { %4891 = vpow2.f32 %v1381_v30  ;;  %v1258_v49 = vpop.xlane.xlu0 %1257 }
 0xb42   :  { %v1263_v52 = vrot.slane %v1258_v49, %v5468_v38  ;;  %v1267_v34 = vrot.slane %v1258_v49, %v5535_v62  ;;  %4893 = vpow2.f32 %v1383_v20 }
 0xb43   :  { %4895 = vpow2.f32 %v1385_v43 }
 0xb44   :  { %v1270_v60 = vsub.f32 %v1194_v2, %v1263_v52  ;;  %v1271_v9 = vsub.f32 %v1197_v12, %v1263_v52  ;;  %v1272_v55 = vsub.f32 %v1200_v56, %v1267_v34  ;;  %v1273_v25 = vsub.f32 %v1203_v31, %v1267_v34 }
 0xb46   :  { %v1274_v11 = vmul.f32 1.442695, %v1270_v60  ;;  %v1276_v35 = vmul.f32 1.442695, %v1271_v9  ;;  %v1278_v44 = vmul.f32 1.442695, %v1272_v55 }
 0xb47   :  { %v1280_v47 = vmul.f32 1.442695, %v1273_v25 }
 0xb48   :  { %4897 = vpow2.f32 %v1274_v11 }
 0xb49   :  { %4899 = vpow2.f32 %v1276_v35 }
 0xb4a   :  { %v4890_v18 = vpop.eup %4889  ;;  %4901 = vpow2.f32 %v1278_v44 }
 0xb4b   :  { %v4892_v32 = vpop.eup %4891  ;;  %1392 = vperm.xlu1 %4840, %v4890_v18   ;;  %4903 = vpow2.f32 %v1280_v47 }
 0xb4c   :  { %1395 = vperm.xlu0 %4839, %v4892_v32   ;;  %v4894_v30 = vpop.eup %4893 }
 0xb4d   :  { %v4896_v51 = vpop.eup %4895 }
 0xb4f   :  { %1398 = vperm.xlu1 %4840, %v4894_v30  }
 0xb52   :  { %v4898_v2 = vpop.eup %4897 }
 0xb53   :  { %1287 = vperm.xlu0 %4839, %v4898_v2   ;;  %1401 = vperm.xlu1 %4840, %v4896_v51   ;;  %v4900_v4 = vpop.eup %4899 }
 0xb54   :  { %v4902_v12 = vpop.eup %4901 }
 0xb55   :  { %v4904_v56 = vpop.eup %4903 }
 0xb57   :  { %1293 = vperm.xlu0 %4839, %v4902_v12   ;;  %1290 = vperm.xlu1 %4840, %v4900_v4  }
 0xb5b   :  { %1296 = vperm.xlu1 %4840, %v4904_v56  }
 0xbca   :  { %v1393_v31 = vpop.permute.xlu1 %1392 }
 0xbcb   :  { %v1396_v24 = vpop.permute.xlu0 %1395  ;;  %v1406_v20 = vrot.slane %v1393_v31, %v6469_v21 }
 0xbcc   :  { %v1410_v3 = vrot.slane %v1396_v24, %v5516_v23 }
 0xbce   :  { %v1399_v22 = vpop.permute.xlu1 %1398  ;;  %v1411_v60 = vsel %vm668_vm3, %v1410_v3, %v1406_v20 }
 0xbcf   :  { %v1415_v34 = vrot.slane %v1399_v22, %v6469_v21 }
 0xbd2   :  { %v1288_v49 = vpop.permute.xlu0 %1287  ;;  %v1402_v52 = vpop.permute.xlu1 %1401 }
 0xbd3   :  { %v1419_v43 = vrot.slane %v1402_v52, %v5516_v23  ;;  %v1301_v31 = vrot.slane %v1288_v49, %v6469_v21 }
 0xbd5   :  { %v1420_v9 = vsel %vm668_vm3, %v1419_v43, %v1415_v34 }
 0xbd6   :  { %v1291_v55 = vpop.permute.xlu1 %1290  ;;  %v1421_v11 = vsel %vm679_vm4, %v1420_v9, %v1411_v60  ;;  %v1294_v25 = vpop.permute.xlu0 %1293 }
 0xbd7   :  { %v1423_v35 = vsel %vm682_vm5, %v1421_v11, 0.0  ;;  %v1305_v44 = vrot.slane %v1291_v55, %v5516_v23  ;;  %v1310_v24 = vrot.slane %v1294_v25, %v6469_v21 }
 0xbd8   :  { %1424 = vadd.xlane.f32.xlu0 %v1423_v35 }
 0xbd9   :  { %v1306_v3 = vsel %vm668_vm3, %v1305_v44, %v1301_v31 }
 0xbda   :  { %v1297_v47 = vpop.permute.xlu1 %1296 }
 0xbdb   :  { %v1314_v22 = vrot.slane %v1297_v47, %v5516_v23 }
 0xbdd   :  { %v1315_v20 = vsel %vm668_vm3, %v1314_v22, %v1310_v24 }
 0xbde   :  { %v1316_v52 = vsel %vm679_vm4, %v1315_v20, %v1306_v3 }
 0xbdf   :  { %v1318_v34 = vsel %vm682_vm5, %v1316_v52, 0.0 }
 0xbe0   :  { %1319 = vadd.xlane.f32.xlu1 %v1318_v34 }
 0xc65   :  { %v1425_v43 = vpop.xlane.xlu0 %1424 }
 0xc66   :  { %4905 = vrcp.f32 %v1425_v43 }
 0xc6d   :  { %v1320_v60 = vpop.xlane.xlu1 %1319 }
 0xc6e   :  { %4907 = vrcp.f32 %v1320_v60 }
 0xc70   :  { %v4906_v9 = vpop.eup %4905 }
 0xc71   :  { %v1431_v49 = vrot.slane %v4906_v9, %v5468_v38  ;;  %v1435_v35 = vrot.slane %v4906_v9, %v5535_v62 }
 0xc73   :  { %v1438_v55 = vmul.f32 %v4890_v18, %v1431_v49  ;;  %v1439_v11 = vmul.f32 %v4892_v32, %v1431_v49  ;;  %v1440_v25 = vmul.f32 %v4894_v30, %v1435_v35  ;;  %v1441_v44 = vmul.f32 %v4896_v51, %v1435_v35 }
 0xc75   :  { %1486 = vperm.xlu0 %4839, %v1438_v55   ;;  %1491 = vperm.xlu1 %4840, %v1439_v11  }
 0xc78   :  { %v4908_v47 = vpop.eup %4907 }
 0xc79   :  { %1496 = vperm.xlu0 %4839, %v1440_v25   ;;  %1501 = vperm.xlu1 %4840, %v1441_v44   ;;  %v1326_v31 = vrot.slane %v4908_v47, %v5468_v38  ;;  %v1330_v3 = vrot.slane %v4908_v47, %v5535_v62 }
 0xc7b   :  { %v1334_v24 = vmul.f32 %v4900_v4, %v1326_v31  ;;  %v1333_v22 = vmul.f32 %v4898_v2, %v1326_v31  ;;  %v1336_v20 = vmul.f32 %v4904_v56, %v1330_v3  ;;  %v1335_v18 = vmul.f32 %v4902_v12, %v1330_v3  ;;  %v6470_v56 = vld [vmem:[#allocation12_spill] sm:$0xff] }
 0xc7d   :  { %1449 = vperm.xlu1 %4840, %v1334_v24   ;;  %1444 = vperm.xlu0 %4839, %v1333_v22  }
 0xc81   :  { %1459 = vperm.xlu1 %4840, %v1336_v20   ;;  %1454 = vperm.xlu0 %4839, %v1335_v18  }
 0xc85   :  { %1537 = vrot.lane.b32.xlu1 %v5687_v40, %s5200_s28 }
 0xcf4   :  { %v1487_v32 = vpop.permute.xlu0 %1486  ;;  %v1492_v30 = vpop.permute.xlu1 %1491 }
 0xcf5   :  { %v1504_v51 = vmul.f32 %v1487_v32, %v5427_v13  ;;  %v1505_v52 = vmul.f32 %v1492_v30, %v5425_v10 }
 0xcf7   :  { %v1508_v4 = vsel %vm313_vm2, %v1504_v51, 0.0  ;;  %v1509_v2 = vsel %vm313_vm2, %v1505_v52, 0.0 }
 0xcf8   :  { %v1510_v34 = vadd.f32 %v1509_v2, %v1508_v4  ;;  %v1497_v43 = vpop.permute.xlu0 %1496  ;;  %v1502_v60 = vpop.permute.xlu1 %1501 }
 0xcf9   :  { %v1506_v12 = vmul.f32 %v1497_v43, %v5435_v19  ;;  %v1507_v9 = vmul.f32 %v1502_v60, %v6470_v56 }
 0xcfa   :  { %v1511_v49 = vrot.slane %v1510_v34, 4 }
 0xcfb   :  { %v1517_v40 = vsel %vm313_vm2, %v1506_v12, 0.0  ;;  %v1518_v55 = vsel %vm313_vm2, %v1507_v9, 0.0 }
 0xcfc   :  { %v1512_v11 = vadd.f32 %v1511_v49, %v1510_v34  ;;  %v1519_v35 = vadd.f32 %v1518_v55, %v1517_v40  ;;  %v1445_v51 = vpop.permute.xlu0 %1444  ;;  %v1450_v52 = vpop.permute.xlu1 %1449 }
 0xcfd   :  { %v1462_v60 = vmul.f32 %v1445_v51, %v5427_v13  ;;  %v1463_v12 = vmul.f32 %v1450_v52, %v5425_v10  ;;  %v1073_v52 = vld [vmem:[#allocation5 + $0x2] sm:$0x3] }
 0xcfe   :  { %v1513_v25 = vrot.slane %v1512_v11, 2  ;;  %v1520_v44 = vrot.slane %v1519_v35, 4 }
 0xcff   :  { %v1466_v40 = vsel %vm313_vm2, %v1462_v60, 0.0  ;;  %v1467_v55 = vsel %vm313_vm2, %v1463_v12, 0.0 }
 0xd00   :  { %v1521_v47 = vadd.f32 %v1520_v44, %v1519_v35  ;;  %v1514_v31 = vadd.f32 %v1513_v25, %v1512_v11  ;;  %v1455_v4 = vpop.permute.xlu0 %1454  ;;  %v1460_v2 = vpop.permute.xlu1 %1459  ;;  %v1468_v35 = vadd.f32 %v1467_v55, %v1466_v40 }
 0xd01   :  { %v1464_v34 = vmul.f32 %v1455_v4, %v5435_v19  ;;  %v1465_v43 = vmul.f32 %v1460_v2, %v6470_v56 }
 0xd02   :  { %v1522_v24 = vrot.slane %v1521_v47, 2  ;;  %v1515_v22 = vrot.slane %v1514_v31, 1  ;;  %v1469_v44 = vrot.slane %v1468_v35, 4 }
 0xd03   :  { %v1475_v9 = vsel %vm313_vm2, %v1464_v34, 0.0  ;;  %v1476_v49 = vsel %vm313_vm2, %v1465_v43, 0.0 }
 0xd04   :  { %v1523_v3 = vadd.f32 %v1522_v24, %v1521_v47  ;;  %v1516_v18 = vadd.f32 %v1515_v22, %v1514_v31  ;;  %v1477_v11 = vadd.f32 %v1476_v49, %v1475_v9  ;;  %v1470_v31 = vadd.f32 %v1469_v44, %v1468_v35  ;;  %v1538_v4 = vpop.permute.xlu1 %1537 }
 0xd05   :  { %v1540_v60 = vsel %vm94_vm1, %v1073_v52, %v1538_v4 }
 0xd06   :  { %v1524_v20 = vrot.slane %v1523_v3, 1  ;;  %v1478_v25 = vrot.slane %v1477_v11, 4  ;;  %v1471_v22 = vrot.slane %v1470_v31, 2 }
 0xd08   :  { %v1525_v32 = vadd.f32 %v1524_v20, %v1523_v3  ;;  %v1479_v47 = vadd.f32 %v1478_v25, %v1477_v11  ;;  %v1472_v20 = vadd.f32 %v1471_v22, %v1470_v31 }
 0xd0a   :  { %v1532_v30 = vsel %vm679_vm4, %v1525_v32, %v1516_v18  ;;  %v1480_v24 = vrot.slane %v1479_v47, 2  ;;  %v1473_v32 = vrot.slane %v1472_v20, 1 }
 0xd0b   :  { %1533 = vrot.lane.b32.xlu0 %v1532_v30, %s5188_s19 }
 0xd0c   :  { %v1481_v3 = vadd.f32 %v1480_v24, %v1479_v47  ;;  %v1474_v51 = vadd.f32 %v1473_v32, %v1472_v20 }
 0xd0e   :  { %v1482_v18 = vrot.slane %v1481_v3, 1 }
 0xd10   :  { %v1483_v30 = vadd.f32 %v1482_v18, %v1481_v3 }
 0xd12   :  { %v1528_v34 = vsel %vm679_vm4, %v1483_v30, %v1474_v51 }
 0xd7d   :  { %v1534_v2 = vpop.permute.xlu0 %1533 }
 0xd7e   :  { %v1536_v43 = vsel %vm313_vm2, %v1528_v34, %v1534_v2  ;;  %v6473_v2 = vld [vmem:[#allocation21_spill] sm:$0xff] }
 0xd7f   :  { %4127 = vmatprep.mubr.msk.f32.mxu1 %vm94_vm1, %v1536_v43  ;;  %v5855_v43 = vld [vmem:[%s6420_s8 + $0x3] ss:$0 sm:$0xff] }
 0xd80   :  { %1609 = vmatmul.mubr.f32.vlgmr.msra.gmra.mrb[8].mxu1 %v1540_v60  ;;  %6474 = vst [vmem:[#allocation12_spill] sm:$0xff] %v5855_v43 }
 0xd81   :  { %4636 = vmatpush3.bf16.msra.mxu1 %v5372_v33  ;;  %4366 = vmatprep.mubr.msk.f32.mxu1 %vm5195_vm0, %v6467_v37 }
 0xd82   :  { %4637 = vmatprep.subr.bf16.mxu1 %v6468_v0 }
 0xd85   :  { %4639 = vmatpush3.bf16.msra.mxu1 %v5381_v36 }
 0xd86   :  { %4640 = vmatprep.subr.bf16.mxu1 %v6468_v0 }
 0xd89   :  { %4642 = vmatpush3.bf16.msra.mxu1 %v5397_v42 }
 0xd8a   :  { %4643 = vmatprep.subr.bf16.mxu1 %v6468_v0 }
 0xd8d   :  { %4645 = vmatpush3.bf16.msra.mxu1 %v5413_v48 }
 0xd8e   :  { %4647 = vmatprep.subr.bf16.mxu1 %v5563_v54 }
 0xe53   :  { %v1610_v12 = vpop.f32.mrb[8].mxu1 }
 0xe54   :  { %v1612_v9 = vpop.f32.mrb[9].mxu1  ;;  %v1611_v55 = vadd.f32 %v1610_v12, %v5679_v39 }
 0xe55   :  { %v1613_v49 = vadd.f32 %v1612_v9, %v5674_v1  ;;  %v6475_v9 = vld [vmem:[#allocation13_spill] sm:$0xff] }
 0xe56   :  { %v4128_v11 = vmul.f32 -1.442695, %v1611_v55 }
 0xe57   :  { %4909 = vtanh.f32 %v1613_v49  ;;  %v4129_v18 = vmul.f32 -1.442695, %v1613_v49 }
 0xe58   :  { %4911 = vpow2.f32 %v4128_v11 }
 0xe61   :  { %v4910_v40 = vpop.eup %4909 }
 0xe62   :  { %1630 = vrot.lane.b32.xlu0 %v4910_v40, %s5200_s28  ;;  %v4912_v35 = vpop.eup %4911 }
 0xe63   :  { %v1621_v25 = vadd.f32 1.0, %v4912_v35 }
 0xe65   :  { %4913 = vrcp.f32 %v1621_v25 }
 0xe6f   :  { %v4914_v44 = vpop.eup %4913 }
 0xe70   :  { %v1628_v24 = vmul.f32 %v4914_v44, %v5683_v15  ;;  %v6472_v15 = vld [vmem:[#allocation20_spill] sm:$0xff] }
 0xed4   :  { %v1631_v47 = vpop.permute.xlu0 %1630 }
 0xed5   :  { %v1633_v31 = vmul.f32 %v4914_v44, %v1631_v47  ;;  %v6476_v44 = vld [vmem:[#allocation15_spill] sm:$0xff] }
 0xed7   :  { %1635 = vrot.lane.b32.xlu1 %v1633_v31, %s5200_s28  ;;  %v6477_v31 = vld [vmem:[#allocation14_spill] sm:$0xff] }
 0xf49   :  { %v1636_v22 = vpop.permute.xlu1 %1635 }
 0xf4a   :  { %v5820_v3 = vadd.f32 %v1636_v22, %v1628_v24  ;;  %v6478_v22 = vld [vmem:[#allocation17_spill] sm:$0xff] }
 0xf4c   :  { %4915 = vtanh.f32 %v5820_v3 }
 0xf4d   :  { %4917 = vpow2.f32 %v4129_v18  ;;  %v6479_v18 = vld [vmem:[#allocation16_spill] sm:$0xff] }
 0xf56   :  { %v4916_v20 = vpop.eup %4915 }
 0xf57   :  { %1641 = vrot.lane.b32.xlu0 %v4916_v20, %s5200_s28  ;;  %v4918_v32 = vpop.eup %4917 }
 0xf58   :  { %v1622_v30 = vadd.f32 1.0, %v4918_v32 }
 0xf5a   :  { %4919 = vrcp.f32 %v1622_v30 }
 0xf64   :  { %v4920_v51 = vpop.eup %4919 }
 0xfc9   :  { %v1642_v52 = vpop.permute.xlu0 %1641 }
 0xfca   :  { %v5824_v4 = vmul.f32 %v4920_v51, %v1642_v52  ;;  %v5870_v52 = vld [vmem:[%s6420_s8 + $0x4] ss:$0 sm:$0xff] }
 0xfcb   :  { %6480 = vst [vmem:[#allocation22_spill] sm:$0xff] %v5870_v52 }
 0xfcc   :  { %6471 = vst [vmem:[#allocation18_spill] sm:$0xff] %v5824_v4  ;;  %4348 = vmatmul.mubr.msk.f32.vlgmr.msra.gmra.mrb[8].mxu0 %vm94_vm1, %v5824_v4 }
 0xfcd   :  { %4589 = vmatpush1.bf16.msra.mxu0 %v5565_v57 }
 0xfce   :  { %4591 = vmatprep.subr.bf16.mxu0 %v5567_v58 }
 0xfd1   :  { %4593 = vmatpush1.bf16.msra.mxu0 %v5572_v61 }
 0xfd2   :  { %4595 = vmatprep.subr.bf16.mxu0 %v5575_v63 }
 0xfd5   :  { %4597 = vmatpush1.bf16.msra.mxu0 %v5578_v6 }
 0xfd6   :  { %4599 = vmatprep.subr.bf16.mxu0 %v5581_v7 }
 0xfd9   :  { %4601 = vmatpush1.bf16.msra.mxu0 %v5584_v14 }
 0xfda   :  { %4603 = vmatprep.subr.bf16.mxu0 %v5587_v29 }
 0xfdd   :  { %4605 = vmatpush1.bf16.msra.mxu0 %v5590_v27 }
 0xfde   :  { %4607 = vmatprep.subr.bf16.mxu0 %v5593_v28 }
 0xfe1   :  { %4609 = vmatpush1.bf16.msra.mxu0 %v5596_v46 }
 0xfe2   :  { %4611 = vmatprep.subr.bf16.mxu0 %v5599_v50 }
 0xfe5   :  { %4613 = vmatpush1.bf16.msra.mxu0 %v5602_v26 }
 0xfe6   :  { %4615 = vmatprep.subr.bf16.mxu0 %v5605_v53 }
 0xfe9   :  { %4617 = vmatpush1.bf16.msra.mxu0 %v5608_v41 }
 0xfea   :  { %4619 = vmatprep.subr.bf16.mxu0 %v5611_v59 }
 0xfed   :  { %4621 = vmatpush1.bf16.msra.mxu0 %v5614_v5 }
 0xfee   :  { %4623 = vmatprep.subr.bf16.mxu0 %v5617_v8 }
 0xff1   :  { %4625 = vmatpush1.bf16.msra.mxu0 %v5620_v16 }
 0xff2   :  { %4627 = vmatprep.subr.bf16.mxu0 %v5623_v17 }
 0xff5   :  { %4629 = vmatpush1.bf16.msra.mxu0 %v5626_v45 }
 0xff6   :  { %4631 = vmatprep.subr.bf16.mxu0 %v6472_v15 }
 0xff9   :  { %4633 = vmatpush1.bf16.msra.mxu0 %v6473_v2 }
 0xffa   :  { %4694 = vmatprep.subr.bf16.mxu0 %v6468_v0 }
0x109f   :  { %v1716_v34 = vpop.f32.mrb[8].mxu0 }
0x10a0   :  { %v1717_v60 = vadd.f32 %v5855_v43, %v1716_v34  ;;  %v4349_v12 = vpop.f32.mrb[9].mxu0 }
0x10a2   :  { %v1727_v49 = vrot.slane %v1717_v60, %v6475_v9 }
0x10a4   :  { %v1728_v40 = vcombine.high %v1727_v49, %v1727_v49  ;;  %v1735_v55 = vrot.slane %v1727_v49, %v6475_v9 }
0x10a6   :  { %v1742_v11 = vrot.slane %v1728_v40, %v6475_v9  ;;  %v1746_v35 = vrot.slane %v1735_v55, %v5468_v38 }
0x10a8   :  { %v1750_v25 = vrot.slane %v1742_v11, %v5468_v38  ;;  %v1753_v47 = vadd.f32 %v1746_v35, %v6476_v44  ;;  %v1754_v24 = vadd.f32 %v1746_v35, %v6477_v31 }
0x10aa   :  { %v1755_v20 = vadd.f32 %v1750_v25, %v6478_v22  ;;  %v1756_v32 = vadd.f32 %v1750_v25, %v6479_v18  ;;  %4921 = vtanh.f32 %v1753_v47 }
0x10ab   :  { %4923 = vtanh.f32 %v1754_v24 }
0x10ac   :  { %4925 = vtanh.f32 %v1755_v20 }
0x10ad   :  { %4927 = vtanh.f32 %v1756_v32 }
0x10b4   :  { %v4922_v30 = vpop.eup %4921 }
0x10b5   :  { %v4924_v51 = vpop.eup %4923  ;;  %v1761_v34 = vmul.f32 %v5870_v52, %v4922_v30 }
0x10b6   :  { %v4926_v60 = vpop.eup %4925  ;;  %v1762_v12 = vmul.f32 %v5870_v52, %v4924_v51 }
0x10b7   :  { %v4928_v49 = vpop.eup %4927  ;;  %1781 = vrot.lane.b32.xlu1 %v1761_v34, %s5198_s27  ;;  %v1763_v40 = vmul.f32 %v5870_v52, %v4926_v60  ;;  %v1765_v60 = vsel %vm313_vm2, %v1761_v34, 0.0 }
0x10b8   :  { %1783 = vrot.lane.b32.xlu0 %v1762_v12, %s5198_s27  ;;  %v1764_v55 = vmul.f32 %v5870_v52, %v4928_v49  ;;  %v1768_v51 = vsel %vm313_vm2, %v1762_v12, 0.0 }
0x10ba   :  { %v1774_v49 = vsel %vm313_vm2, %v1764_v55, 0.0 }
0x10bb   :  { %1785 = vrot.lane.b32.xlu1 %v1763_v40, %s5198_s27 }
0x10bc   :  { %1787 = vrot.lane.b32.xlu0 %v1764_v55, %s5198_s27 }
0x1129   :  { %v1782_v11 = vpop.permute.xlu1 %1781 }
0x112a   :  { %v1784_v35 = vpop.permute.xlu0 %1783  ;;  %v1793_v25 = vsel %vm313_vm2, %v1782_v11, 0.0  ;;  %v1771_v11 = vsel %vm313_vm2, %v1763_v40, 0.0 }
0x112b   :  { %v1796_v47 = vsel %vm313_vm2, %v1784_v35, 0.0  ;;  %1794 = vadd.xlane.f32.xlu1 %v1793_v25 }
0x112c   :  { %1797 = vadd.xlane.f32.xlu0 %v1796_v47 }
0x112d   :  { %v1786_v24 = vpop.permute.xlu1 %1785 }
0x112e   :  { %v1788_v20 = vpop.permute.xlu0 %1787  ;;  %v1799_v32 = vsel %vm313_vm2, %v1786_v24, 0.0 }
0x112f   :  { %v1802_v30 = vsel %vm313_vm2, %v1788_v20, 0.0 }
0x1130   :  { %1803 = vadd.xlane.f32.xlu1 %v1802_v30  ;;  %1800 = vadd.xlane.f32.xlu0 %v1799_v32 }
0x1134   :  { %1769 = vadd.xlane.f32.xlu1 %v1768_v51  ;;  %1766 = vadd.xlane.f32.xlu0 %v1765_v60 }
0x1138   :  { %1775 = vadd.xlane.f32.xlu1 %v1774_v49  ;;  %1772 = vadd.xlane.f32.xlu0 %v1771_v11 }
0x11b8   :  { %v1795_v35 = vpop.xlane.xlu1 %1794 }
0x11b9   :  { %v1798_v25 = vpop.xlane.xlu0 %1797  ;;  %v1917_v24 = vrot.slane %v1795_v35, %v6469_v21 }
0x11ba   :  { %v1921_v47 = vrot.slane %v1798_v25, %v5516_v23 }
0x11bc   :  { %v1922_v30 = vsel %vm668_vm3, %v1921_v47, %v1917_v24 }
0x11bd   :  { %v1801_v20 = vpop.xlane.xlu0 %1800  ;;  %v1804_v32 = vpop.xlane.xlu1 %1803 }
0x11be   :  { %v1926_v12 = vrot.slane %v1801_v20, %v6469_v21  ;;  %v1930_v34 = vrot.slane %v1804_v32, %v5516_v23 }
0x11c0   :  { %v1931_v55 = vsel %vm668_vm3, %v1930_v34, %v1926_v12 }
0x11c1   :  { %v1767_v51 = vpop.xlane.xlu0 %1766  ;;  %v1770_v40 = vpop.xlane.xlu1 %1769  ;;  %v1932_v60 = vsel %vm679_vm4, %v1931_v55, %v1922_v30 }
0x11c2   :  { %v1934_v49 = vsel %vm682_vm5, %v1932_v60, -inf  ;;  %v1812_v11 = vrot.slane %v1767_v51, %v6469_v21  ;;  %v1816_v52 = vrot.slane %v1770_v40, %v5516_v23 }
0x11c3   :  { %1935 = vmax.xlane.f32.xlu0 %v1934_v49 }
0x11c4   :  { %v1817_v47 = vsel %vm668_vm3, %v1816_v52, %v1812_v11 }
0x11c5   :  { %v1776_v18 = vpop.xlane.xlu1 %1775  ;;  %v1773_v22 = vpop.xlane.xlu0 %1772 }
0x11c6   :  { %v1825_v31 = vrot.slane %v1776_v18, %v5516_v23  ;;  %v1821_v44 = vrot.slane %v1773_v22, %v6469_v21 }
0x11c8   :  { %v1826_v24 = vsel %vm668_vm3, %v1825_v31, %v1821_v44 }
0x11c9   :  { %v1827_v12 = vsel %vm679_vm4, %v1826_v24, %v1817_v47 }
0x11ca   :  { %v1829_v34 = vsel %vm682_vm5, %v1827_v12, -inf }
0x11cb   :  { %1830 = vmax.xlane.f32.xlu1 %v1829_v34 }
0x1250   :  { %v1936_v30 = vpop.xlane.xlu0 %1935 }
0x1251   :  { %v1941_v55 = vrot.slane %v1936_v30, %v5468_v38  ;;  %v1945_v60 = vrot.slane %v1936_v30, %v5535_v62 }
0x1253   :  { %v1948_v49 = vsub.f32 %v1795_v35, %v1941_v55  ;;  %v1949_v9 = vsub.f32 %v1798_v25, %v1941_v55  ;;  %v1951_v43 = vsub.f32 %v1804_v32, %v1945_v60  ;;  %v1950_v2 = vsub.f32 %v1801_v20, %v1945_v60 }
0x1255   :  { %v1952_v15 = vmul.f32 1.442695, %v1948_v49  ;;  %v1954_v45 = vmul.f32 1.442695, %v1949_v9  ;;  %v1958_v52 = vmul.f32 1.442695, %v1951_v43 }
0x1256   :  { %v1956_v44 = vmul.f32 1.442695, %v1950_v2 }
0x1257   :  { %4929 = vpow2.f32 %v1952_v15 }
0x1258   :  { %4931 = vpow2.f32 %v1954_v45  ;;  %v1831_v31 = vpop.xlane.xlu1 %1830 }
0x1259   :  { %v1836_v11 = vrot.slane %v1831_v31, %v5468_v38  ;;  %v1840_v47 = vrot.slane %v1831_v31, %v5535_v62  ;;  %4933 = vpow2.f32 %v1958_v52 }
0x125a   :  { %4935 = vpow2.f32 %v1956_v44 }
0x125b   :  { %v1843_v24 = vsub.f32 %v1767_v51, %v1836_v11  ;;  %v1844_v12 = vsub.f32 %v1770_v40, %v1836_v11  ;;  %v1845_v34 = vsub.f32 %v1773_v22, %v1840_v47  ;;  %v1846_v35 = vsub.f32 %v1776_v18, %v1840_v47 }
0x125d   :  { %v1847_v25 = vmul.f32 1.442695, %v1843_v24  ;;  %v1849_v32 = vmul.f32 1.442695, %v1844_v12  ;;  %v1851_v20 = vmul.f32 1.442695, %v1845_v34 }
0x125e   :  { %v1853_v15 = vmul.f32 1.442695, %v1846_v35 }
0x125f   :  { %4937 = vpow2.f32 %v1847_v25 }
0x1260   :  { %4939 = vpow2.f32 %v1849_v32 }
0x1261   :  { %v4930_v43 = vpop.eup %4929  ;;  %4941 = vpow2.f32 %v1851_v20 }
0x1262   :  { %v4932_v45 = vpop.eup %4931  ;;  %1965 = vperm.xlu0 %4839, %v4930_v43   ;;  %4943 = vpow2.f32 %v1853_v15 }
0x1263   :  { %1968 = vperm.xlu1 %4840, %v4932_v45   ;;  %v4934_v2 = vpop.eup %4933 }
0x1264   :  { %v4936_v9 = vpop.eup %4935 }
0x1266   :  { %1974 = vperm.xlu0 %4839, %v4934_v2  }
0x1267   :  { %1971 = vperm.xlu1 %4840, %v4936_v9  }
0x1269   :  { %v4938_v51 = vpop.eup %4937 }
0x126a   :  { %v4940_v22 = vpop.eup %4939 }
0x126b   :  { %1860 = vperm.xlu1 %4840, %v4938_v51   ;;  %1863 = vperm.xlu0 %4839, %v4940_v22   ;;  %v4942_v18 = vpop.eup %4941 }
0x126c   :  { %v4944_v40 = vpop.eup %4943 }
0x126f   :  { %1866 = vperm.xlu1 %4840, %v4942_v18   ;;  %1869 = vperm.xlu0 %4839, %v4944_v40  }
0x12e1   :  { %v1966_v30 = vpop.permute.xlu0 %1965 }
0x12e2   :  { %v1969_v55 = vpop.permute.xlu1 %1968  ;;  %v1979_v49 = vrot.slane %v1966_v30, %v6469_v21 }
0x12e3   :  { %v1983_v60 = vrot.slane %v1969_v55, %v5516_v23 }
0x12e5   :  { %v1975_v52 = vpop.permute.xlu0 %1974  ;;  %v1984_v47 = vsel %vm668_vm3, %v1983_v60, %v1979_v49 }
0x12e6   :  { %v1972_v44 = vpop.permute.xlu1 %1971  ;;  %v1992_v31 = vrot.slane %v1975_v52, %v5516_v23 }
0x12e7   :  { %v1988_v11 = vrot.slane %v1972_v44, %v6469_v21 }
0x12e9   :  { %v1993_v24 = vsel %vm668_vm3, %v1992_v31, %v1988_v11 }
0x12ea   :  { %v1861_v12 = vpop.permute.xlu1 %1860  ;;  %v1864_v34 = vpop.permute.xlu0 %1863  ;;  %v1994_v35 = vsel %vm679_vm4, %v1993_v24, %v1984_v47 }
0x12eb   :  { %v1996_v25 = vsel %vm682_vm5, %v1994_v35, 0.0  ;;  %v1874_v32 = vrot.slane %v1861_v12, %v6469_v21  ;;  %v1878_v20 = vrot.slane %v1864_v34, %v5516_v23 }
0x12ec   :  { %1997 = vadd.xlane.f32.xlu1 %v1996_v25 }
0x12ed   :  { %v1879_v60 = vsel %vm668_vm3, %v1878_v20, %v1874_v32 }
0x12ee   :  { %v1867_v15 = vpop.permute.xlu1 %1866  ;;  %v1870_v30 = vpop.permute.xlu0 %1869 }
0x12ef   :  { %v1883_v55 = vrot.slane %v1867_v15, %v6469_v21  ;;  %v1887_v52 = vrot.slane %v1870_v30, %v5516_v23 }
0x12f1   :  { %v1888_v49 = vsel %vm668_vm3, %v1887_v52, %v1883_v55 }
0x12f2   :  { %v1889_v44 = vsel %vm679_vm4, %v1888_v49, %v1879_v60 }
0x12f3   :  { %v1891_v31 = vsel %vm682_vm5, %v1889_v44, 0.0 }
0x12f4   :  { %1892 = vadd.xlane.f32.xlu0 %v1891_v31 }
0x1379   :  { %v1998_v11 = vpop.xlane.xlu1 %1997 }
0x137a   :  { %4945 = vrcp.f32 %v1998_v11 }
0x1381   :  { %v1893_v47 = vpop.xlane.xlu0 %1892 }
0x1382   :  { %4947 = vrcp.f32 %v1893_v47 }
0x1384   :  { %v4946_v24 = vpop.eup %4945 }
0x1385   :  { %v2004_v12 = vrot.slane %v4946_v24, %v5468_v38  ;;  %v2008_v25 = vrot.slane %v4946_v24, %v5535_v62 }
0x1387   :  { %v2012_v34 = vmul.f32 %v4932_v45, %v2004_v12  ;;  %v2011_v35 = vmul.f32 %v4930_v43, %v2004_v12  ;;  %v2013_v32 = vmul.f32 %v4936_v9, %v2008_v25  ;;  %v2014_v20 = vmul.f32 %v4934_v2, %v2008_v25 }
0x1389   :  { %2064 = vperm.xlu1 %4840, %v2012_v34   ;;  %2059 = vperm.xlu0 %4839, %v2011_v35  }
0x138c   :  { %v4948_v15 = vpop.eup %4947 }
0x138d   :  { %2069 = vperm.xlu1 %4840, %v2013_v32   ;;  %2074 = vperm.xlu0 %4839, %v2014_v20   ;;  %v1899_v30 = vrot.slane %v4948_v15, %v5468_v38  ;;  %v1903_v60 = vrot.slane %v4948_v15, %v5535_v62 }
0x138f   :  { %v1907_v55 = vmul.f32 %v4940_v22, %v1899_v30  ;;  %v1906_v52 = vmul.f32 %v4938_v51, %v1899_v30  ;;  %v1909_v49 = vmul.f32 %v4944_v40, %v1903_v60  ;;  %v1908_v45 = vmul.f32 %v4942_v18, %v1903_v60 }
0x1391   :  { %2022 = vperm.xlu0 %4839, %v1907_v55   ;;  %2017 = vperm.xlu1 %4840, %v1906_v52  }
0x1395   :  { %2032 = vperm.xlu0 %4839, %v1909_v49   ;;  %2027 = vperm.xlu1 %4840, %v1908_v45  }
0x1399   :  { %2110 = vrot.lane.b32.xlu0 %v5824_v4, %s5200_s28 }
0x1408   :  { %v2065_v43 = vpop.permute.xlu1 %2064  ;;  %v2060_v2 = vpop.permute.xlu0 %2059 }
0x1409   :  { %v2078_v9 = vmul.f32 %v2065_v43, %v5425_v10  ;;  %v2077_v44 = vmul.f32 %v2060_v2, %v5427_v13 }
0x140b   :  { %v2082_v22 = vsel %vm313_vm2, %v2078_v9, 0.0  ;;  %v2081_v51 = vsel %vm313_vm2, %v2077_v44, 0.0 }
0x140c   :  { %v2083_v31 = vadd.f32 %v2082_v22, %v2081_v51  ;;  %v2070_v11 = vpop.permute.xlu1 %2069  ;;  %v2075_v47 = vpop.permute.xlu0 %2074 }
0x140d   :  { %v2079_v18 = vmul.f32 %v2070_v11, %v5435_v19  ;;  %v2080_v40 = vmul.f32 %v2075_v47, %v6470_v56 }
0x140e   :  { %v2084_v24 = vrot.slane %v2083_v31, 4 }
0x140f   :  { %v2090_v12 = vsel %vm313_vm2, %v2079_v18, 0.0  ;;  %v2091_v34 = vsel %vm313_vm2, %v2080_v40, 0.0 }
0x1410   :  { %v2085_v35 = vadd.f32 %v2084_v24, %v2083_v31  ;;  %v2092_v25 = vadd.f32 %v2091_v34, %v2090_v12  ;;  %v2018_v9 = vpop.permute.xlu1 %2017  ;;  %v2023_v44 = vpop.permute.xlu0 %2022 }
0x1411   :  { %v2035_v47 = vmul.f32 %v2018_v9, %v5427_v13  ;;  %v2036_v18 = vmul.f32 %v2023_v44, %v5425_v10  ;;  %v1646_v44 = vld [vmem:[#allocation5 + $0x4] sm:$0x3] }
0x1412   :  { %v2086_v32 = vrot.slane %v2085_v35, 2  ;;  %v2093_v20 = vrot.slane %v2092_v25, 4 }
0x1413   :  { %v2039_v12 = vsel %vm313_vm2, %v2035_v47, 0.0  ;;  %v2040_v34 = vsel %vm313_vm2, %v2036_v18, 0.0 }
0x1414   :  { %v2094_v15 = vadd.f32 %v2093_v20, %v2092_v25  ;;  %v2087_v30 = vadd.f32 %v2086_v32, %v2085_v35  ;;  %v2028_v22 = vpop.permute.xlu1 %2027  ;;  %v2033_v51 = vpop.permute.xlu0 %2032  ;;  %v2041_v25 = vadd.f32 %v2040_v34, %v2039_v12 }
0x1415   :  { %v2037_v31 = vmul.f32 %v2028_v22, %v5435_v19  ;;  %v2038_v11 = vmul.f32 %v2033_v51, %v6470_v56 }
0x1416   :  { %v2095_v55 = vrot.slane %v2094_v15, 2  ;;  %v2088_v52 = vrot.slane %v2087_v30, 1  ;;  %v2042_v20 = vrot.slane %v2041_v25, 4 }
0x1417   :  { %v2048_v40 = vsel %vm313_vm2, %v2037_v31, 0.0  ;;  %v2049_v24 = vsel %vm313_vm2, %v2038_v11, 0.0 }
0x1418   :  { %v2096_v60 = vadd.f32 %v2095_v55, %v2094_v15  ;;  %v2089_v45 = vadd.f32 %v2088_v52, %v2087_v30  ;;  %v2050_v35 = vadd.f32 %v2049_v24, %v2048_v40  ;;  %v2043_v30 = vadd.f32 %v2042_v20, %v2041_v25  ;;  %v2111_v22 = vpop.permute.xlu0 %2110 }
0x1419   :  { %v2113_v47 = vsel %vm94_vm1, %v1646_v44, %v2111_v22 }
0x141a   :  { %v2097_v49 = vrot.slane %v2096_v60, 1  ;;  %v2051_v32 = vrot.slane %v2050_v35, 4  ;;  %v2044_v52 = vrot.slane %v2043_v30, 2 }
0x141c   :  { %v2098_v43 = vadd.f32 %v2097_v49, %v2096_v60  ;;  %v2052_v15 = vadd.f32 %v2051_v32, %v2050_v35  ;;  %v2045_v49 = vadd.f32 %v2044_v52, %v2043_v30 }
0x141e   :  { %v2105_v2 = vsel %vm679_vm4, %v2098_v43, %v2089_v45  ;;  %v2053_v55 = vrot.slane %v2052_v15, 2  ;;  %v2046_v43 = vrot.slane %v2045_v49, 1 }
0x141f   :  { %2106 = vrot.lane.b32.xlu1 %v2105_v2, %s5188_s19 }
0x1420   :  { %v2054_v60 = vadd.f32 %v2053_v55, %v2052_v15  ;;  %v2047_v9 = vadd.f32 %v2046_v43, %v2045_v49 }
0x1422   :  { %v2055_v45 = vrot.slane %v2054_v60, 1 }
0x1424   :  { %v2056_v2 = vadd.f32 %v2055_v45, %v2054_v60 }
0x1426   :  { %v2101_v31 = vsel %vm679_vm4, %v2056_v2, %v2047_v9 }
0x1491   :  { %v2107_v51 = vpop.permute.xlu1 %2106 }
0x1492   :  { %v2109_v11 = vsel %vm313_vm2, %v2101_v31, %v2107_v51  ;;  %v6483_v51 = vld [vmem:[#allocation20_spill] sm:$0xff]  ;;  %v6484_v31 = vld [vmem:[#allocation21_spill] sm:$0xff] }
0x1493   :  { %4131 = vmatprep.mubr.msk.f32.mxu0 %vm94_vm1, %v2109_v11 }
0x1494   :  { %2182 = vmatmul.mubr.f32.vlgmr.msra.gmra.mrb[10].mxu0 %v2113_v47  ;;  %v6485_v47 = vld [vmem:[#allocation12_spill] sm:$0xff] }
0x1495   :  { %4696 = vmatpush3.bf16.msra.mxu0 %v5372_v33  ;;  %4385 = vmatprep.mubr.msk.f32.mxu0 %vm5195_vm0, %v6467_v37 }
0x1496   :  { %4697 = vmatprep.subr.bf16.mxu0 %v6468_v0 }
0x1499   :  { %4699 = vmatpush3.bf16.msra.mxu0 %v5381_v36 }
0x149a   :  { %4700 = vmatprep.subr.bf16.mxu0 %v6468_v0 }
0x149d   :  { %4702 = vmatpush3.bf16.msra.mxu0 %v5397_v42 }
0x149e   :  { %4703 = vmatprep.subr.bf16.mxu0 %v6468_v0 }
0x14a1   :  { %4705 = vmatpush3.bf16.msra.mxu0 %v5413_v48 }
0x14a2   :  { %4707 = vmatprep.subr.bf16.mxu0 %v5563_v54 }
0x1567   :  { %v2183_v18 = vpop.f32.mrb[10].mxu0 }
0x1568   :  { %v2185_v40 = vpop.f32.mrb[11].mxu0  ;;  %v2184_v34 = vadd.f32 %v2183_v18, %v5679_v39 }
0x1569   :  { %v2186_v24 = vadd.f32 %v2185_v40, %v5674_v1 }
0x156a   :  { %v4132_v35 = vmul.f32 -1.442695, %v2184_v34 }
0x156b   :  { %4949 = vtanh.f32 %v2186_v24  ;;  %v4133_v45 = vmul.f32 -1.442695, %v2186_v24  ;;  %v6486_v24 = vld [vmem:[#allocation13_spill] sm:$0xff] }
0x156c   :  { %4951 = vpow2.f32 %v4132_v35 }
0x1575   :  { %v4950_v12 = vpop.eup %4949 }
0x1576   :  { %2203 = vrot.lane.b32.xlu1 %v4950_v12, %s5200_s28  ;;  %v4952_v25 = vpop.eup %4951 }
0x1577   :  { %v2194_v32 = vadd.f32 1.0, %v4952_v25 }
0x1579   :  { %4953 = vrcp.f32 %v2194_v32 }
0x1583   :  { %v4954_v20 = vpop.eup %4953 }
0x1584   :  { %v2201_v55 = vmul.f32 %v4954_v20, %v5820_v3  ;;  %v6482_v3 = vld [vmem:[#allocation19_spill] sm:$0xff] }
0x15e8   :  { %v2204_v15 = vpop.permute.xlu1 %2203 }
0x15e9   :  { %v2206_v30 = vmul.f32 %v4954_v20, %v2204_v15  ;;  %v6487_v15 = vld [vmem:[#allocation15_spill] sm:$0xff] }
0x15eb   :  { %2208 = vrot.lane.b32.xlu0 %v2206_v30, %s5200_s28 }
0x165d   :  { %v2209_v52 = vpop.permute.xlu0 %2208 }
0x165e   :  { %v5967_v60 = vadd.f32 %v2209_v52, %v2201_v55  ;;  %v6488_v55 = vld [vmem:[#allocation14_spill] sm:$0xff] }
0x1660   :  { %4955 = vtanh.f32 %v5967_v60 }
0x1661   :  { %4957 = vpow2.f32 %v4133_v45 }
0x166a   :  { %v4956_v49 = vpop.eup %4955 }
0x166b   :  { %2214 = vrot.lane.b32.xlu1 %v4956_v49, %s5200_s28  ;;  %v4958_v43 = vpop.eup %4957  ;;  %v6489_v49 = vld [vmem:[#allocation17_spill] sm:$0xff] }
0x166c   :  { %v2195_v2 = vadd.f32 1.0, %v4958_v43  ;;  %v6490_v43 = vld [vmem:[#allocation16_spill] sm:$0xff] }
0x166e   :  { %4959 = vrcp.f32 %v2195_v2 }
0x1678   :  { %v4960_v9 = vpop.eup %4959 }
0x16dd   :  { %v2215_v44 = vpop.permute.xlu1 %2214 }
0x16de   :  { %v5971_v22 = vmul.f32 %v4960_v9, %v2215_v44 }
0x16e0   :  { %6481 = vst [vmem:[#allocation23_spill] sm:$0xff] %v5971_v22  ;;  %4367 = vmatmul.mubr.msk.f32.vlgmr.msra.gmra.mrb[10].mxu1 %vm94_vm1, %v5971_v22 }
0x16e1   :  { %4649 = vmatpush1.bf16.msra.mxu1 %v5565_v57 }
0x16e2   :  { %4651 = vmatprep.subr.bf16.mxu1 %v5567_v58 }
0x16e5   :  { %4653 = vmatpush1.bf16.msra.mxu1 %v5572_v61 }
0x16e6   :  { %4655 = vmatprep.subr.bf16.mxu1 %v5575_v63 }
0x16e9   :  { %4657 = vmatpush1.bf16.msra.mxu1 %v5578_v6 }
0x16ea   :  { %4659 = vmatprep.subr.bf16.mxu1 %v5581_v7 }
0x16ed   :  { %4661 = vmatpush1.bf16.msra.mxu1 %v5584_v14 }
0x16ee   :  { %4663 = vmatprep.subr.bf16.mxu1 %v5587_v29 }
0x16f1   :  { %4665 = vmatpush1.bf16.msra.mxu1 %v5590_v27 }
0x16f2   :  { %4667 = vmatprep.subr.bf16.mxu1 %v5593_v28 }
0x16f5   :  { %4669 = vmatpush1.bf16.msra.mxu1 %v5596_v46 }
0x16f6   :  { %4671 = vmatprep.subr.bf16.mxu1 %v5599_v50 }
0x16f9   :  { %4673 = vmatpush1.bf16.msra.mxu1 %v5602_v26 }
0x16fa   :  { %4675 = vmatprep.subr.bf16.mxu1 %v5605_v53 }
0x16fd   :  { %4677 = vmatpush1.bf16.msra.mxu1 %v5608_v41 }
0x16fe   :  { %4679 = vmatprep.subr.bf16.mxu1 %v5611_v59 }
0x1701   :  { %4681 = vmatpush1.bf16.msra.mxu1 %v5614_v5 }
0x1702   :  { %4683 = vmatprep.subr.bf16.mxu1 %v5617_v8 }
0x1705   :  { %4685 = vmatpush1.bf16.msra.mxu1 %v5620_v16 }
0x1706   :  { %4687 = vmatprep.subr.bf16.mxu1 %v5623_v17 }
0x1709   :  { %4689 = vmatpush1.bf16.msra.mxu1 %v6482_v3 }
0x170a   :  { %4691 = vmatprep.subr.bf16.mxu1 %v6483_v51 }
0x170d   :  { %4693 = vmatpush1.bf16.msra.mxu1 %v6484_v31 }
0x170e   :  { %4754 = vmatprep.subr.bf16.mxu1 %v6468_v0 }
0x17b3   :  { %v2289_v11 = vpop.f32.mrb[10].mxu1 }
0x17b4   :  { %v2290_v18 = vadd.f32 %v6485_v47, %v2289_v11  ;;  %v4368_v40 = vpop.f32.mrb[11].mxu1  ;;  %v6491_v11 = vld [vmem:[#allocation22_spill] sm:$0xff] }
0x17b6   :  { %v2300_v12 = vrot.slane %v2290_v18, %v6486_v24 }
0x17b8   :  { %v2301_v34 = vcombine.high %v2300_v12, %v2300_v12  ;;  %v2308_v35 = vrot.slane %v2300_v12, %v6486_v24 }
0x17ba   :  { %v2315_v25 = vrot.slane %v2301_v34, %v6486_v24  ;;  %v2319_v32 = vrot.slane %v2308_v35, %v5468_v38 }
0x17bc   :  { %v2323_v20 = vrot.slane %v2315_v25, %v5468_v38  ;;  %v2326_v30 = vadd.f32 %v2319_v32, %v6487_v15  ;;  %v2327_v52 = vadd.f32 %v2319_v32, %v6488_v55 }
0x17be   :  { %v2328_v45 = vadd.f32 %v2323_v20, %v6489_v49  ;;  %v2329_v2 = vadd.f32 %v2323_v20, %v6490_v43  ;;  %4961 = vtanh.f32 %v2326_v30 }
0x17bf   :  { %4963 = vtanh.f32 %v2327_v52 }
0x17c0   :  { %4965 = vtanh.f32 %v2328_v45 }
0x17c1   :  { %4967 = vtanh.f32 %v2329_v2 }
0x17c8   :  { %v4962_v9 = vpop.eup %4961 }
0x17c9   :  { %v4964_v44 = vpop.eup %4963  ;;  %v2334_v47 = vmul.f32 %v6491_v11, %v4962_v9 }
0x17ca   :  { %v4966_v18 = vpop.eup %4965  ;;  %v2335_v40 = vmul.f32 %v6491_v11, %v4964_v44 }
0x17cb   :  { %v4968_v12 = vpop.eup %4967  ;;  %2354 = vrot.lane.b32.xlu0 %v2334_v47, %s5198_s27  ;;  %v2336_v34 = vmul.f32 %v6491_v11, %v4966_v18  ;;  %v2338_v9 = vsel %vm313_vm2, %v2334_v47, 0.0 }
0x17cc   :  { %2356 = vrot.lane.b32.xlu1 %v2335_v40, %s5198_s27  ;;  %v2337_v35 = vmul.f32 %v6491_v11, %v4968_v12  ;;  %v2341_v18 = vsel %vm313_vm2, %v2335_v40, 0.0 }
0x17cd   :  { %v2344_v11 = vsel %vm313_vm2, %v2336_v34, 0.0 }
0x17ce   :  { %v2347_v12 = vsel %vm313_vm2, %v2337_v35, 0.0 }
0x17cf   :  { %2358 = vrot.lane.b32.xlu0 %v2336_v34, %s5198_s27 }
0x17d0   :  { %2360 = vrot.lane.b32.xlu1 %v2337_v35, %s5198_s27 }
0x183d   :  { %v2355_v25 = vpop.permute.xlu0 %2354 }
0x183e   :  { %v2357_v32 = vpop.permute.xlu1 %2356  ;;  %v2366_v20 = vsel %vm313_vm2, %v2355_v25, 0.0 }
0x183f   :  { %v2369_v30 = vsel %vm313_vm2, %v2357_v32, 0.0  ;;  %2367 = vadd.xlane.f32.xlu0 %v2366_v20 }
0x1840   :  { %2370 = vadd.xlane.f32.xlu1 %v2369_v30 }
0x1841   :  { %v2359_v52 = vpop.permute.xlu0 %2358 }
0x1842   :  { %v2372_v45 = vsel %vm313_vm2, %v2359_v52, 0.0  ;;  %v2361_v2 = vpop.permute.xlu1 %2360 }
0x1843   :  { %2373 = vadd.xlane.f32.xlu0 %v2372_v45  ;;  %v2375_v44 = vsel %vm313_vm2, %v2361_v2, 0.0 }
0x1844   :  { %2339 = vadd.xlane.f32.xlu1 %v2338_v9 }
0x1847   :  { %2376 = vadd.xlane.f32.xlu0 %v2375_v44 }
0x1848   :  { %2345 = vadd.xlane.f32.xlu1 %v2344_v11 }
0x184b   :  { %2342 = vadd.xlane.f32.xlu0 %v2341_v18 }
0x184f   :  { %2348 = vadd.xlane.f32.xlu0 %v2347_v12 }
0x18cc   :  { %v2368_v25 = vpop.xlane.xlu0 %2367 }
0x18cd   :  { %v2371_v32 = vpop.xlane.xlu1 %2370  ;;  %v2490_v47 = vrot.slane %v2368_v25, %v6469_v21 }
0x18ce   :  { %v2494_v30 = vrot.slane %v2371_v32, %v5516_v23 }
0x18d0   :  { %v2374_v20 = vpop.xlane.xlu0 %2373  ;;  %v2495_v9 = vsel %vm668_vm3, %v2494_v30, %v2490_v47 }
0x18d1   :  { %v2340_v52 = vpop.xlane.xlu1 %2339  ;;  %v2499_v2 = vrot.slane %v2374_v20, %v6469_v21 }
0x18d2   :  { %v2385_v43 = vrot.slane %v2340_v52, %v6469_v21 }
0x18d4   :  { %v2377_v45 = vpop.xlane.xlu0 %2376 }
0x18d5   :  { %v2503_v34 = vrot.slane %v2377_v45, %v5516_v23  ;;  %v2346_v18 = vpop.xlane.xlu1 %2345 }
0x18d6   :  { %v2394_v49 = vrot.slane %v2346_v18, %v6469_v21 }
0x18d7   :  { %v2504_v40 = vsel %vm668_vm3, %v2503_v34, %v2499_v2 }
0x18d8   :  { %v2343_v44 = vpop.xlane.xlu0 %2342  ;;  %v2505_v35 = vsel %vm679_vm4, %v2504_v40, %v2495_v9 }
0x18d9   :  { %v2507_v11 = vsel %vm682_vm5, %v2505_v35, -inf  ;;  %v2389_v12 = vrot.slane %v2343_v44, %v5516_v23 }
0x18da   :  { %2508 = vmax.xlane.f32.xlu1 %v2507_v11 }
0x18db   :  { %v2390_v30 = vsel %vm668_vm3, %v2389_v12, %v2385_v43 }
0x18dc   :  { %v2349_v4 = vpop.xlane.xlu0 %2348 }
0x18dd   :  { %v2398_v55 = vrot.slane %v2349_v4, %v5516_v23 }
0x18df   :  { %v2399_v47 = vsel %vm668_vm3, %v2398_v55, %v2394_v49 }
0x18e0   :  { %v2400_v2 = vsel %vm679_vm4, %v2399_v47, %v2390_v30 }
0x18e1   :  { %v2402_v34 = vsel %vm682_vm5, %v2400_v2, -inf }
0x18e2   :  { %2403 = vmax.xlane.f32.xlu0 %v2402_v34 }
0x1967   :  { %v2509_v9 = vpop.xlane.xlu1 %2508 }
0x1968   :  { %v2514_v40 = vrot.slane %v2509_v9, %v5468_v38  ;;  %v2518_v35 = vrot.slane %v2509_v9, %v5535_v62 }
0x196a   :  { %v2521_v11 = vsub.f32 %v2368_v25, %v2514_v40  ;;  %v2522_v15 = vsub.f32 %v2371_v32, %v2514_v40  ;;  %v2523_v24 = vsub.f32 %v2374_v20, %v2518_v35  ;;  %v2524_v3 = vsub.f32 %v2377_v45, %v2518_v35 }
0x196c   :  { %v2525_v31 = vmul.f32 1.442695, %v2521_v11  ;;  %v2527_v51 = vmul.f32 1.442695, %v2522_v15  ;;  %v2529_v43 = vmul.f32 1.442695, %v2523_v24 }
0x196d   :  { %v2531_v30 = vmul.f32 1.442695, %v2524_v3 }
0x196e   :  { %4969 = vpow2.f32 %v2525_v31 }
0x196f   :  { %4971 = vpow2.f32 %v2527_v51  ;;  %v2404_v55 = vpop.xlane.xlu0 %2403 }
0x1970   :  { %v2409_v49 = vrot.slane %v2404_v55, %v5468_v38  ;;  %v2413_v12 = vrot.slane %v2404_v55, %v5535_v62  ;;  %4973 = vpow2.f32 %v2529_v43 }
0x1971   :  { %4975 = vpow2.f32 %v2531_v30 }
0x1972   :  { %v2416_v47 = vsub.f32 %v2340_v52, %v2409_v49  ;;  %v2417_v2 = vsub.f32 %v2343_v44, %v2409_v49  ;;  %v2418_v34 = vsub.f32 %v2346_v18, %v2413_v12  ;;  %v2419_v32 = vsub.f32 %v2349_v4, %v2413_v12 }
0x1974   :  { %v2420_v9 = vmul.f32 1.442695, %v2416_v47  ;;  %v2422_v25 = vmul.f32 1.442695, %v2417_v2  ;;  %v2424_v15 = vmul.f32 1.442695, %v2418_v34 }
0x1975   :  { %v2426_v51 = vmul.f32 1.442695, %v2419_v32 }
0x1976   :  { %4977 = vpow2.f32 %v2420_v9 }
0x1977   :  { %4979 = vpow2.f32 %v2422_v25 }
0x1978   :  { %v4970_v20 = vpop.eup %4969  ;;  %4981 = vpow2.f32 %v2424_v15 }
0x1979   :  { %v4972_v31 = vpop.eup %4971  ;;  %2538 = vperm.xlu1 %4840, %v4970_v20   ;;  %4983 = vpow2.f32 %v2426_v51 }
0x197a   :  { %2541 = vperm.xlu0 %4839, %v4972_v31   ;;  %v4974_v24 = vpop.eup %4973 }
0x197b   :  { %v4976_v3 = vpop.eup %4975 }
0x197d   :  { %2544 = vperm.xlu1 %4840, %v4974_v24  }
0x1980   :  { %v4978_v52 = vpop.eup %4977 }
0x1981   :  { %2433 = vperm.xlu0 %4839, %v4978_v52   ;;  %2547 = vperm.xlu1 %4840, %v4976_v3   ;;  %v4980_v45 = vpop.eup %4979 }
0x1982   :  { %v4982_v44 = vpop.eup %4981 }
0x1983   :  { %v4984_v4 = vpop.eup %4983 }
0x1985   :  { %2439 = vperm.xlu0 %4839, %v4982_v44   ;;  %2436 = vperm.xlu1 %4840, %v4980_v45  }
0x1989   :  { %2442 = vperm.xlu1 %4840, %v4984_v4  }
0x19f8   :  { %v2539_v18 = vpop.permute.xlu1 %2538 }
0x19f9   :  { %v2542_v40 = vpop.permute.xlu0 %2541  ;;  %v2552_v43 = vrot.slane %v2539_v18, %v6469_v21 }
0x19fa   :  { %v2556_v11 = vrot.slane %v2542_v40, %v5516_v23 }
0x19fc   :  { %v2545_v35 = vpop.permute.xlu1 %2544  ;;  %v2557_v47 = vsel %vm668_vm3, %v2556_v11, %v2552_v43 }
0x19fd   :  { %v2561_v12 = vrot.slane %v2545_v35, %v6469_v21 }
0x1a00   :  { %v2434_v55 = vpop.permute.xlu0 %2433  ;;  %v2548_v49 = vpop.permute.xlu1 %2547 }
0x1a01   :  { %v2565_v30 = vrot.slane %v2548_v49, %v5516_v23  ;;  %v2447_v18 = vrot.slane %v2434_v55, %v6469_v21 }
0x1a03   :  { %v2566_v2 = vsel %vm668_vm3, %v2565_v30, %v2561_v12 }
0x1a04   :  { %v2437_v34 = vpop.permute.xlu1 %2436  ;;  %v2567_v9 = vsel %vm679_vm4, %v2566_v2, %v2557_v47  ;;  %v2440_v32 = vpop.permute.xlu0 %2439 }
0x1a05   :  { %v2569_v25 = vsel %vm682_vm5, %v2567_v9, 0.0  ;;  %v2451_v15 = vrot.slane %v2437_v34, %v5516_v23  ;;  %v2456_v40 = vrot.slane %v2440_v32, %v6469_v21 }
0x1a06   :  { %2570 = vadd.xlane.f32.xlu0 %v2569_v25 }
0x1a07   :  { %v2452_v11 = vsel %vm668_vm3, %v2451_v15, %v2447_v18 }
0x1a08   :  { %v2443_v51 = vpop.permute.xlu1 %2442 }
0x1a09   :  { %v2460_v35 = vrot.slane %v2443_v51, %v5516_v23 }
0x1a0b   :  { %v2461_v43 = vsel %vm668_vm3, %v2460_v35, %v2456_v40 }
0x1a0c   :  { %v2462_v49 = vsel %vm679_vm4, %v2461_v43, %v2452_v11 }
0x1a0d   :  { %v2464_v12 = vsel %vm682_vm5, %v2462_v49, 0.0 }
0x1a0e   :  { %2465 = vadd.xlane.f32.xlu1 %v2464_v12 }
0x1a93   :  { %v2571_v30 = vpop.xlane.xlu0 %2570 }
0x1a94   :  { %4985 = vrcp.f32 %v2571_v30 }
0x1a9b   :  { %v2466_v47 = vpop.xlane.xlu1 %2465 }
0x1a9c   :  { %4987 = vrcp.f32 %v2466_v47 }
0x1a9e   :  { %v4986_v2 = vpop.eup %4985 }
0x1a9f   :  { %v2577_v55 = vrot.slane %v4986_v2, %v5468_v38  ;;  %v2581_v25 = vrot.slane %v4986_v2, %v5535_v62 }
0x1aa1   :  { %v2584_v34 = vmul.f32 %v4970_v20, %v2577_v55  ;;  %v2585_v9 = vmul.f32 %v4972_v31, %v2577_v55  ;;  %v2586_v32 = vmul.f32 %v4974_v24, %v2581_v25  ;;  %v2587_v15 = vmul.f32 %v4976_v3, %v2581_v25 }
0x1aa3   :  { %2632 = vperm.xlu0 %4839, %v2584_v34   ;;  %2637 = vperm.xlu1 %4840, %v2585_v9  }
0x1aa6   :  { %v4988_v51 = vpop.eup %4987 }
0x1aa7   :  { %2642 = vperm.xlu0 %4839, %v2586_v32   ;;  %2647 = vperm.xlu1 %4840, %v2587_v15   ;;  %v2472_v18 = vrot.slane %v4988_v51, %v5468_v38  ;;  %v2476_v11 = vrot.slane %v4988_v51, %v5535_v62 }
0x1aa9   :  { %v2480_v40 = vmul.f32 %v4980_v45, %v2472_v18  ;;  %v2479_v35 = vmul.f32 %v4978_v52, %v2472_v18  ;;  %v2482_v43 = vmul.f32 %v4984_v4, %v2476_v11  ;;  %v2481_v20 = vmul.f32 %v4982_v44, %v2476_v11 }
0x1aab   :  { %2595 = vperm.xlu1 %4840, %v2480_v40   ;;  %2590 = vperm.xlu0 %4839, %v2479_v35  }
0x1aaf   :  { %2605 = vperm.xlu1 %4840, %v2482_v43   ;;  %2600 = vperm.xlu0 %4839, %v2481_v20  }
0x1ab3   :  { %2683 = vrot.lane.b32.xlu1 %v5971_v22, %s5200_s28 }
0x1b22   :  { %v2633_v31 = vpop.permute.xlu0 %2632  ;;  %v2638_v24 = vpop.permute.xlu1 %2637 }
0x1b23   :  { %v2650_v3 = vmul.f32 %v2633_v31, %v5427_v13  ;;  %v2651_v49 = vmul.f32 %v2638_v24, %v5425_v10 }
0x1b25   :  { %v2654_v45 = vsel %vm313_vm2, %v2650_v3, 0.0  ;;  %v2655_v52 = vsel %vm313_vm2, %v2651_v49, 0.0 }
0x1b26   :  { %v2656_v12 = vadd.f32 %v2655_v52, %v2654_v45  ;;  %v2643_v30 = vpop.permute.xlu0 %2642  ;;  %v2648_v47 = vpop.permute.xlu1 %2647 }
0x1b27   :  { %v2652_v44 = vmul.f32 %v2643_v30, %v5435_v19  ;;  %v2653_v4 = vmul.f32 %v2648_v47, %v6470_v56 }
0x1b28   :  { %v2657_v2 = vrot.slane %v2656_v12, 4 }
0x1b29   :  { %v2663_v55 = vsel %vm313_vm2, %v2652_v44, 0.0  ;;  %v2664_v34 = vsel %vm313_vm2, %v2653_v4, 0.0 }
0x1b2a   :  { %v2658_v9 = vadd.f32 %v2657_v2, %v2656_v12  ;;  %v2665_v25 = vadd.f32 %v2664_v34, %v2663_v55  ;;  %v2591_v3 = vpop.permute.xlu0 %2590  ;;  %v2596_v49 = vpop.permute.xlu1 %2595 }
0x1b2b   :  { %v2608_v47 = vmul.f32 %v2591_v3, %v5427_v13  ;;  %v2609_v44 = vmul.f32 %v2596_v49, %v5425_v10  ;;  %v2219_v49 = vld [vmem:[#allocation5 + $0x6] sm:$0x3] }
0x1b2c   :  { %v2659_v32 = vrot.slane %v2658_v9, 2  ;;  %v2666_v15 = vrot.slane %v2665_v25, 4 }
0x1b2d   :  { %v2612_v55 = vsel %vm313_vm2, %v2608_v47, 0.0  ;;  %v2613_v34 = vsel %vm313_vm2, %v2609_v44, 0.0 }
0x1b2e   :  { %v2660_v51 = vadd.f32 %v2659_v32, %v2658_v9  ;;  %v2667_v18 = vadd.f32 %v2666_v15, %v2665_v25  ;;  %v2601_v45 = vpop.permute.xlu0 %2600  ;;  %v2606_v52 = vpop.permute.xlu1 %2605  ;;  %v2614_v25 = vadd.f32 %v2613_v34, %v2612_v55 }
0x1b2f   :  { %v2610_v12 = vmul.f32 %v2601_v45, %v5435_v19  ;;  %v2611_v30 = vmul.f32 %v2606_v52, %v6470_v56 }
0x1b30   :  { %v2668_v40 = vrot.slane %v2667_v18, 2  ;;  %v2661_v11 = vrot.slane %v2660_v51, 1  ;;  %v2615_v15 = vrot.slane %v2614_v25, 4 }
0x1b31   :  { %v2621_v4 = vsel %vm313_vm2, %v2610_v12, 0.0  ;;  %v2622_v2 = vsel %vm313_vm2, %v2611_v30, 0.0 }
0x1b32   :  { %v2669_v35 = vadd.f32 %v2668_v40, %v2667_v18  ;;  %v2662_v20 = vadd.f32 %v2661_v11, %v2660_v51  ;;  %v2623_v9 = vadd.f32 %v2622_v2, %v2621_v4  ;;  %v2616_v18 = vadd.f32 %v2615_v15, %v2614_v25  ;;  %v2684_v45 = vpop.permute.xlu1 %2683 }
0x1b33   :  { %v2686_v47 = vsel %vm94_vm1, %v2219_v49, %v2684_v45  ;;  %v6495_v45 = vld [vmem:[#allocation13_spill] sm:$0xff] }
0x1b34   :  { %v2670_v43 = vrot.slane %v2669_v35, 1  ;;  %v2624_v32 = vrot.slane %v2623_v9, 4 }
0x1b36   :  { %v2671_v31 = vadd.f32 %v2670_v43, %v2669_v35  ;;  %v2625_v51 = vadd.f32 %v2624_v32, %v2623_v9  ;;  %v2617_v35 = vrot.slane %v2616_v18, 2 }
0x1b38   :  { %v2678_v24 = vsel %vm679_vm4, %v2671_v31, %v2662_v20  ;;  %v2626_v40 = vrot.slane %v2625_v51, 2  ;;  %v2618_v43 = vadd.f32 %v2617_v35, %v2616_v18 }
0x1b39   :  { %2679 = vrot.lane.b32.xlu0 %v2678_v24, %s5188_s19 }
0x1b3a   :  { %v2627_v11 = vadd.f32 %v2626_v40, %v2625_v51  ;;  %v2619_v31 = vrot.slane %v2618_v43, 1 }
0x1b3c   :  { %v2628_v20 = vrot.slane %v2627_v11, 1  ;;  %v2620_v3 = vadd.f32 %v2619_v31, %v2618_v43  ;;  %v6493_v43 = vld [vmem:[#allocation20_spill] sm:$0xff] }
0x1b3e   :  { %v2629_v24 = vadd.f32 %v2628_v20, %v2627_v11  ;;  %v6494_v20 = vld [vmem:[#allocation21_spill] sm:$0xff] }
0x1b40   :  { %v2674_v12 = vsel %vm679_vm4, %v2629_v24, %v2620_v3  ;;  %v6138_v24 = vld [vmem:[%s6420_s8 + $0x3] ss:$0 sm:$0xff] }
0x1bab   :  { %v2680_v52 = vpop.permute.xlu0 %2679 }
0x1bac   :  { %v2682_v30 = vsel %vm313_vm2, %v2674_v12, %v2680_v52 }
0x1bad   :  { %4135 = vmatprep.mubr.msk.f32.mxu1 %vm94_vm1, %v2682_v30 }
0x1bae   :  { %2755 = vmatmul.mubr.f32.vlgmr.msra.gmra.mrb[12].mxu1 %v2686_v47 }
0x1baf   :  { %4756 = vmatpush3.bf16.msra.mxu1 %v5372_v33  ;;  %4404 = vmatprep.mubr.msk.f32.mxu1 %vm5195_vm0, %v6467_v37 }
0x1bb0   :  { %4757 = vmatprep.subr.bf16.mxu1 %v6468_v0 }
0x1bb3   :  { %4759 = vmatpush3.bf16.msra.mxu1 %v5381_v36 }
0x1bb4   :  { %4760 = vmatprep.subr.bf16.mxu1 %v6468_v0 }
0x1bb7   :  { %4762 = vmatpush3.bf16.msra.mxu1 %v5397_v42 }
0x1bb8   :  { %4763 = vmatprep.subr.bf16.mxu1 %v6468_v0 }
0x1bbb   :  { %4765 = vmatpush3.bf16.msra.mxu1 %v5413_v48 }
0x1bbc   :  { %4767 = vmatprep.subr.bf16.mxu1 %v5563_v54 }
0x1c81   :  { %v2756_v44 = vpop.f32.mrb[12].mxu1 }
0x1c82   :  { %v2758_v4 = vpop.f32.mrb[13].mxu1  ;;  %v2757_v36 = vadd.f32 %v2756_v44, %v5679_v39 }
0x1c83   :  { %v2759_v33 = vadd.f32 %v2758_v4, %v5674_v1 }
0x1c84   :  { %v4136_v2 = vmul.f32 -1.442695, %v2757_v36  ;;  %v6497_v36 = vld [vmem:[#allocation14_spill] sm:$0xff] }
0x1c85   :  { %4989 = vtanh.f32 %v2759_v33  ;;  %v4137_v15 = vmul.f32 -1.442695, %v2759_v33  ;;  %v6496_v33 = vld [vmem:[#allocation15_spill] sm:$0xff] }
0x1c86   :  { %4991 = vpow2.f32 %v4136_v2 }
0x1c8f   :  { %v4990_v37 = vpop.eup %4989 }
0x1c90   :  { %2776 = vrot.lane.b32.xlu0 %v4990_v37, %s5200_s28  ;;  %v4992_v55 = vpop.eup %4991 }
0x1c91   :  { %v2767_v42 = vadd.f32 1.0, %v4992_v55  ;;  %v6498_v55 = vld [vmem:[#allocation17_spill] sm:$0xff] }
0x1c93   :  { %4993 = vrcp.f32 %v2767_v42 }
0x1c9d   :  { %v4994_v0 = vpop.eup %4993 }
0x1c9e   :  { %v2774_v54 = vmul.f32 %v4994_v0, %v5967_v60  ;;  %v6492_v60 = vld [vmem:[#allocation19_spill] sm:$0xff] }
0x1d02   :  { %v2777_v34 = vpop.permute.xlu0 %2776 }
0x1d03   :  { %v2779_v48 = vmul.f32 %v4994_v0, %v2777_v34  ;;  %v6499_v0 = vld [vmem:[#allocation16_spill] sm:$0xff] }
0x1d05   :  { %2781 = vrot.lane.b32.xlu1 %v2779_v48, %s5200_s28 }
0x1d77   :  { %v2782_v9 = vpop.permute.xlu1 %2781 }
0x1d78   :  { %v6104_v25 = vadd.f32 %v2782_v9, %v2774_v54  ;;  %v6153_v9 = vld [vmem:[%s6420_s8 + $0x4] ss:$0 sm:$0xff] }
0x1d79   :  { %6500 = vst [vmem:[#allocation12_spill] sm:$0xff] %v6153_v9 }
0x1d7a   :  { %4995 = vtanh.f32 %v6104_v25 }
0x1d7b   :  { %4997 = vpow2.f32 %v4137_v15 }
0x1d84   :  { %v4996_v32 = vpop.eup %4995 }
0x1d85   :  { %2787 = vrot.lane.b32.xlu0 %v4996_v32, %s5200_s28  ;;  %v4998_v51 = vpop.eup %4997 }
0x1d86   :  { %v2768_v18 = vadd.f32 1.0, %v4998_v51 }
0x1d88   :  { %4999 = vrcp.f32 %v2768_v18 }
0x1d92   :  { %v5000_v40 = vpop.eup %4999 }
0x1df7   :  { %v2788_v35 = vpop.permute.xlu0 %2787 }
0x1df8   :  { %v6108_v11 = vmul.f32 %v5000_v40, %v2788_v35 }
0x1dfa   :  { %4386 = vmatmul.mubr.msk.f32.vlgmr.msra.gmra.mrb[12].mxu0 %vm94_vm1, %v6108_v11 }
0x1dfb   :  { %4709 = vmatpush1.bf16.msra.mxu0 %v5565_v57 }
0x1dfc   :  { %4711 = vmatprep.subr.bf16.mxu0 %v5567_v58 }
0x1dff   :  { %4713 = vmatpush1.bf16.msra.mxu0 %v5572_v61 }
0x1e00   :  { %4715 = vmatprep.subr.bf16.mxu0 %v5575_v63 }
0x1e03   :  { %4717 = vmatpush1.bf16.msra.mxu0 %v5578_v6 }
0x1e04   :  { %4719 = vmatprep.subr.bf16.mxu0 %v5581_v7 }
0x1e07   :  { %4721 = vmatpush1.bf16.msra.mxu0 %v5584_v14 }
0x1e08   :  { %4723 = vmatprep.subr.bf16.mxu0 %v5587_v29 }
0x1e0b   :  { %4725 = vmatpush1.bf16.msra.mxu0 %v5590_v27 }
0x1e0c   :  { %4727 = vmatprep.subr.bf16.mxu0 %v5593_v28 }
0x1e0f   :  { %4729 = vmatpush1.bf16.msra.mxu0 %v5596_v46 }
0x1e10   :  { %4731 = vmatprep.subr.bf16.mxu0 %v5599_v50 }
0x1e13   :  { %4733 = vmatpush1.bf16.msra.mxu0 %v5602_v26 }
0x1e14   :  { %4735 = vmatprep.subr.bf16.mxu0 %v5605_v53 }
0x1e17   :  { %4737 = vmatpush1.bf16.msra.mxu0 %v5608_v41 }
0x1e18   :  { %4739 = vmatprep.subr.bf16.mxu0 %v5611_v59 }
0x1e1b   :  { %4741 = vmatpush1.bf16.msra.mxu0 %v5614_v5 }
0x1e1c   :  { %4743 = vmatprep.subr.bf16.mxu0 %v5617_v8 }
0x1e1f   :  { %4745 = vmatpush1.bf16.msra.mxu0 %v5620_v16 }
0x1e20   :  { %4747 = vmatprep.subr.bf16.mxu0 %v5623_v17 }
0x1e23   :  { %4749 = vmatpush1.bf16.msra.mxu0 %v6492_v60 }
0x1e24   :  { %4751 = vmatprep.subr.bf16.mxu0 %v6493_v43 }
0x1e27   :  { %4753 = vmatpush1.bf16.msra.mxu0 %v6494_v20 }
0x1ecd   :  { %v2862_v31 = vpop.f32.mrb[12].mxu0 }
0x1ece   :  { %v2863_v3 = vadd.f32 %v6138_v24, %v2862_v31  ;;  %v4387_v49 = vpop.f32.mrb[13].mxu0 }
0x1ed0   :  { %v2873_v52 = vrot.slane %v2863_v3, %v6495_v45 }
0x1ed2   :  { %v2874_v12 = vcombine.high %v2873_v52, %v2873_v52  ;;  %v2881_v30 = vrot.slane %v2873_v52, %v6495_v45 }
0x1ed4   :  { %v2888_v47 = vrot.slane %v2874_v12, %v6495_v45  ;;  %v2892_v44 = vrot.slane %v2881_v30, %v5468_v38 }
0x1ed6   :  { %v2896_v4 = vrot.slane %v2888_v47, %v5468_v38  ;;  %v2899_v37 = vadd.f32 %v2892_v44, %v6496_v33  ;;  %v2900_v2 = vadd.f32 %v2892_v44, %v6497_v36 }
0x1ed8   :  { %v2901_v42 = vadd.f32 %v2896_v4, %v6498_v55  ;;  %v2902_v34 = vadd.f32 %v2896_v4, %v6499_v0  ;;  %5001 = vtanh.f32 %v2899_v37 }
0x1ed9   :  { %5003 = vtanh.f32 %v2900_v2 }
0x1eda   :  { %5005 = vtanh.f32 %v2901_v42 }
0x1edb   :  { %5007 = vtanh.f32 %v2902_v34 }
0x1ee2   :  { %v5002_v48 = vpop.eup %5001 }
0x1ee3   :  { %v5004_v54 = vpop.eup %5003  ;;  %v2907_v32 = vmul.f32 %v6153_v9, %v5002_v48 }
0x1ee4   :  { %v5006_v15 = vpop.eup %5005  ;;  %v2908_v51 = vmul.f32 %v6153_v9, %v5004_v54 }
0x1ee5   :  { %v5008_v18 = vpop.eup %5007  ;;  %2927 = vrot.lane.b32.xlu1 %v2907_v32, %s5198_s27  ;;  %v2909_v40 = vmul.f32 %v6153_v9, %v5006_v15  ;;  %v2911_v37 = vsel %vm313_vm2, %v2907_v32, 0.0 }
0x1ee6   :  { %2929 = vrot.lane.b32.xlu0 %v2908_v51, %s5198_s27  ;;  %v2910_v35 = vmul.f32 %v6153_v9, %v5008_v18  ;;  %v2914_v4 = vsel %vm313_vm2, %v2908_v51, 0.0 }
0x1ee7   :  { %v2917_v42 = vsel %vm313_vm2, %v2909_v40, 0.0 }
0x1ee8   :  { %v2920_v2 = vsel %vm313_vm2, %v2910_v35, 0.0 }
0x1ee9   :  { %2931 = vrot.lane.b32.xlu1 %v2909_v40, %s5198_s27 }
0x1eea   :  { %2933 = vrot.lane.b32.xlu0 %v2910_v35, %s5198_s27 }
0x1f57   :  { %v2928_v31 = vpop.permute.xlu1 %2927 }
0x1f58   :  { %v2930_v3 = vpop.permute.xlu0 %2929  ;;  %v2939_v49 = vsel %vm313_vm2, %v2928_v31, 0.0 }
0x1f59   :  { %v2942_v52 = vsel %vm313_vm2, %v2930_v3, 0.0  ;;  %2940 = vadd.xlane.f32.xlu1 %v2939_v49 }
0x1f5a   :  { %2943 = vadd.xlane.f32.xlu0 %v2942_v52 }
0x1f5b   :  { %v2932_v12 = vpop.permute.xlu1 %2931 }
0x1f5c   :  { %v2934_v30 = vpop.permute.xlu0 %2933  ;;  %v2945_v47 = vsel %vm313_vm2, %v2932_v12, 0.0 }
0x1f5d   :  { %v2948_v44 = vsel %vm313_vm2, %v2934_v30, 0.0 }
0x1f5e   :  { %2949 = vadd.xlane.f32.xlu1 %v2948_v44  ;;  %2946 = vadd.xlane.f32.xlu0 %v2945_v47 }
0x1f62   :  { %2915 = vadd.xlane.f32.xlu1 %v2914_v4  ;;  %2912 = vadd.xlane.f32.xlu0 %v2911_v37 }
0x1f66   :  { %2921 = vadd.xlane.f32.xlu1 %v2920_v2  ;;  %2918 = vadd.xlane.f32.xlu0 %v2917_v42 }
0x1fe6   :  { %v2941_v34 = vpop.xlane.xlu1 %2940 }
0x1fe7   :  { %v2944_v48 = vpop.xlane.xlu0 %2943  ;;  %v3063_v15 = vrot.slane %v2941_v34, %v6469_v21 }
0x1fe8   :  { %v3067_v54 = vrot.slane %v2944_v48, %v5516_v23 }
0x1fea   :  { %v3068_v3 = vsel %vm668_vm3, %v3067_v54, %v3063_v15 }
0x1feb   :  { %v2947_v18 = vpop.xlane.xlu0 %2946  ;;  %v2950_v31 = vpop.xlane.xlu1 %2949 }
0x1fec   :  { %v3072_v51 = vrot.slane %v2947_v18, %v6469_v21  ;;  %v3076_v32 = vrot.slane %v2950_v31, %v5516_v23 }
0x1fee   :  { %v3077_v35 = vsel %vm668_vm3, %v3076_v32, %v3072_v51 }
0x1fef   :  { %v2913_v49 = vpop.xlane.xlu0 %2912  ;;  %v2916_v40 = vpop.xlane.xlu1 %2915  ;;  %v3078_v52 = vsel %vm679_vm4, %v3077_v35, %v3068_v3 }
0x1ff0   :  { %v3080_v12 = vsel %vm682_vm5, %v3078_v52, -inf  ;;  %v2958_v30 = vrot.slane %v2913_v49, %v6469_v21  ;;  %v2962_v47 = vrot.slane %v2916_v40, %v5516_v23 }
0x1ff1   :  { %3081 = vmax.xlane.f32.xlu0 %v3080_v12 }
0x1ff2   :  { %v2963_v42 = vsel %vm668_vm3, %v2962_v47, %v2958_v30 }
0x1ff3   :  { %v2922_v44 = vpop.xlane.xlu1 %2921  ;;  %v2919_v4 = vpop.xlane.xlu0 %2918 }
0x1ff4   :  { %v2971_v37 = vrot.slane %v2922_v44, %v5516_v23  ;;  %v2967_v2 = vrot.slane %v2919_v4, %v6469_v21 }
0x1ff6   :  { %v2972_v54 = vsel %vm668_vm3, %v2971_v37, %v2967_v2 }
0x1ff7   :  { %v2973_v15 = vsel %vm679_vm4, %v2972_v54, %v2963_v42 }
0x1ff8   :  { %v2975_v51 = vsel %vm682_vm5, %v2973_v15, -inf }
0x1ff9   :  { %2976 = vmax.xlane.f32.xlu1 %v2975_v51 }
0x207e   :  { %v3082_v32 = vpop.xlane.xlu0 %3081 }
0x207f   :  { %v3087_v3 = vrot.slane %v3082_v32, %v5468_v38  ;;  %v3091_v35 = vrot.slane %v3082_v32, %v5535_v62 }
0x2081   :  { %v3094_v52 = vsub.f32 %v2941_v34, %v3087_v3  ;;  %v3095_v12 = vsub.f32 %v2944_v48, %v3087_v3  ;;  %v3097_v22 = vsub.f32 %v2950_v31, %v3091_v35  ;;  %v3096_v9 = vsub.f32 %v2947_v18, %v3091_v35 }
0x2083   :  { %v3098_v0 = vmul.f32 1.442695, %v3094_v52  ;;  %v3100_v55 = vmul.f32 1.442695, %v3095_v12  ;;  %v3104_v30 = vmul.f32 1.442695, %v3097_v22 }
0x2084   :  { %v3102_v47 = vmul.f32 1.442695, %v3096_v9 }
0x2085   :  { %5009 = vpow2.f32 %v3098_v0 }
0x2086   :  { %5011 = vpow2.f32 %v3100_v55  ;;  %v2977_v37 = vpop.xlane.xlu1 %2976 }
0x2087   :  { %v2982_v2 = vrot.slane %v2977_v37, %v5468_v38  ;;  %v2986_v42 = vrot.slane %v2977_v37, %v5535_v62  ;;  %5013 = vpow2.f32 %v3104_v30 }
0x2088   :  { %5015 = vpow2.f32 %v3102_v47 }
0x2089   :  { %v2989_v54 = vsub.f32 %v2913_v49, %v2982_v2  ;;  %v2990_v15 = vsub.f32 %v2916_v40, %v2982_v2  ;;  %v2991_v51 = vsub.f32 %v2919_v4, %v2986_v42  ;;  %v2992_v34 = vsub.f32 %v2922_v44, %v2986_v42 }
0x208b   :  { %v2993_v48 = vmul.f32 1.442695, %v2989_v54  ;;  %v2995_v31 = vmul.f32 1.442695, %v2990_v15  ;;  %v2997_v18 = vmul.f32 1.442695, %v2991_v51 }
0x208c   :  { %v2999_v0 = vmul.f32 1.442695, %v2992_v34 }
0x208d   :  { %5017 = vpow2.f32 %v2993_v48 }
0x208e   :  { %5019 = vpow2.f32 %v2995_v31 }
0x208f   :  { %v5010_v22 = vpop.eup %5009  ;;  %5021 = vpow2.f32 %v2997_v18 }
0x2090   :  { %v5012_v55 = vpop.eup %5011  ;;  %3111 = vperm.xlu0 %4839, %v5010_v22   ;;  %5023 = vpow2.f32 %v2999_v0 }
0x2091   :  { %3114 = vperm.xlu1 %4840, %v5012_v55   ;;  %v5014_v9 = vpop.eup %5013 }
0x2092   :  { %v5016_v32 = vpop.eup %5015 }
0x2094   :  { %3120 = vperm.xlu0 %4839, %v5014_v9  }
0x2095   :  { %3117 = vperm.xlu1 %4840, %v5016_v32  }
0x2097   :  { %v5018_v49 = vpop.eup %5017 }
0x2098   :  { %v5020_v40 = vpop.eup %5019 }
0x2099   :  { %3006 = vperm.xlu1 %4840, %v5018_v49   ;;  %3009 = vperm.xlu0 %4839, %v5020_v40   ;;  %v5022_v44 = vpop.eup %5021 }
0x209a   :  { %v5024_v4 = vpop.eup %5023 }
0x209d   :  { %3012 = vperm.xlu1 %4840, %v5022_v44   ;;  %3015 = vperm.xlu0 %4839, %v5024_v4  }
0x210f   :  { %v3112_v3 = vpop.permute.xlu0 %3111 }
0x2110   :  { %v3115_v35 = vpop.permute.xlu1 %3114  ;;  %v3125_v12 = vrot.slane %v3112_v3, %v6469_v21 }
0x2111   :  { %v3129_v52 = vrot.slane %v3115_v35, %v5516_v23 }
0x2113   :  { %v3121_v30 = vpop.permute.xlu0 %3120  ;;  %v3130_v42 = vsel %vm668_vm3, %v3129_v52, %v3125_v12 }
0x2114   :  { %v3118_v47 = vpop.permute.xlu1 %3117  ;;  %v3138_v37 = vrot.slane %v3121_v30, %v5516_v23 }
0x2115   :  { %v3134_v2 = vrot.slane %v3118_v47, %v6469_v21 }
0x2117   :  { %v3139_v54 = vsel %vm668_vm3, %v3138_v37, %v3134_v2 }
0x2118   :  { %v3007_v15 = vpop.permute.xlu1 %3006  ;;  %v3010_v51 = vpop.permute.xlu0 %3009  ;;  %v3140_v34 = vsel %vm679_vm4, %v3139_v54, %v3130_v42 }
0x2119   :  { %v3142_v48 = vsel %vm682_vm5, %v3140_v34, 0.0  ;;  %v3020_v31 = vrot.slane %v3007_v15, %v6469_v21  ;;  %v3024_v18 = vrot.slane %v3010_v51, %v5516_v23 }
0x211a   :  { %3143 = vadd.xlane.f32.xlu1 %v3142_v48 }
0x211b   :  { %v3025_v52 = vsel %vm668_vm3, %v3024_v18, %v3020_v31 }
0x211c   :  { %v3013_v0 = vpop.permute.xlu1 %3012  ;;  %v3016_v3 = vpop.permute.xlu0 %3015 }
0x211d   :  { %v3029_v35 = vrot.slane %v3013_v0, %v6469_v21  ;;  %v3033_v30 = vrot.slane %v3016_v3, %v5516_v23 }
0x211f   :  { %v3034_v12 = vsel %vm668_vm3, %v3033_v30, %v3029_v35 }
0x2120   :  { %v3035_v47 = vsel %vm679_vm4, %v3034_v12, %v3025_v52 }
0x2121   :  { %v3037_v37 = vsel %vm682_vm5, %v3035_v47, 0.0 }
0x2122   :  { %3038 = vadd.xlane.f32.xlu0 %v3037_v37 }
0x21a7   :  { %v3144_v2 = vpop.xlane.xlu1 %3143 }
0x21a8   :  { %5025 = vrcp.f32 %v3144_v2 }
0x21af   :  { %v3039_v42 = vpop.xlane.xlu0 %3038 }
0x21b0   :  { %5027 = vrcp.f32 %v3039_v42 }
0x21b2   :  { %v5026_v54 = vpop.eup %5025 }
0x21b3   :  { %v3150_v15 = vrot.slane %v5026_v54, %v5468_v38  ;;  %v3154_v48 = vrot.slane %v5026_v54, %v5535_v62 }
0x21b5   :  { %v3158_v51 = vmul.f32 %v5012_v55, %v3150_v15  ;;  %v3157_v34 = vmul.f32 %v5010_v22, %v3150_v15  ;;  %v3159_v31 = vmul.f32 %v5016_v32, %v3154_v48  ;;  %v3160_v18 = vmul.f32 %v5014_v9, %v3154_v48 }
0x21b7   :  { %3210 = vperm.xlu1 %4840, %v3158_v51   ;;  %3205 = vperm.xlu0 %4839, %v3157_v34  }
0x21ba   :  { %v5028_v0 = vpop.eup %5027 }
0x21bb   :  { %3215 = vperm.xlu1 %4840, %v3159_v31   ;;  %3220 = vperm.xlu0 %4839, %v3160_v18   ;;  %v3045_v3 = vrot.slane %v5028_v0, %v5468_v38  ;;  %v3049_v52 = vrot.slane %v5028_v0, %v5535_v62 }
0x21bd   :  { %v3053_v35 = vmul.f32 %v5020_v40, %v3045_v3  ;;  %v3052_v30 = vmul.f32 %v5018_v49, %v3045_v3  ;;  %v3055_v12 = vmul.f32 %v5024_v4, %v3049_v52  ;;  %v3054_v55 = vmul.f32 %v5022_v44, %v3049_v52 }
0x21bf   :  { %3168 = vperm.xlu0 %4839, %v3053_v35   ;;  %3163 = vperm.xlu1 %4840, %v3052_v30  }
0x21c3   :  { %3178 = vperm.xlu0 %4839, %v3055_v12   ;;  %3173 = vperm.xlu1 %4840, %v3054_v55  }
0x21c7   :  { %3256 = vrot.lane.b32.xlu0 %v6108_v11, %s5200_s28 }
0x2236   :  { %v3211_v22 = vpop.permute.xlu1 %3210  ;;  %v3206_v9 = vpop.permute.xlu0 %3205 }
0x2237   :  { %v3224_v32 = vmul.f32 %v3211_v22, %v5425_v10  ;;  %v3223_v47 = vmul.f32 %v3206_v9, %v5427_v13 }
0x2239   :  { %v3228_v40 = vsel %vm313_vm2, %v3224_v32, 0.0  ;;  %v3227_v49 = vsel %vm313_vm2, %v3223_v47, 0.0 }
0x223a   :  { %v3229_v37 = vadd.f32 %v3228_v40, %v3227_v49  ;;  %v3216_v2 = vpop.permute.xlu1 %3215  ;;  %v3221_v42 = vpop.permute.xlu0 %3220 }
0x223b   :  { %v3225_v44 = vmul.f32 %v3216_v2, %v5435_v19  ;;  %v3226_v4 = vmul.f32 %v3221_v42, %v6470_v56 }
0x223c   :  { %v3230_v54 = vrot.slane %v3229_v37, 4 }
0x223d   :  { %v3236_v15 = vsel %vm313_vm2, %v3225_v44, 0.0  ;;  %v3237_v51 = vsel %vm313_vm2, %v3226_v4, 0.0 }
0x223e   :  { %v3231_v34 = vadd.f32 %v3230_v54, %v3229_v37  ;;  %v3238_v48 = vadd.f32 %v3237_v51, %v3236_v15  ;;  %v3164_v32 = vpop.permute.xlu1 %3163  ;;  %v3169_v47 = vpop.permute.xlu0 %3168 }
0x223f   :  { %v3181_v42 = vmul.f32 %v3164_v32, %v5427_v13  ;;  %v3182_v44 = vmul.f32 %v3169_v47, %v5425_v10  ;;  %v2792_v47 = vld [vmem:[#allocation5 + $0x8] sm:$0x3] }
0x2240   :  { %v3232_v31 = vrot.slane %v3231_v34, 2  ;;  %v3239_v18 = vrot.slane %v3238_v48, 4 }
0x2241   :  { %v3185_v15 = vsel %vm313_vm2, %v3181_v42, 0.0  ;;  %v3186_v51 = vsel %vm313_vm2, %v3182_v44, 0.0 }
0x2242   :  { %v3233_v0 = vadd.f32 %v3232_v31, %v3231_v34  ;;  %v3240_v3 = vadd.f32 %v3239_v18, %v3238_v48  ;;  %v3174_v40 = vpop.permute.xlu1 %3173  ;;  %v3179_v49 = vpop.permute.xlu0 %3178  ;;  %v3187_v48 = vadd.f32 %v3186_v51, %v3185_v15 }
0x2243   :  { %v3183_v37 = vmul.f32 %v3174_v40, %v5435_v19  ;;  %v3184_v2 = vmul.f32 %v3179_v49, %v6470_v56 }
0x2244   :  { %v3241_v35 = vrot.slane %v3240_v3, 2  ;;  %v3234_v52 = vrot.slane %v3233_v0, 1  ;;  %v3188_v18 = vrot.slane %v3187_v48, 4 }
0x2245   :  { %v3194_v4 = vsel %vm313_vm2, %v3183_v37, 0.0  ;;  %v3195_v54 = vsel %vm313_vm2, %v3184_v2, 0.0 }
0x2246   :  { %v3242_v30 = vadd.f32 %v3241_v35, %v3240_v3  ;;  %v3235_v55 = vadd.f32 %v3234_v52, %v3233_v0  ;;  %v3196_v34 = vadd.f32 %v3195_v54, %v3194_v4  ;;  %v3189_v3 = vadd.f32 %v3188_v18, %v3187_v48  ;;  %v3257_v40 = vpop.permute.xlu0 %3256 }
0x2247   :  { %v3259_v42 = vsel %vm94_vm1, %v2792_v47, %v3257_v40 }
0x2248   :  { %v3243_v12 = vrot.slane %v3242_v30, 1  ;;  %v3197_v31 = vrot.slane %v3196_v34, 4 }
0x224a   :  { %v3244_v22 = vadd.f32 %v3243_v12, %v3242_v30  ;;  %v3198_v0 = vadd.f32 %v3197_v31, %v3196_v34  ;;  %v3190_v30 = vrot.slane %v3189_v3, 2 }
0x224c   :  { %v3251_v9 = vsel %vm679_vm4, %v3244_v22, %v3235_v55  ;;  %v3199_v35 = vrot.slane %v3198_v0, 2  ;;  %v3191_v12 = vadd.f32 %v3190_v30, %v3189_v3 }
0x224d   :  { %3252 = vrot.lane.b32.xlu1 %v3251_v9, %s5188_s19 }
0x224e   :  { %v3200_v52 = vadd.f32 %v3199_v35, %v3198_v0  ;;  %v3192_v22 = vrot.slane %v3191_v12, 1 }
0x2250   :  { %v3201_v55 = vrot.slane %v3200_v52, 1  ;;  %v3193_v32 = vadd.f32 %v3192_v22, %v3191_v12 }
0x2252   :  { %v3202_v9 = vadd.f32 %v3201_v55, %v3200_v52 }
0x2254   :  { %v3247_v37 = vsel %vm679_vm4, %v3202_v9, %v3193_v32 }
0x22bf   :  { %v3253_v49 = vpop.permute.xlu1 %3252 }
0x22c0   :  { %v3255_v2 = vsel %vm313_vm2, %v3247_v37, %v3253_v49 }
0x22c1   :  { %4139 = vmatprep.mubr.msk.f32.mxu0 %vm94_vm1, %v3255_v2 }
0x22c2   :  { %3328 = vmatmul.mubr.f32.vlgmr.msra.gmra.mrb[14].mxu0 %v3259_v42 }
0x2395   :  { %v3329_v44 = vpop.f32.mrb[14].mxu0 }
0x2396   :  { %v3331_v4 = vpop.f32.mrb[15].mxu0  ;;  %v3330_v51 = vadd.f32 %v3329_v44, %v5679_v39 }
0x2397   :  { %v3332_v54 = vadd.f32 %v3331_v4, %v5674_v1 }
0x2398   :  { %v4140_v34 = vmul.f32 -1.442695, %v3330_v51 }
0x2399   :  { %5029 = vtanh.f32 %v3332_v54  ;;  %v4141_v55 = vmul.f32 -1.442695, %v3332_v54 }
0x239a   :  { %5031 = vpow2.f32 %v4140_v34 }
0x23a3   :  { %v5030_v15 = vpop.eup %5029 }
0x23a4   :  { %3349 = vrot.lane.b32.xlu1 %v5030_v15, %s5200_s28  ;;  %v5032_v48 = vpop.eup %5031 }
0x23a5   :  { %v3340_v31 = vadd.f32 1.0, %v5032_v48 }
0x23a7   :  { %5033 = vrcp.f32 %v3340_v31 }
0x23b1   :  { %v5034_v18 = vpop.eup %5033 }
0x23b2   :  { %v3347_v35 = vmul.f32 %v5034_v18, %v6104_v25 }
0x2416   :  { %v3350_v0 = vpop.permute.xlu1 %3349 }
0x2417   :  { %v3352_v3 = vmul.f32 %v5034_v18, %v3350_v0 }
0x2419   :  { %3354 = vrot.lane.b32.xlu0 %v3352_v3, %s5200_s28 }
0x248b   :  { %v3355_v30 = vpop.permute.xlu0 %3354 }
0x248c   :  { %v6240_v52 = vadd.f32 %v3355_v30, %v3347_v35 }
0x248e   :  { %5035 = vtanh.f32 %v6240_v52 }
0x248f   :  { %5037 = vpow2.f32 %v4141_v55 }
0x2498   :  { %v5036_v12 = vpop.eup %5035 }
0x2499   :  { %3360 = vrot.lane.b32.xlu1 %v5036_v12, %s5200_s28  ;;  %v5038_v22 = vpop.eup %5037 }
0x249a   :  { %v3341_v9 = vadd.f32 1.0, %v5038_v22 }
0x249c   :  { %5039 = vrcp.f32 %v3341_v9 }
0x24a6   :  { %v5040_v32 = vpop.eup %5039 }
0x250b   :  { %v3361_v47 = vpop.permute.xlu1 %3360 }
0x250c   :  { %v6244_v40 = vmul.f32 %v5040_v32, %v3361_v47 }
0x250e   :  { %4405 = vmatmul.mubr.msk.f32.vlgmr.msra.gmra.mrb[14].mxu1 %vm94_vm1, %v6244_v40 }
0x250f   :  { %4769 = vmatpush1.bf16.msra.mxu1 %v5565_v57 }
0x2510   :  { %4771 = vmatprep.subr.bf16.mxu1 %v5567_v58 }
0x2513   :  { %4773 = vmatpush1.bf16.msra.mxu1 %v5572_v61 }
0x2514   :  { %4775 = vmatprep.subr.bf16.mxu1 %v5575_v63 }
0x2517   :  { %4777 = vmatpush1.bf16.msra.mxu1 %v5578_v6 }
0x2518   :  { %4779 = vmatprep.subr.bf16.mxu1 %v5581_v7 }
0x251b   :  { %4781 = vmatpush1.bf16.msra.mxu1 %v5584_v14 }
0x251c   :  { %4783 = vmatprep.subr.bf16.mxu1 %v5587_v29 }
0x251f   :  { %4785 = vmatpush1.bf16.msra.mxu1 %v5590_v27 }
0x2520   :  { %4787 = vmatprep.subr.bf16.mxu1 %v5593_v28 }
0x2523   :  { %4789 = vmatpush1.bf16.msra.mxu1 %v5596_v46 }
0x2524   :  { %4791 = vmatprep.subr.bf16.mxu1 %v5599_v50  ;;  %v6501_v50 = vld [vmem:[#allocation17_spill] sm:$0xff] }
0x2527   :  { %4793 = vmatpush1.bf16.msra.mxu1 %v5602_v26 }
0x2528   :  { %4795 = vmatprep.subr.bf16.mxu1 %v5605_v53  ;;  %v6502_v53 = vld [vmem:[#allocation16_spill] sm:$0xff] }
0x252b   :  { %4797 = vmatpush1.bf16.msra.mxu1 %v5608_v41 }
0x252c   :  { %4799 = vmatprep.subr.bf16.mxu1 %v5611_v59 }
0x252f   :  { %4801 = vmatpush1.bf16.msra.mxu1 %v5614_v5 }
0x2530   :  { %4803 = vmatprep.subr.bf16.mxu1 %v5617_v8  ;;  %v6503_v8 = vld [vmem:[#allocation12_spill] sm:$0xff] }
0x2533   :  { %4805 = vmatpush1.bf16.msra.mxu1 %v5620_v16 }
0x2534   :  { %4807 = vmatprep.subr.bf16.mxu1 %v5623_v17 }
0x2537   :  { %4809 = vmatpush1.bf16.msra.mxu1 %v6492_v60 }
0x2538   :  { %4811 = vmatprep.subr.bf16.mxu1 %v6493_v43 }
0x253b   :  { %4813 = vmatpush1.bf16.msra.mxu1 %v6494_v20 }
0x25e1   :  { %v3435_v57 = vpop.f32.mrb[14].mxu1 }
0x25e2   :  { %v3436_v58 = vadd.f32 %v6138_v24, %v3435_v57  ;;  %v4406_v61 = vpop.f32.mrb[15].mxu1 }
0x25e4   :  { %v3446_v63 = vrot.slane %v3436_v58, %v6495_v45 }
0x25e6   :  { %v3447_v6 = vcombine.high %v3446_v63, %v3446_v63  ;;  %v3454_v7 = vrot.slane %v3446_v63, %v6495_v45 }
0x25e8   :  { %v3461_v14 = vrot.slane %v3447_v6, %v6495_v45  ;;  %v3465_v29 = vrot.slane %v3454_v7, %v5468_v38 }
0x25ea   :  { %v3469_v27 = vrot.slane %v3461_v14, %v5468_v38  ;;  %v3472_v28 = vadd.f32 %v3465_v29, %v6496_v33  ;;  %v3473_v46 = vadd.f32 %v3465_v29, %v6497_v36 }
0x25ec   :  { %v3474_v26 = vadd.f32 %v3469_v27, %v6501_v50  ;;  %v3475_v41 = vadd.f32 %v3469_v27, %v6502_v53  ;;  %5041 = vtanh.f32 %v3472_v28 }
0x25ed   :  { %5043 = vtanh.f32 %v3473_v46 }
0x25ee   :  { %5045 = vtanh.f32 %v3474_v26 }
0x25ef   :  { %5047 = vtanh.f32 %v3475_v41 }
0x25f6   :  { %v5042_v59 = vpop.eup %5041 }
0x25f7   :  { %v5044_v5 = vpop.eup %5043  ;;  %v3480_v16 = vmul.f32 %v6503_v8, %v5042_v59 }
0x25f8   :  { %v5046_v17 = vpop.eup %5045  ;;  %v3481_v25 = vmul.f32 %v6503_v8, %v5044_v5 }
0x25f9   :  { %v5048_v60 = vpop.eup %5047  ;;  %3500 = vrot.lane.b32.xlu0 %v3480_v16, %s5198_s27  ;;  %v3482_v43 = vmul.f32 %v6503_v8, %v5046_v17  ;;  %v3484_v42 = vsel %vm313_vm2, %v3480_v16, 0.0 }
0x25fa   :  { %3502 = vrot.lane.b32.xlu1 %v3481_v25, %s5198_s27  ;;  %v3483_v20 = vmul.f32 %v6503_v8, %v5048_v60  ;;  %v3487_v54 = vsel %vm313_vm2, %v3481_v25, 0.0 }
0x25fb   :  { %v3490_v4 = vsel %vm313_vm2, %v3482_v43, 0.0 }
0x25fc   :  { %v3493_v15 = vsel %vm313_vm2, %v3483_v20, 0.0 }
0x25fd   :  { %3504 = vrot.lane.b32.xlu0 %v3482_v43, %s5198_s27 }
0x25fe   :  { %3506 = vrot.lane.b32.xlu1 %v3483_v20, %s5198_s27 }
0x266b   :  { %v3501_v24 = vpop.permute.xlu0 %3500 }
0x266c   :  { %v3503_v45 = vpop.permute.xlu1 %3502  ;;  %v3512_v33 = vsel %vm313_vm2, %v3501_v24, 0.0 }
0x266d   :  { %v3515_v36 = vsel %vm313_vm2, %v3503_v45, 0.0  ;;  %3513 = vadd.xlane.f32.xlu0 %v3512_v33 }
0x266e   :  { %3516 = vadd.xlane.f32.xlu1 %v3515_v36 }
0x266f   :  { %v3505_v49 = vpop.permute.xlu0 %3504 }
0x2670   :  { %v3518_v37 = vsel %vm313_vm2, %v3505_v49, 0.0  ;;  %v3507_v2 = vpop.permute.xlu1 %3506 }
0x2671   :  { %3519 = vadd.xlane.f32.xlu0 %v3518_v37  ;;  %v3521_v44 = vsel %vm313_vm2, %v3507_v2, 0.0 }
0x2672   :  { %3485 = vadd.xlane.f32.xlu1 %v3484_v42 }
0x2675   :  { %3522 = vadd.xlane.f32.xlu0 %v3521_v44 }
0x2676   :  { %3491 = vadd.xlane.f32.xlu1 %v3490_v4 }
0x2679   :  { %3488 = vadd.xlane.f32.xlu0 %v3487_v54 }
0x267d   :  { %3494 = vadd.xlane.f32.xlu0 %v3493_v15 }
0x26fa   :  { %v3514_v51 = vpop.xlane.xlu0 %3513 }
0x26fb   :  { %v3517_v34 = vpop.xlane.xlu1 %3516  ;;  %v3636_v18 = vrot.slane %v3514_v51, %v6469_v21 }
0x26fc   :  { %v3640_v31 = vrot.slane %v3517_v34, %v5516_v23 }
0x26fe   :  { %v3520_v48 = vpop.xlane.xlu0 %3519  ;;  %v3641_v12 = vsel %vm668_vm3, %v3640_v31, %v3636_v18 }
0x26ff   :  { %v3486_v0 = vpop.xlane.xlu1 %3485  ;;  %v3645_v35 = vrot.slane %v3520_v48, %v6469_v21 }
0x2700   :  { %v3531_v61 = vrot.slane %v3486_v0, %v6469_v21 }
0x2702   :  { %v3523_v3 = vpop.xlane.xlu0 %3522 }
0x2703   :  { %v3649_v30 = vrot.slane %v3523_v3, %v5516_v23  ;;  %v3492_v47 = vpop.xlane.xlu1 %3491 }
0x2704   :  { %v3540_v63 = vrot.slane %v3492_v47, %v6469_v21 }
0x2705   :  { %v3650_v55 = vsel %vm668_vm3, %v3649_v30, %v3645_v35 }
0x2706   :  { %v3489_v22 = vpop.xlane.xlu0 %3488  ;;  %v3651_v9 = vsel %vm679_vm4, %v3650_v55, %v3641_v12 }
0x2707   :  { %v3653_v32 = vsel %vm682_vm5, %v3651_v9, -inf  ;;  %v3535_v57 = vrot.slane %v3489_v22, %v5516_v23 }
0x2708   :  { %3654 = vmax.xlane.f32.xlu1 %v3653_v32 }
0x2709   :  { %v3536_v7 = vsel %vm668_vm3, %v3535_v57, %v3531_v61 }
0x270a   :  { %v3495_v58 = vpop.xlane.xlu0 %3494 }
0x270b   :  { %v3544_v6 = vrot.slane %v3495_v58, %v5516_v23 }
0x270d   :  { %v3545_v14 = vsel %vm668_vm3, %v3544_v6, %v3540_v63 }
0x270e   :  { %v3546_v29 = vsel %vm679_vm4, %v3545_v14, %v3536_v7 }
0x270f   :  { %v3548_v27 = vsel %vm682_vm5, %v3546_v29, -inf }
0x2710   :  { %3549 = vmax.xlane.f32.xlu0 %v3548_v27 }
0x2795   :  { %v3655_v28 = vpop.xlane.xlu1 %3654 }
0x2796   :  { %v3660_v46 = vrot.slane %v3655_v28, %v5468_v38  ;;  %v3664_v50 = vrot.slane %v3655_v28, %v5535_v62 }
0x2798   :  { %v3667_v26 = vsub.f32 %v3514_v51, %v3660_v46  ;;  %v3668_v53 = vsub.f32 %v3517_v34, %v3660_v46  ;;  %v3669_v41 = vsub.f32 %v3520_v48, %v3664_v50  ;;  %v3670_v8 = vsub.f32 %v3523_v3, %v3664_v50 }
0x279a   :  { %v3671_v59 = vmul.f32 1.442695, %v3667_v26  ;;  %v3673_v5 = vmul.f32 1.442695, %v3668_v53  ;;  %v3675_v16 = vmul.f32 1.442695, %v3669_v41 }
0x279b   :  { %v3677_v43 = vmul.f32 1.442695, %v3670_v8 }
0x279c   :  { %5049 = vpow2.f32 %v3671_v59 }
0x279d   :  { %5051 = vpow2.f32 %v3673_v5  ;;  %v3550_v17 = vpop.xlane.xlu0 %3549 }
0x279e   :  { %v3555_v25 = vrot.slane %v3550_v17, %v5468_v38  ;;  %v3559_v60 = vrot.slane %v3550_v17, %v5535_v62  ;;  %5053 = vpow2.f32 %v3675_v16 }
0x279f   :  { %5055 = vpow2.f32 %v3677_v43 }
0x27a0   :  { %v3562_v20 = vsub.f32 %v3486_v0, %v3555_v25  ;;  %v3563_v24 = vsub.f32 %v3489_v22, %v3555_v25  ;;  %v3564_v45 = vsub.f32 %v3492_v47, %v3559_v60  ;;  %v3565_v49 = vsub.f32 %v3495_v58, %v3559_v60 }
0x27a2   :  { %v3566_v33 = vmul.f32 1.442695, %v3562_v20  ;;  %v3568_v36 = vmul.f32 1.442695, %v3563_v24  ;;  %v3570_v37 = vmul.f32 1.442695, %v3564_v45 }
0x27a3   :  { %v3572_v44 = vmul.f32 1.442695, %v3565_v49 }
0x27a4   :  { %5057 = vpow2.f32 %v3566_v33 }
0x27a5   :  { %5059 = vpow2.f32 %v3568_v36 }
0x27a6   :  { %v5050_v2 = vpop.eup %5049  ;;  %5061 = vpow2.f32 %v3570_v37 }
0x27a7   :  { %v5052_v42 = vpop.eup %5051  ;;  %3684 = vperm.xlu1 %4840, %v5050_v2   ;;  %5063 = vpow2.f32 %v3572_v44 }
0x27a8   :  { %3687 = vperm.xlu0 %4839, %v5052_v42   ;;  %v5054_v4 = vpop.eup %5053 }
0x27a9   :  { %v5056_v54 = vpop.eup %5055 }
0x27ab   :  { %3690 = vperm.xlu1 %4840, %v5054_v4  }
0x27ae   :  { %v5058_v15 = vpop.eup %5057 }
0x27af   :  { %3579 = vperm.xlu0 %4839, %v5058_v15   ;;  %3693 = vperm.xlu1 %4840, %v5056_v54   ;;  %v5060_v51 = vpop.eup %5059 }
0x27b0   :  { %v5062_v34 = vpop.eup %5061 }
0x27b1   :  { %v5064_v48 = vpop.eup %5063 }
0x27b3   :  { %3585 = vperm.xlu0 %4839, %v5062_v34   ;;  %3582 = vperm.xlu1 %4840, %v5060_v51  }
0x27b7   :  { %3588 = vperm.xlu1 %4840, %v5064_v48  }
0x2826   :  { %v3685_v31 = vpop.permute.xlu1 %3684 }
0x2827   :  { %v3688_v18 = vpop.permute.xlu0 %3687  ;;  %v3698_v35 = vrot.slane %v3685_v31, %v6469_v21 }
0x2828   :  { %v3702_v3 = vrot.slane %v3688_v18, %v5516_v23 }
0x282a   :  { %v3691_v0 = vpop.permute.xlu1 %3690  ;;  %v3703_v9 = vsel %vm668_vm3, %v3702_v3, %v3698_v35 }
0x282b   :  { %v3707_v55 = vrot.slane %v3691_v0, %v6469_v21 }
0x282e   :  { %v3580_v30 = vpop.permute.xlu0 %3579  ;;  %v3694_v12 = vpop.permute.xlu1 %3693 }
0x282f   :  { %v3711_v22 = vrot.slane %v3694_v12, %v5516_v23  ;;  %v3593_v7 = vrot.slane %v3580_v30, %v6469_v21 }
0x2831   :  { %v3712_v32 = vsel %vm668_vm3, %v3711_v22, %v3707_v55 }
0x2832   :  { %v3583_v47 = vpop.permute.xlu1 %3582  ;;  %v3713_v57 = vsel %vm679_vm4, %v3712_v32, %v3703_v9  ;;  %v3586_v61 = vpop.permute.xlu0 %3585 }
0x2833   :  { %v3715_v58 = vsel %vm682_vm5, %v3713_v57, 0.0  ;;  %v3597_v63 = vrot.slane %v3583_v47, %v5516_v23  ;;  %v3602_v14 = vrot.slane %v3586_v61, %v6469_v21 }
0x2834   :  { %3716 = vadd.xlane.f32.xlu0 %v3715_v58 }
0x2835   :  { %v3598_v27 = vsel %vm668_vm3, %v3597_v63, %v3593_v7 }
0x2836   :  { %v3589_v6 = vpop.permute.xlu1 %3588 }
0x2837   :  { %v3606_v29 = vrot.slane %v3589_v6, %v5516_v23 }
0x2839   :  { %v3607_v28 = vsel %vm668_vm3, %v3606_v29, %v3602_v14 }
0x283a   :  { %v3608_v46 = vsel %vm679_vm4, %v3607_v28, %v3598_v27 }
0x283b   :  { %v3610_v50 = vsel %vm682_vm5, %v3608_v46, 0.0 }
0x283c   :  { %3611 = vadd.xlane.f32.xlu1 %v3610_v50 }
0x28c1   :  { %v3717_v26 = vpop.xlane.xlu0 %3716 }
0x28c2   :  { %5065 = vrcp.f32 %v3717_v26 }
0x28c9   :  { %v3612_v53 = vpop.xlane.xlu1 %3611 }
0x28ca   :  { %5067 = vrcp.f32 %v3612_v53 }
0x28cc   :  { %v5066_v41 = vpop.eup %5065 }
0x28cd   :  { %v3723_v59 = vrot.slane %v5066_v41, %v5468_v38  ;;  %v3727_v23 = vrot.slane %v5066_v41, %v5535_v62 }
0x28cf   :  { %v3730_v5 = vmul.f32 %v5050_v2, %v3723_v59  ;;  %v3731_v21 = vmul.f32 %v5052_v42, %v3723_v59  ;;  %v3732_v8 = vmul.f32 %v5054_v4, %v3727_v23  ;;  %v3733_v16 = vmul.f32 %v5056_v54, %v3727_v23 }
0x28d1   :  { %3778 = vperm.xlu0 %4839, %v3730_v5   ;;  %3783 = vperm.xlu1 %4840, %v3731_v21  }
0x28d4   :  { %v5068_v17 = vpop.eup %5067 }
0x28d5   :  { %3788 = vperm.xlu0 %4839, %v3732_v8   ;;  %3793 = vperm.xlu1 %4840, %v3733_v16   ;;  %v3618_v25 = vrot.slane %v5068_v17, %v5468_v38  ;;  %v3622_v20 = vrot.slane %v5068_v17, %v5535_v62 }
0x28d7   :  { %v3626_v60 = vmul.f32 %v5060_v51, %v3618_v25  ;;  %v3625_v43 = vmul.f32 %v5058_v15, %v3618_v25  ;;  %v3628_v24 = vmul.f32 %v5064_v48, %v3622_v20  ;;  %v3627_v45 = vmul.f32 %v5062_v34, %v3622_v20  ;;  %v3365_v25 = vld [vmem:[#allocation5 + $0xa] sm:$0x3] }
0x28d9   :  { %3741 = vperm.xlu1 %4840, %v3626_v60   ;;  %3736 = vperm.xlu0 %4839, %v3625_v43  }
0x28dd   :  { %3751 = vperm.xlu1 %4840, %v3628_v24   ;;  %3746 = vperm.xlu0 %4839, %v3627_v45  }
0x28e1   :  { %3829 = vrot.lane.b32.xlu1 %v6244_v40, %s5200_s28 }
0x2950   :  { %v3779_v33 = vpop.permute.xlu0 %3778  ;;  %v3784_v36 = vpop.permute.xlu1 %3783 }
0x2951   :  { %v3796_v49 = vmul.f32 %v3779_v33, %v5427_v13  ;;  %v3797_v37 = vmul.f32 %v3784_v36, %v5425_v10 }
0x2953   :  { %v3800_v38 = vsel %vm313_vm2, %v3796_v49, 0.0  ;;  %v3801_v2 = vsel %vm313_vm2, %v3797_v37, 0.0 }
0x2954   :  { %v3802_v62 = vadd.f32 %v3801_v2, %v3800_v38  ;;  %v3789_v42 = vpop.permute.xlu0 %3788  ;;  %v3794_v44 = vpop.permute.xlu1 %3793 }
0x2955   :  { %v3798_v4 = vmul.f32 %v3789_v42, %v5435_v19  ;;  %v3799_v54 = vmul.f32 %v3794_v44, %v6470_v56 }
0x2956   :  { %v3803_v15 = vrot.slane %v3802_v62, 4 }
0x2957   :  { %v3809_v51 = vsel %vm313_vm2, %v3798_v4, 0.0  ;;  %v3810_v34 = vsel %vm313_vm2, %v3799_v54, 0.0 }
0x2958   :  { %v3804_v48 = vadd.f32 %v3803_v15, %v3802_v62  ;;  %v3811_v31 = vadd.f32 %v3810_v34, %v3809_v51  ;;  %v3737_v57 = vpop.permute.xlu0 %3736  ;;  %v3742_v58 = vpop.permute.xlu1 %3741  ;;  %v3974_v34 = vld [vmem:[%s6419_s7 + $0x8] sm:$0xff] }
0x2959   :  { %v3754_v14 = vmul.f32 %v3737_v57, %v5427_v13  ;;  %v3755_v29 = vmul.f32 %v3742_v58, %v5425_v10 }
0x295a   :  { %v3805_v18 = vrot.slane %v3804_v48, 2  ;;  %v3812_v0 = vrot.slane %v3811_v31, 4 }
0x295b   :  { %v3758_v46 = vsel %vm313_vm2, %v3754_v14, 0.0  ;;  %v3759_v50 = vsel %vm313_vm2, %v3755_v29, 0.0 }
0x295c   :  { %v3806_v3 = vadd.f32 %v3805_v18, %v3804_v48  ;;  %v3813_v35 = vadd.f32 %v3812_v0, %v3811_v31  ;;  %v3747_v61 = vpop.permute.xlu0 %3746  ;;  %v3752_v63 = vpop.permute.xlu1 %3751  ;;  %v3760_v53 = vadd.f32 %v3759_v50, %v3758_v46 }
0x295d   :  { %v3756_v6 = vmul.f32 %v3747_v61, %v5435_v19  ;;  %v3757_v7 = vmul.f32 %v3752_v63, %v6470_v56 }
0x295e   :  { %v3814_v30 = vrot.slane %v3813_v35, 2  ;;  %v3807_v55 = vrot.slane %v3806_v3, 1  ;;  %v3761_v59 = vrot.slane %v3760_v53, 4 }
0x295f   :  { %v3767_v27 = vsel %vm313_vm2, %v3756_v6, 0.0  ;;  %v3768_v28 = vsel %vm313_vm2, %v3757_v7, 0.0 }
0x2960   :  { %v3815_v12 = vadd.f32 %v3814_v30, %v3813_v35  ;;  %v3808_v9 = vadd.f32 %v3807_v55, %v3806_v3  ;;  %v3769_v26 = vadd.f32 %v3768_v28, %v3767_v27  ;;  %v3762_v19 = vadd.f32 %v3761_v59, %v3760_v53  ;;  %v3830_v60 = vpop.permute.xlu1 %3829  ;;  %v3975_v35 = vld [vmem:[%s6419_s7 + $0x10] sm:$0xff]  ;;  %v3976_v30 = vld [vmem:[%s6419_s7 + $0x18] sm:$0xff] }
0x2961   :  { %v3832_v45 = vsel %vm94_vm1, %v3365_v25, %v3830_v60 }
0x2962   :  { %v3816_v22 = vrot.slane %v3815_v12, 1  ;;  %v3770_v41 = vrot.slane %v3769_v26, 4  ;;  %v3763_v56 = vrot.slane %v3762_v19, 2 }
0x2964   :  { %v3817_v32 = vadd.f32 %v3816_v22, %v3815_v12  ;;  %v3771_v5 = vadd.f32 %v3770_v41, %v3769_v26  ;;  %v3764_v13 = vadd.f32 %v3763_v56, %v3762_v19  ;;  %v4818_v12 = vpack.c.bf16 %v3976_v30, %v3975_v35 }
0x2966   :  { %v3824_v47 = vsel %vm679_vm4, %v3817_v32, %v3808_v9  ;;  %v3772_v21 = vrot.slane %v3771_v5, 2  ;;  %v3765_v10 = vrot.slane %v3764_v13, 1  ;;  %v6505_v32 = vld [vmem:[#allocation18_spill] sm:$0xff] }
0x2967   :  { %3825 = vrot.lane.b32.xlu0 %v3824_v47, %s5188_s19 }
0x2968   :  { %v3773_v23 = vadd.f32 %v3772_v21, %v3771_v5  ;;  %v3766_v17 = vadd.f32 %v3765_v10, %v3764_v13 }
0x296a   :  { %v3774_v8 = vrot.slane %v3773_v23, 1 }
0x296c   :  { %v3775_v16 = vadd.f32 %v3774_v8, %v3773_v23 }
0x296e   :  { %v3820_v20 = vsel %vm679_vm4, %v3775_v16, %v3766_v17 }
0x29d9   :  { %v3826_v43 = vpop.permute.xlu0 %3825 }
0x29da   :  { %v3828_v24 = vsel %vm313_vm2, %v3820_v20, %v3826_v43 }
0x29db   :  { %4143 = vmatprep.mubr.msk.f32.mxu1 %vm94_vm1, %v3828_v24 }
0x29dc   :  { %3901 = vmatmul.mubr.f32.vlgmr.msra.gmra.mrb[16].mxu1 %v3832_v45 }
0x2aaf   :  { %v3902_v33 = vpop.f32.mrb[16].mxu1 }
0x2ab0   :  { %v3904_v36 = vpop.f32.mrb[17].mxu1  ;;  %v3903_v38 = vadd.f32 %v3902_v33, %v5679_v39  ;;  %v3973_v39 = vld [vmem:[%s6419_s7] sm:$0xff] }
0x2ab1   :  { %v3905_v49 = vadd.f32 %v3904_v36, %v5674_v1  ;;  %v4814_v48 = vpack.c.bf16 %v3974_v34, %v3973_v39 }
0x2ab2   :  { %v4144_v2 = vmul.f32 -1.442695, %v3903_v38 }
0x2ab3   :  { %5069 = vtanh.f32 %v3905_v49  ;;  %4815 = vmatprep.subr.bf16.mxu0 %v4814_v48  ;;  %v4145_v18 = vmul.f32 -1.442695, %v3905_v49 }
0x2ab4   :  { %5071 = vpow2.f32 %v4144_v2  ;;  %4817 = vmatpush3.bf16.msra.mxu0 %v4814_v48 }
0x2ab5   :  { %4819 = vmatprep.subr.bf16.mxu0 %v4818_v12 }
0x2ab8   :  { %4821 = vmatpush3.bf16.msra.mxu0 %v4818_v12 }
0x2abd   :  { %v5070_v37 = vpop.eup %5069 }
0x2abe   :  { %3922 = vrot.lane.b32.xlu0 %v5070_v37, %s5200_s28  ;;  %v5072_v62 = vpop.eup %5071 }
0x2abf   :  { %v3913_v42 = vadd.f32 1.0, %v5072_v62 }
0x2ac1   :  { %5073 = vrcp.f32 %v3913_v42 }
0x2acb   :  { %v5074_v44 = vpop.eup %5073 }
0x2acc   :  { %v3920_v1 = vmul.f32 %v5074_v44, %v6240_v52  ;;  %v6504_v52 = vld [vmem:[#allocation23_spill] sm:$0xff] }
0x2b30   :  { %v3923_v4 = vpop.permute.xlu0 %3922 }
0x2b31   :  { %v3925_v54 = vmul.f32 %v5074_v44, %v3923_v4 }
0x2b33   :  { %3927 = vrot.lane.b32.xlu1 %v3925_v54, %s5200_s28 }
0x2b37   :  { %3942 = vrot.lane.b32.xlu1 %v6244_v40, %s5198_s27 }
0x2ba5   :  { %v3928_v15 = vpop.permute.xlu1 %3927 }
0x2ba6   :  { %v3930_v51 = vadd.f32 %v3928_v15, %v3920_v1 }
0x2ba8   :  { %5075 = vtanh.f32 %v3930_v51 }
0x2ba9   :  { %5077 = vpow2.f32 %v4145_v18  ;;  %v3943_v57 = vpop.permute.xlu1 %3942 }
0x2baa   :  { %v3945_v61 = vadd.f32 %v3943_v57, %v6504_v52 }
0x2bac   :  { %v3959_v14 = vrot.slane %v3945_v61, 6 }
0x2bb2   :  { %v5076_v31 = vpop.eup %5075 }
0x2bb3   :  { %3933 = vrot.lane.b32.xlu0 %v5076_v31, %s5200_s28  ;;  %v5078_v0 = vpop.eup %5077 }
0x2bb4   :  { %v3914_v3 = vadd.f32 1.0, %v5078_v0 }
0x2bb6   :  { %5079 = vrcp.f32 %v3914_v3 }
0x2bb7   :  { %3946 = vrot.lane.b32.xlu0 %v6108_v11, %s5198_s27 }
0x2bbb   :  { %3950 = vrot.lane.b32.xlu0 %v6504_v52, %s5198_s27 }
0x2bc0   :  { %v5080_v55 = vpop.eup %5079 }
0x2c25   :  { %v3934_v22 = vpop.permute.xlu0 %3933 }
0x2c26   :  { %v3936_v9 = vmul.f32 %v5080_v55, %v3934_v22 }
0x2c28   :  { %3938 = vrot.lane.b32.xlu1 %v3936_v9, %s5198_s27 }
0x2c29   :  { %v3947_v47 = vpop.permute.xlu0 %3946 }
0x2c2a   :  { %v3949_v63 = vadd.f32 %v3947_v47, %v6108_v11  ;;  %v4146_v11 = vld [vmem:[%s6420_s8 + $0x7] ss:$0 sm:$0xff]  ;;  %s5201_s8 = smov [#allocation8]  }
0x2c2b   :  { %s4095_s21 = sshll.u32 %s5201_s8, 4  ;;  %s4096_s21 = int_to_ptr.vmem [resolvable:$true] %s4095_s21 }
0x2c2c   :  { %3954 = vrot.lane.b32.xlu1 %v6505_v32, %s5198_s27  ;;  %v3962_v27 = vrot.slane %v3949_v63, 4  ;;  %s5159_s22 = scalar_lea.vmem %s4096_s21, 256  ;;  %p5164_p11 = scmp.lt.s32.totalorder %s4096_s21, %s4096_s21 }
0x2c2d   :  { %v3951_v58 = vpop.permute.xlu0 %3950  ;;  %p5160_p10 = scmp.ne.s32.totalorder %s4096_s21, %s5159_s22  ;;  %p5165_p12 = scmp.lt.s32.totalorder %s5159_s22, %s5159_s22 }
0x2c2e   :  { %v3953_v6 = vadd.f32 %v3951_v58, %v6244_v40 }
0x2c2f   :  { %p5166_p13 = por %p5165_p12, %p5164_p11 }
0x2c30   :  { %v3965_v28 = vrot.slane %v3953_v6, 2 }
0x2c31   :  { %p5167_p0 = pnand %p5166_p13, %p5160_p10 }
0x2c9a   :  { %v3939_v7 = vpop.permute.xlu1 %3938 }
0x2c9b   :  { %v3941_v29 = vadd.f32 %v3939_v7, %v6505_v32 }
0x2c9d   :  { %v3968_v46 = vsel %vm3967_vm6, %v3941_v29, %v3959_v14 }
0x2c9e   :  { %v3955_v50 = vpop.permute.xlu1 %3954  ;;  %v3970_v26 = vsel %vm3969_vm7, %v3968_v46, %v3962_v27 }
0x2c9f   :  { %v3957_v53 = vadd.f32 %v3955_v50, %v3936_v9  ;;  %v3972_v41 = vsel %vm3971_vm8, %v3970_v26, %v3965_v28 }
0x2ca0   :  { %4415 = vmatprep.mubr.msk.f32.mxu0 %vm313_vm2, %v3972_v41 }
0x2ca1   :  { %4416 = vmatmul.mubr.msk.f32.vlgmr.msra.gmra.mrb[16].mxu0 %vm313_vm2, %v3957_v53 }
0x2d74   :  { %v4417_v40 = vpop.f32.mrb[16].mxu0 }
0x2d75   :  { %v4061_v59 = vadd.f32 %v4417_v40, %v4146_v11  ;;  %v4055_v5 = vpop.f32.mrb[17].mxu0 }
0x2d76   :  { %v4056_v19 = vadd.f32 %v4146_v11, %v4055_v5 }
0x2d77   :  { %v4066_v21 = vsel %vm3967_vm6, %v4061_v59, -inf }
0x2d78   :  { %4067 = vmax.xlane.f32.xlu1 %v4066_v21  ;;  %4064 = vmax.xlane.f32.xlu0 %v4056_v19 }
0x2e05   :  { %v4068_v56 = vpop.xlane.xlu1 %4067  ;;  %v4065_v23 = vpop.xlane.xlu0 %4064 }
0x2e06   :  { %v4070_v13 = vsub.f32 %v4061_v59, %v4068_v56  ;;  %v4069_v8 = vsub.f32 %v4056_v19, %v4065_v23 }
0x2e08   :  { %v4073_v10 = vmul.f32 1.442695, %v4070_v13  ;;  %v4071_v16 = vmul.f32 1.442695, %v4069_v8 }
0x2e0a   :  { %5081 = vpow2.f32 %v4071_v16 }
0x2e0b   :  { %5083 = vpow2.f32 %v4073_v10 }
0x2e14   :  { %v5082_v17 = vpop.eup %5081 }
0x2e15   :  { %v5084_v25 = vpop.eup %5083  ;;  %4075 = vadd.xlane.f32.xlu0 %v5082_v17 }
0x2e16   :  { %v4077_v60 = vsel %vm3967_vm6, %v5084_v25, 0.0 }
0x2e19   :  { %4078 = vadd.xlane.f32.xlu0 %v4077_v60 }
0x2ea2   :  { %v4076_v43 = vpop.xlane.xlu0 %4075 }
0x2ea3   :  { %5085 = vlog2.f32 %v4076_v43 }
0x2ea6   :  { %v4079_v20 = vpop.xlane.xlu0 %4078 }
0x2ea7   :  { %5087 = vlog2.f32 %v4079_v20 }
0x2ead   :  { %v5086_v24 = vpop.eup %5085 }
0x2eae   :  { %v4081_v45 = vmul.f32 0.6931472, %v5086_v24 }
0x2eb0   :  { %v4084_v33 = vadd.f32 %v4081_v45, %v4065_v23 }
0x2eb1   :  { %v5088_v36 = vpop.eup %5087 }
0x2eb2   :  { %v4086_v49 = vsub.f32 %v4056_v19, %v4084_v33  ;;  %v4083_v37 = vmul.f32 0.6931472, %v5088_v36 }
0x2eb4   :  { %4088 = vst [vmem:[#allocation8] sm:$0xff] %v4086_v49  ;;  %v4085_v38 = vadd.f32 %v4083_v37, %v4068_v56 }
0x2eb6   :  { %v4087_v2 = vsub.f32 %v4061_v59, %v4085_v38 }
0x2eb8   :  { %4089 = vst [vmem:[#allocation8 + $0x8] sm:$0x3] %v4087_v2 }
0x2eb9   :  { %5170 = shalt.err (!%p5167_p0)
}
0x2eba   :  { %s5171_s24 = scalar_lea.hbm %s6421_s9, 256 }
0x2ebb   :  { %p5172_p1 = scmp.ne.s32.totalorder %s6421_s9, %s5171_s24  ;;  %p5175_p2 = scmp.lt.u32.totalorder %s5171_s24, %s6421_s9 }
0x2ebd   :  { %p5177_p3 = pnand %p5175_p2, %p5172_p1 }
0x2ebf   :  { %5180 = shalt.err (!%p5177_p3)
}
0x2ec0   :  { %s5202_s29 = smov 128   ;;  %s5203_s30 = smov 8  }
0x2ec1   :  { %4101 = dma.vmem_to_hbm [thread:$0]  %s4096_s21, 256, %s6421_s9, [#allocation4], %s5202_s29, %s5202_s29, %s5203_s30  }
0x2ec2   :  { %5185 = dma.done.wait [#allocation4], 256  }
0x2ec3   :  { %5186 = vsyncadd [#allocation4], 4294967040 }
0x2ec4   :  { %4105 = vsyncpa [#allocation3], 1 }
0x2ec5   :  { %4106 = vsyncpa [#allocation6], 1 }
0x2ec6   :  { %4107 = vsyncpa [#allocation4], 1 }

</bundles_post_ra>
